<compile_context>
chip_gen: v6e
topology: v6e:2x2x1
jax: 0.10.0
libtpu: 0.0.40
codegen_flags: <defaults>
</compile_context>

<pallas_src>
import jax
import jax.numpy as jnp
from jax import lax
from jax.experimental import pallas as pl
from jax.experimental.pallas import tpu as pltpu


# ------------------------------ fused kernel ---------------------------------
def _fused_rcnn_kernel(x_ref, wbb_ref, bbb_ref, wcat_ref,
                       sel_cls_ref, sel_box_ref, bcls_ref, bbox_ref,
                       cls_ref, box_ref):
    # x_ref:       (B*HW, Cin)      channels-last flattened input rows
    # wbb_ref:     (Cin, Cout)      frozen 1x1-conv weight
    # bbb_ref:     (1, Cout)        frozen 1x1-conv bias
    # wcat_ref:    (Cout, HW*J)     concatenated cls+rpn weight, lane-dense layout
    # sel_cls_ref: (HW*J, n_cls)    0/1 selector: column (hw*J + j) -> j (cls part)
    # sel_box_ref: (HW*J, n_box)    0/1 selector: column (hw*J + j) -> j (box part)
    # bcls_ref:    (1, n_cls)       classifier bias
    # bbox_ref:    (1, n_box)       rpn bias
    # cls_ref:     (B, n_cls)       output
    # box_ref:     (B, n_box)       output
    bhw = x_ref.shape[0]
    b = cls_ref.shape[0]
    hwj = wcat_ref.shape[1]
    hw = bhw // b
    jdim = hwj // hw

    # --- backbone: 1x1 conv + ReLU (rows = (batch, spatial), cols = channel) --
    feat = jnp.dot(x_ref[...], wbb_ref[...], preferred_element_type=jnp.float32)
    feat = jnp.maximum(feat + bbb_ref[...], 0.0)                      # (BHW, Cout)

    # --- both heads in one MXU matmul against the lane-dense weight tile -----
    g = jnp.dot(feat, wcat_ref[...], preferred_element_type=jnp.float32)  # (BHW, HW*J)

    # keep only the J-wide column block that matches each row's spatial index
    p = lax.broadcasted_iota(jnp.int32, (bhw, hwj), 0)                # row index
    q = lax.broadcasted_iota(jnp.int32, (bhw, hwj), 1)                # col index
    hw_p = p
    for _ in range(b - 1):                                            # p % HW (no int div)
        hw_p = jnp.where(hw_p >= hw, hw_p - hw, hw_p)
    lo = hw_p * jdim
    g = jnp.where((q >= lo) & (q < lo + jdim), g, 0.0)

    # fold the (hw, j) column index back to j: per-(row, j) contributions
    r_cls = jnp.dot(g, sel_cls_ref[...], preferred_element_type=jnp.float32)  # (BHW, n_cls)
    r_box = jnp.dot(g, sel_box_ref[...], preferred_element_type=jnp.float32)  # (BHW, n_box)

    # sum the HW rows belonging to each batch element
    bi = lax.broadcasted_iota(jnp.int32, (b, bhw), 0)
    pi = lax.broadcasted_iota(jnp.int32, (b, bhw), 1)
    bsel = ((pi >= bi * hw) & (pi < (bi + 1) * hw)).astype(jnp.float32)       # (B, BHW)

    cls_ref[...] = jnp.dot(bsel, r_cls, preferred_element_type=jnp.float32) + bcls_ref[...]
    box_ref[...] = jnp.dot(bsel, r_box, preferred_element_type=jnp.float32) + bbox_ref[...]


# --------------------- one-time (init) weight preparation --------------------
def prepare_params(params, H, W):
    """Frozen weights: concatenate + reshape the heads once, build selectors."""
    Cin, Cout = params["w_bb"].shape
    HW = H * W
    n_cls = params["w_cls"].shape[1]
    n_box = params["w_rpn"].shape[1]
    J = n_cls + n_box
    K = Cout * HW
    assert params["w_cls"].shape[0] == K and params["w_rpn"].shape[0] == K

    # combined head weight, rows ordered c*HW + hw (PyTorch CHW flatten order)
    w_comb = jnp.concatenate([params["w_cls"], params["w_rpn"]], axis=1)   # (K, J)
    # lane-dense layout used by the kernel: column index = hw*J + j
    wcat = w_comb.reshape(Cout, HW * J)

    # 0/1 selector folding column (hw*J + j) -> j
    qmod = jnp.arange(HW * J, dtype=jnp.int32) % J
    sel = (qmod[:, None] == jnp.arange(J, dtype=jnp.int32)[None, :]).astype(jnp.float32)

    return {
        "w_bb": params["w_bb"],
        "b_bb": params["b_bb"].reshape(1, Cout),
        "wcat": wcat,
        "sel_cls": sel[:, :n_cls],
        "sel_box": sel[:, n_cls:],
        "b_cls": params["b_cls"].reshape(1, n_cls),
        "b_rpn": params["b_rpn"].reshape(1, n_box),
    }


# --------------------------------- forward -----------------------------------
def rcnn_forward(x, prep):
    B, Cin, H, W = x.shape
    HW = H * W
    Cout = prep["w_bb"].shape[1]
    HWJ = prep["wcat"].shape[1]
    n_cls = prep["b_cls"].shape[1]
    n_box = prep["b_rpn"].shape[1]

    # channels-last flattened view of the (tiny, 1.5 KB) input
    x2d = jnp.transpose(x, (0, 2, 3, 1)).reshape(B * HW, Cin)

    def full(shape):
        return pl.BlockSpec(shape, lambda i: (0, 0))

    class_id, box = pl.pallas_call(
        _fused_rcnn_kernel,
        out_shape=(
            jax.ShapeDtypeStruct((B, n_cls), jnp.float32),
            jax.ShapeDtypeStruct((B, n_box), jnp.float32),
        ),
        grid=(1,),
        in_specs=[
            full((B * HW, Cin)),
            full((Cin, Cout)),
            full((1, Cout)),
            full((Cout, HWJ)),
            full((HWJ, n_cls)),
            full((HWJ, n_box)),
            full((1, n_cls)),
            full((1, n_box)),
        ],
        out_specs=(full((B, n_cls)), full((B, n_box))),
        compiler_params=pltpu.CompilerParams(dimension_semantics=("arbitrary",)),
    )(x2d, prep["w_bb"], prep["b_bb"], prep["wcat"],
      prep["sel_cls"], prep["sel_box"], prep["b_cls"], prep["b_rpn"])
    return class_id, box


# ------------------------------ pure-JAX reference ---------------------------
def reference_forward(x, params):
    B, Cin, H, W = x.shape
    Cout = params["w_bb"].shape[1]
    x2d = jnp.transpose(x, (0, 2, 3, 1)).reshape(B * H * W, Cin)
    feat = jnp.maximum(x2d @ params["w_bb"] + params["b_bb"], 0.0)
    feat = jnp.transpose(feat.reshape(B, H, W, Cout), (0, 3, 1, 2)).reshape(B, -1)
    cls = feat @ params["w_cls"] + params["b_cls"]
    box = feat @ params["w_rpn"] + params["b_rpn"]
    return cls, box


if __name__ == "__main__":
    classes = ["cat", "dog", "bird", "car", "person"]
    num_classes = len(classes)

    # shapes consistent with the module: backbone output flattens to 25088 = 512*7*7
    B, Cin, H, W = 2, 4, 7, 7
    Cout = 512
    K = Cout * H * W  # 25088

    key = jax.random.PRNGKey(0)
    k_x, k_wb, k_bb, k_wc, k_bc, k_wr, k_br = jax.random.split(key, 7)

    x = jax.random.normal(k_x, (B, Cin, H, W), dtype=jnp.float32)
    params = {
        # synthetic frozen backbone (stand-in for the passed-in `backbone` module)
        "w_bb": jax.random.normal(k_wb, (Cin, Cout), dtype=jnp.float32) * 0.1,
        "b_bb": jax.random.normal(k_bb, (Cout,), dtype=jnp.float32) * 0.1,
        # classifier_fc: Linear(25088, num_classes)
        "w_cls": jax.random.normal(k_wc, (K, num_classes), dtype=jnp.float32) * 0.01,
        "b_cls": jax.random.normal(k_bc, (num_classes,), dtype=jnp.float32) * 0.01,
        # rpn_fc: Linear(25088, 4)
        "w_rpn": jax.random.normal(k_wr, (K, 4), dtype=jnp.float32) * 0.01,
        "b_rpn": jax.random.normal(k_br, (4,), dtype=jnp.float32) * 0.01,
    }

    prep = prepare_params(params, H, W)          # one-time: frozen-weight repack
    fwd = jax.jit(rcnn_forward)

    class_id, box = jax.block_until_ready(fwd(x, prep))
    ref_cls, ref_box = reference_forward(x, params)

    assert class_id.shape == (B, num_classes) and box.shape == (B, 4)
    assert jnp.allclose(class_id, ref_cls, rtol=1e-4, atol=1e-3)
    assert jnp.allclose(box, ref_box, rtol=1e-4, atol=1e-3)
    print("KERNEL_OK")
</pallas_src>

<mosaic_0001>
module attributes {stable_mosaic.version = 11 : i64} {
  func.func @_fused_rcnn_kernel(%arg0: i32, %arg1: memref<98x4xf32, #tpu.memory_space<vmem>>, %arg2: memref<4x512xf32, #tpu.memory_space<vmem>>, %arg3: memref<1x512xf32, #tpu.memory_space<vmem>>, %arg4: memref<512x441xf32, #tpu.memory_space<vmem>>, %arg5: memref<441x5xf32, #tpu.memory_space<vmem>>, %arg6: memref<441x4xf32, #tpu.memory_space<vmem>>, %arg7: memref<1x5xf32, #tpu.memory_space<vmem>>, %arg8: memref<1x4xf32, #tpu.memory_space<vmem>>, %arg9: memref<2x5xf32, #tpu.memory_space<vmem>>, %arg10: memref<2x4xf32, #tpu.memory_space<vmem>>) attributes {dimension_semantics = [#tpu.dimension_semantics<arbitrary>], iteration_bounds = array<i64: 1>, scalar_prefetch = 0 : i64, scratch_operands = 0 : i64, tpu.core_type = #tpu.core_type<tc>, window_params = [{pipeline_mode = #tpu.pipeline_mode<synchronous>, transform_indices = @transform_0, window_bounds = array<i64: 98, 4>}, {pipeline_mode = #tpu.pipeline_mode<synchronous>, transform_indices = @transform_1, window_bounds = array<i64: 4, 512>}, {pipeline_mode = #tpu.pipeline_mode<synchronous>, transform_indices = @transform_2, window_bounds = array<i64: 1, 512>}, {pipeline_mode = #tpu.pipeline_mode<synchronous>, transform_indices = @transform_3, window_bounds = array<i64: 512, 441>}, {pipeline_mode = #tpu.pipeline_mode<synchronous>, transform_indices = @transform_4, window_bounds = array<i64: 441, 5>}, {pipeline_mode = #tpu.pipeline_mode<synchronous>, transform_indices = @transform_5, window_bounds = array<i64: 441, 4>}, {pipeline_mode = #tpu.pipeline_mode<synchronous>, transform_indices = @transform_6, window_bounds = array<i64: 1, 5>}, {pipeline_mode = #tpu.pipeline_mode<synchronous>, transform_indices = @transform_7, window_bounds = array<i64: 1, 4>}, {pipeline_mode = #tpu.pipeline_mode<synchronous>, transform_indices = @transform_8, window_bounds = array<i64: 2, 5>}, {pipeline_mode = #tpu.pipeline_mode<synchronous>, transform_indices = @transform_9, window_bounds = array<i64: 2, 4>}]} {
    %c0 = arith.constant 0 : index
    %c0_0 = arith.constant 0 : index
    %0 = vector.load %arg1[%c0, %c0_0] : memref<98x4xf32, #tpu.memory_space<vmem>>, vector<98x4xf32>
    %c0_1 = arith.constant 0 : index
    %c0_2 = arith.constant 0 : index
    %1 = vector.load %arg2[%c0_1, %c0_2] : memref<4x512xf32, #tpu.memory_space<vmem>>, vector<4x512xf32>
    %cst = arith.constant dense<0.000000e+00> : vector<98x512xf32>
    %2 = tpu.matmul %0, %1, %cst {dimension_numbers = #tpu.dot_dimension_numbers<[1], [0], [0], [1], [0, 0, 1, 1], [], []>} : vector<98x4xf32>, vector<4x512xf32>, vector<98x512xf32> -> vector<98x512xf32>
    %c0_3 = arith.constant 0 : index
    %c0_4 = arith.constant 0 : index
    %3 = vector.load %arg3[%c0_3, %c0_4] : memref<1x512xf32, #tpu.memory_space<vmem>>, vector<1x512xf32>
    %4 = vector.broadcast %3 : vector<1x512xf32> to vector<98x512xf32>
    %5 = arith.addf %2, %4 : vector<98x512xf32>
    %cst_5 = arith.constant 0.000000e+00 : f32
    %6 = vector.broadcast %cst_5 : f32 to vector<98x512xf32>
    %7 = arith.maximumf %5, %6 : vector<98x512xf32>
    %c0_6 = arith.constant 0 : index
    %c0_7 = arith.constant 0 : index
    %8 = vector.load %arg4[%c0_6, %c0_7] : memref<512x441xf32, #tpu.memory_space<vmem>>, vector<512x441xf32>
    %cst_8 = arith.constant dense<0.000000e+00> : vector<98x441xf32>
    %9 = tpu.matmul %7, %8, %cst_8 {dimension_numbers = #tpu.dot_dimension_numbers<[1], [0], [0], [1], [0, 0, 1, 1], [], []>} : vector<98x512xf32>, vector<512x441xf32>, vector<98x441xf32> -> vector<98x441xf32>
    %10 = tpu.iota {dimensions = array<i32: 0>} : vector<98x441xi32>
    %11 = tpu.iota {dimensions = array<i32: 1>} : vector<98x441xi32>
    %c49_i32 = arith.constant 49 : i32
    %12 = vector.broadcast %c49_i32 : i32 to vector<98x441xi32>
    %13 = arith.cmpi sge, %10, %12 : vector<98x441xi32>
    %c49_i32_9 = arith.constant 49 : i32
    %14 = vector.broadcast %c49_i32_9 : i32 to vector<98x441xi32>
    %15 = arith.subi %10, %14 : vector<98x441xi32>
    %16 = arith.select %13, %15, %10 : vector<98x441xi1>, vector<98x441xi32>
    %c9_i32 = arith.constant 9 : i32
    %17 = vector.broadcast %c9_i32 : i32 to vector<98x441xi32>
    %18 = arith.muli %16, %17 : vector<98x441xi32>
    %19 = arith.cmpi sge, %11, %18 : vector<98x441xi32>
    %c9_i32_10 = arith.constant 9 : i32
    %20 = vector.broadcast %c9_i32_10 : i32 to vector<98x441xi32>
    %21 = arith.addi %18, %20 : vector<98x441xi32>
    %22 = arith.cmpi slt, %11, %21 : vector<98x441xi32>
    %23 = arith.andi %19, %22 : vector<98x441xi1>
    %cst_11 = arith.constant 0.000000e+00 : f32
    %24 = vector.broadcast %cst_11 : f32 to vector<98x441xf32>
    %25 = arith.select %23, %9, %24 : vector<98x441xi1>, vector<98x441xf32>
    %c0_12 = arith.constant 0 : index
    %c0_13 = arith.constant 0 : index
    %26 = vector.load %arg5[%c0_12, %c0_13] : memref<441x5xf32, #tpu.memory_space<vmem>>, vector<441x5xf32>
    %cst_14 = arith.constant dense<0.000000e+00> : vector<98x5xf32>
    %27 = tpu.matmul %25, %26, %cst_14 {dimension_numbers = #tpu.dot_dimension_numbers<[1], [0], [0], [1], [0, 0, 1, 1], [], []>} : vector<98x441xf32>, vector<441x5xf32>, vector<98x5xf32> -> vector<98x5xf32>
    %c0_15 = arith.constant 0 : index
    %c0_16 = arith.constant 0 : index
    %28 = vector.load %arg6[%c0_15, %c0_16] : memref<441x4xf32, #tpu.memory_space<vmem>>, vector<441x4xf32>
    %cst_17 = arith.constant dense<0.000000e+00> : vector<98x4xf32>
    %29 = tpu.matmul %25, %28, %cst_17 {dimension_numbers = #tpu.dot_dimension_numbers<[1], [0], [0], [1], [0, 0, 1, 1], [], []>} : vector<98x441xf32>, vector<441x4xf32>, vector<98x4xf32> -> vector<98x4xf32>
    %30 = tpu.iota {dimensions = array<i32: 0>} : vector<2x98xi32>
    %31 = tpu.iota {dimensions = array<i32: 1>} : vector<2x98xi32>
    %c49_i32_18 = arith.constant 49 : i32
    %32 = vector.broadcast %c49_i32_18 : i32 to vector<2x98xi32>
    %33 = arith.muli %30, %32 : vector<2x98xi32>
    %34 = arith.cmpi sge, %31, %33 : vector<2x98xi32>
    %c1_i32 = arith.constant 1 : i32
    %35 = vector.broadcast %c1_i32 : i32 to vector<2x98xi32>
    %36 = arith.addi %30, %35 : vector<2x98xi32>
    %c49_i32_19 = arith.constant 49 : i32
    %37 = vector.broadcast %c49_i32_19 : i32 to vector<2x98xi32>
    %38 = arith.muli %36, %37 : vector<2x98xi32>
    %39 = arith.cmpi slt, %31, %38 : vector<2x98xi32>
    %40 = arith.andi %34, %39 : vector<2x98xi1>
    %41 = arith.extui %40 : vector<2x98xi1> to vector<2x98xi32>
    %42 = arith.sitofp %41 : vector<2x98xi32> to vector<2x98xf32>
    %cst_20 = arith.constant dense<0.000000e+00> : vector<2x5xf32>
    %43 = tpu.matmul %42, %27, %cst_20 {dimension_numbers = #tpu.dot_dimension_numbers<[1], [0], [0], [1], [0, 0, 1, 1], [], []>} : vector<2x98xf32>, vector<98x5xf32>, vector<2x5xf32> -> vector<2x5xf32>
    %c0_21 = arith.constant 0 : index
    %c0_22 = arith.constant 0 : index
    %44 = vector.load %arg7[%c0_21, %c0_22] : memref<1x5xf32, #tpu.memory_space<vmem>>, vector<1x5xf32>
    %45 = vector.broadcast %44 : vector<1x5xf32> to vector<2x5xf32>
    %46 = arith.addf %43, %45 : vector<2x5xf32>
    %c0_23 = arith.constant 0 : index
    %c0_24 = arith.constant 0 : index
    %47 = vector.load %arg9[%c0_23, %c0_24] : memref<2x5xf32, #tpu.memory_space<vmem>>, vector<2x5xf32>
    tpu.vector_store %arg9[%c0_23, %c0_24], %46 {strides = array<i32>} : memref<2x5xf32, #tpu.memory_space<vmem>>, vector<2x5xf32>,
    %cst_25 = arith.constant dense<0.000000e+00> : vector<2x4xf32>
    %48 = tpu.matmul %42, %29, %cst_25 {dimension_numbers = #tpu.dot_dimension_numbers<[1], [0], [0], [1], [0, 0, 1, 1], [], []>} : vector<2x98xf32>, vector<98x4xf32>, vector<2x4xf32> -> vector<2x4xf32>
    %c0_26 = arith.constant 0 : index
    %c0_27 = arith.constant 0 : index
    %49 = vector.load %arg8[%c0_26, %c0_27] : memref<1x4xf32, #tpu.memory_space<vmem>>, vector<1x4xf32>
    %50 = vector.broadcast %49 : vector<1x4xf32> to vector<2x4xf32>
    %51 = arith.addf %48, %50 : vector<2x4xf32>
    %c0_28 = arith.constant 0 : index
    %c0_29 = arith.constant 0 : index
    %52 = vector.load %arg10[%c0_28, %c0_29] : memref<2x4xf32, #tpu.memory_space<vmem>>, vector<2x4xf32>
    tpu.vector_store %arg10[%c0_28, %c0_29], %51 {strides = array<i32>} : memref<2x4xf32, #tpu.memory_space<vmem>>, vector<2x4xf32>,
    return
  }
  func.func @transform_0(%arg0: i32) -> (i32, i32) {
    %c0_i32 = arith.constant 0 : i32
    %c0_i32_0 = arith.constant 0 : i32
    %c0_i32_1 = arith.constant 0 : i32
    return %c0_i32, %c0_i32_0 : i32, i32
  }
  func.func @transform_1(%arg0: i32) -> (i32, i32) {
    %c0_i32 = arith.constant 0 : i32
    %c0_i32_0 = arith.constant 0 : i32
    %c0_i32_1 = arith.constant 0 : i32
    return %c0_i32, %c0_i32_0 : i32, i32
  }
  func.func @transform_2(%arg0: i32) -> (i32, i32) {
    %c0_i32 = arith.constant 0 : i32
    %c0_i32_0 = arith.constant 0 : i32
    %c0_i32_1 = arith.constant 0 : i32
    return %c0_i32, %c0_i32_0 : i32, i32
  }
  func.func @transform_3(%arg0: i32) -> (i32, i32) {
    %c0_i32 = arith.constant 0 : i32
    %c0_i32_0 = arith.constant 0 : i32
    %c0_i32_1 = arith.constant 0 : i32
    return %c0_i32, %c0_i32_0 : i32, i32
  }
  func.func @transform_4(%arg0: i32) -> (i32, i32) {
    %c0_i32 = arith.constant 0 : i32
    %c0_i32_0 = arith.constant 0 : i32
    %c0_i32_1 = arith.constant 0 : i32
    return %c0_i32, %c0_i32_0 : i32, i32
  }
  func.func @transform_5(%arg0: i32) -> (i32, i32) {
    %c0_i32 = arith.constant 0 : i32
    %c0_i32_0 = arith.constant 0 : i32
    %c0_i32_1 = arith.constant 0 : i32
    return %c0_i32, %c0_i32_0 : i32, i32
  }
  func.func @transform_6(%arg0: i32) -> (i32, i32) {
    %c0_i32 = arith.constant 0 : i32
    %c0_i32_0 = arith.constant 0 : i32
    %c0_i32_1 = arith.constant 0 : i32
    return %c0_i32, %c0_i32_0 : i32, i32
  }
  func.func @transform_7(%arg0: i32) -> (i32, i32) {
    %c0_i32 = arith.constant 0 : i32
    %c0_i32_0 = arith.constant 0 : i32
    %c0_i32_1 = arith.constant 0 : i32
    return %c0_i32, %c0_i32_0 : i32, i32
  }
  func.func @transform_8(%arg0: i32) -> (i32, i32) {
    %c0_i32 = arith.constant 0 : i32
    %c0_i32_0 = arith.constant 0 : i32
    %c0_i32_1 = arith.constant 0 : i32
    return %c0_i32, %c0_i32_0 : i32, i32
  }
  func.func @transform_9(%arg0: i32) -> (i32, i32) {
    %c0_i32 = arith.constant 0 : i32
    %c0_i32_0 = arith.constant 0 : i32
    %c0_i32_1 = arith.constant 0 : i32
    return %c0_i32, %c0_i32_0 : i32, i32
  }
}

</mosaic_0001>

<bundles_post_ra>
// kernel: rcnn_forward.1
= control target key start
LH: loop header
LB: loop body
LE: loop exit
PB: predicated region body
PF: predicated region fallthrough
CT: control target
= control target key end

     0   :  { %15 = vsyncpa [#allocation3], 0  ;;  %vm114_vm0 = vcmask 1043456   ;;  %v5861_v4 = vmov 0.0   ;;  %vm74_vm1 = vcmask 31744   ;;  %s5828_s0 = inlined_call_operand.vmem [shape: f32[98,4], index: 0, kind: input, shape index: {}]   ;;  %s5829_s1 = inlined_call_operand.vmem [shape: f32[4,512], index: 1, kind: input, shape index: {}]   ;;  %s5830_s2 = inlined_call_operand.vmem [shape: f32[1,512], index: 2, kind: input, shape index: {}]   ;;  %s5831_s3 = inlined_call_operand.vmem [shape: f32[512,441], index: 3, kind: input, shape index: {}]   ;;  %s5832_s4 = inlined_call_operand.vmem [shape: f32[441,5], index: 4, kind: input, shape index: {}]   ;;  %s5833_s5 = inlined_call_operand.vmem [shape: f32[441,4], index: 5, kind: input, shape index: {}]   ;;  %s5834_s6 = inlined_call_operand.vmem [shape: f32[1,5], index: 6, kind: input, shape index: {}]   ;;  %s5835_s7 = inlined_call_operand.vmem [shape: f32[1,4], index: 7, kind: input, shape index: {}]   ;;  %s5836_s8 = inlined_call_operand.hbm [shape: f32[2,5], index: 8, kind: output, shape index: {0}]   ;;  %s5837_s9 = inlined_call_operand.hbm [shape: f32[2,4], index: 9, kind: output, shape index: {1}]  }
   0x1   :  { %v46_v0 = vld [vmem:[%s5829_s1] sm:$0xff]  ;;  %v47_v1 = vld [vmem:[%s5829_s1 + $0x8] sm:$0xff]  ;;  %187 = vmatprep.mubr.f32.mxu0 %v5861_v4  ;;  %330 = vmatprep.mubr.f32.mxu1 %v5861_v4  ;;  %v35_v15 = vld [vmem:[%s5828_s0 + $0x10] sm:$0xff] }
   0x2   :  { %v72_v2 = vcombine.high %v46_v0, %v46_v0  ;;  %v73_v3 = vcombine.high %v47_v1, %v47_v1  ;;  %v33_v5 = vld [vmem:[%s5828_s0] sm:$0xff]  ;;  %v522_v6 = vld [vmem:[%s5831_s3 + $0x1e8] sm:$0xff]  ;;  %v36_v20 = vld [vmem:[%s5828_s0 + $0x18] sm:$0xff] }
   0x3   :  { %v650_v7 = vld [vmem:[%s5831_s3 + $0x5e8] sm:$0xff]  ;;  %v521_v8 = vld [vmem:[%s5831_s3 + $0x1e0] sm:$0xff]  ;;  %v39_v35 = vld [vmem:[%s5828_s0 + $0x30] sm:$0xff] }
   0x4   :  { %2465 = vmatprep.subr.msk.mxu0 %vm114_vm0, %v72_v2  ;;  %2480 = vmatprep.subr.msk.mxu1 %vm114_vm0, %v73_v3  ;;  %v34_v9 = vld [vmem:[%s5828_s0 + $0x8] sm:$0xff]  ;;  %v649_v10 = vld [vmem:[%s5831_s3 + $0x5e0] sm:$0xff]  ;;  %v40_v40 = vld [vmem:[%s5828_s0 + $0x38] sm:$0xff] }
   0x5   :  { %2466 = vmatpush1.msk.msra.mxu0 %vm114_vm0, %v46_v0  ;;  %2481 = vmatpush1.msk.msra.mxu1 %vm114_vm0, %v47_v1  ;;  %v518_v11 = vld [vmem:[%s5831_s3 + $0x1c8] sm:$0xff]  ;;  %v517_v13 = vld [vmem:[%s5831_s3 + $0x1c0] sm:$0xff]  ;;  %v43_v55 = vld [vmem:[%s5828_s0 + $0x50] sm:$0xff] }
   0x6   :  { %2467 = vmatmul.mubr.msk.f32.vlgmr.msra.gmra.mxu0 %vm74_vm1, %v33_v5  ;;  %2482 = vmatmul.mubr.msk.f32.vlgmr.msra.gmra.mxu1 %vm74_vm1, %v33_v5  ;;  %v646_v12 = vld [vmem:[%s5831_s3 + $0x5c8] sm:$0xff]  ;;  %v645_v14 = vld [vmem:[%s5831_s3 + $0x5c0] sm:$0xff] }
   0x7   :  { %193 = vmatprep.mubr.f32.mxu0 %v5861_v4  ;;  %336 = vmatprep.mubr.f32.mxu1 %v5861_v4  ;;  %v514_v16 = vld [vmem:[%s5831_s3 + $0x1a8] sm:$0xff]  ;;  %v513_v18 = vld [vmem:[%s5831_s3 + $0x1a0] sm:$0xff] }
   0x8   :  { %717 = vmatprep.subr.mxu0 %v522_v6  ;;  %860 = vmatprep.subr.mxu1 %v650_v7  ;;  %v642_v17 = vld [vmem:[%s5831_s3 + $0x5a8] sm:$0xff]  ;;  %v641_v19 = vld [vmem:[%s5831_s3 + $0x5a0] sm:$0xff] }
   0x9   :  { %718 = vmatpush1.msra.mxu0 %v521_v8  ;;  %861 = vmatpush1.msra.mxu1 %v649_v10  ;;  %v510_v21 = vld [vmem:[%s5831_s3 + $0x188] sm:$0xff]  ;;  %v509_v23 = vld [vmem:[%s5831_s3 + $0x180] sm:$0xff] }
   0xa   :  { %2468 = vmatmul.mubr.msk.f32.gmra.mxu0 %vm74_vm1, %v34_v9  ;;  %2483 = vmatmul.mubr.msk.f32.gmra.mxu1 %vm74_vm1, %v34_v9  ;;  %v638_v22 = vld [vmem:[%s5831_s3 + $0x588] sm:$0xff]  ;;  %v637_v24 = vld [vmem:[%s5831_s3 + $0x580] sm:$0xff] }
   0xb   :  { %199 = vmatprep.mubr.f32.mxu0 %v5861_v4  ;;  %342 = vmatprep.mubr.f32.mxu1 %v5861_v4  ;;  %v37_v25 = vld [vmem:[%s5828_s0 + $0x20] sm:$0xff]  ;;  %v506_v26 = vld [vmem:[%s5831_s3 + $0x168] sm:$0xff] }
   0xc   :  { %719 = vmatprep.subr.mxu0 %v518_v11  ;;  %862 = vmatprep.subr.mxu1 %v646_v12  ;;  %v634_v27 = vld [vmem:[%s5831_s3 + $0x568] sm:$0xff]  ;;  %v505_v28 = vld [vmem:[%s5831_s3 + $0x160] sm:$0xff] }
   0xd   :  { %720 = vmatpush1.msra.mxu0 %v517_v13  ;;  %863 = vmatpush1.msra.mxu1 %v645_v14  ;;  %v633_v29 = vld [vmem:[%s5831_s3 + $0x560] sm:$0xff]  ;;  %v38_v30 = vld [vmem:[%s5828_s0 + $0x28] sm:$0xff] }
   0xe   :  { %2469 = vmatmul.mubr.msk.f32.gmra.mxu0 %vm74_vm1, %v35_v15  ;;  %2484 = vmatmul.mubr.msk.f32.gmra.mxu1 %vm74_vm1, %v35_v15  ;;  %v502_v31 = vld [vmem:[%s5831_s3 + $0x148] sm:$0xff]  ;;  %v501_v33 = vld [vmem:[%s5831_s3 + $0x140] sm:$0xff] }
   0xf   :  { %205 = vmatprep.mubr.f32.mxu0 %v5861_v4  ;;  %348 = vmatprep.mubr.f32.mxu1 %v5861_v4  ;;  %v630_v32 = vld [vmem:[%s5831_s3 + $0x548] sm:$0xff]  ;;  %v629_v34 = vld [vmem:[%s5831_s3 + $0x540] sm:$0xff] }
  0x10   :  { %721 = vmatprep.subr.mxu0 %v514_v16  ;;  %864 = vmatprep.subr.mxu1 %v642_v17  ;;  %v498_v36 = vld [vmem:[%s5831_s3 + $0x128] sm:$0xff]  ;;  %v497_v38 = vld [vmem:[%s5831_s3 + $0x120] sm:$0xff] }
  0x11   :  { %722 = vmatpush1.msra.mxu0 %v513_v18  ;;  %865 = vmatpush1.msra.mxu1 %v641_v19  ;;  %v626_v37 = vld [vmem:[%s5831_s3 + $0x528] sm:$0xff]  ;;  %v625_v39 = vld [vmem:[%s5831_s3 + $0x520] sm:$0xff] }
  0x12   :  { %2470 = vmatmul.mubr.msk.f32.gmra.mxu0 %vm74_vm1, %v36_v20  ;;  %2485 = vmatmul.mubr.msk.f32.gmra.mxu1 %vm74_vm1, %v36_v20  ;;  %v494_v41 = vld [vmem:[%s5831_s3 + $0x108] sm:$0xff]  ;;  %v493_v43 = vld [vmem:[%s5831_s3 + $0x100] sm:$0xff] }
  0x13   :  { %211 = vmatprep.mubr.f32.mxu0 %v5861_v4  ;;  %354 = vmatprep.mubr.f32.mxu1 %v5861_v4  ;;  %v622_v42 = vld [vmem:[%s5831_s3 + $0x508] sm:$0xff]  ;;  %v621_v44 = vld [vmem:[%s5831_s3 + $0x500] sm:$0xff] }
  0x14   :  { %723 = vmatprep.subr.mxu0 %v510_v21  ;;  %866 = vmatprep.subr.mxu1 %v638_v22  ;;  %v41_v45 = vld [vmem:[%s5828_s0 + $0x40] sm:$0xff]  ;;  %v490_v46 = vld [vmem:[%s5831_s3 + $0xe8] sm:$0xff] }
  0x15   :  { %724 = vmatpush1.msra.mxu0 %v509_v23  ;;  %867 = vmatpush1.msra.mxu1 %v637_v24  ;;  %v618_v47 = vld [vmem:[%s5831_s3 + $0x4e8] sm:$0xff]  ;;  %v489_v48 = vld [vmem:[%s5831_s3 + $0xe0] sm:$0xff] }
  0x16   :  { %2471 = vmatmul.mubr.msk.f32.gmra.mxu0 %vm74_vm1, %v37_v25  ;;  %2486 = vmatmul.mubr.msk.f32.gmra.mxu1 %vm74_vm1, %v37_v25  ;;  %v617_v49 = vld [vmem:[%s5831_s3 + $0x4e0] sm:$0xff]  ;;  %v42_v50 = vld [vmem:[%s5828_s0 + $0x48] sm:$0xff] }
  0x17   :  { %217 = vmatprep.mubr.f32.mxu0 %v5861_v4  ;;  %360 = vmatprep.mubr.f32.mxu1 %v5861_v4  ;;  %v486_v51 = vld [vmem:[%s5831_s3 + $0xc8] sm:$0xff]  ;;  %v485_v53 = vld [vmem:[%s5831_s3 + $0xc0] sm:$0xff] }
  0x18   :  { %725 = vmatprep.subr.mxu0 %v506_v26  ;;  %868 = vmatprep.subr.mxu1 %v634_v27  ;;  %v614_v52 = vld [vmem:[%s5831_s3 + $0x4c8] sm:$0xff]  ;;  %v613_v54 = vld [vmem:[%s5831_s3 + $0x4c0] sm:$0xff] }
  0x19   :  { %726 = vmatpush1.msra.mxu0 %v505_v28  ;;  %869 = vmatpush1.msra.mxu1 %v633_v29 }
  0x1a   :  { %2472 = vmatmul.mubr.msk.f32.gmra.mxu0 %vm74_vm1, %v38_v30  ;;  %2487 = vmatmul.mubr.msk.f32.gmra.mxu1 %vm74_vm1, %v38_v30 }
  0x1b   :  { %223 = vmatprep.mubr.f32.mxu0 %v5861_v4  ;;  %366 = vmatprep.mubr.f32.mxu1 %v5861_v4 }
  0x1c   :  { %727 = vmatprep.subr.mxu0 %v502_v31  ;;  %870 = vmatprep.subr.mxu1 %v630_v32 }
  0x1d   :  { %728 = vmatpush1.msra.mxu0 %v501_v33  ;;  %871 = vmatpush1.msra.mxu1 %v629_v34 }
  0x1e   :  { %2473 = vmatmul.mubr.msk.f32.gmra.mxu0 %vm74_vm1, %v39_v35  ;;  %2488 = vmatmul.mubr.msk.f32.gmra.mxu1 %vm74_vm1, %v39_v35 }
  0x1f   :  { %229 = vmatprep.mubr.f32.mxu0 %v5861_v4  ;;  %372 = vmatprep.mubr.f32.mxu1 %v5861_v4 }
  0x20   :  { %729 = vmatprep.subr.mxu0 %v498_v36  ;;  %872 = vmatprep.subr.mxu1 %v626_v37 }
  0x21   :  { %730 = vmatpush1.msra.mxu0 %v497_v38  ;;  %873 = vmatpush1.msra.mxu1 %v625_v39 }
  0x22   :  { %2474 = vmatmul.mubr.msk.f32.gmra.mxu0 %vm74_vm1, %v40_v40  ;;  %2489 = vmatmul.mubr.msk.f32.gmra.mxu1 %vm74_vm1, %v40_v40 }
  0x23   :  { %235 = vmatprep.mubr.f32.mxu0 %v5861_v4  ;;  %378 = vmatprep.mubr.f32.mxu1 %v5861_v4 }
  0x24   :  { %731 = vmatprep.subr.mxu0 %v494_v41  ;;  %874 = vmatprep.subr.mxu1 %v622_v42 }
  0x25   :  { %732 = vmatpush1.msra.mxu0 %v493_v43  ;;  %875 = vmatpush1.msra.mxu1 %v621_v44 }
  0x26   :  { %2475 = vmatmul.mubr.msk.f32.gmra.mxu0 %vm74_vm1, %v41_v45  ;;  %2490 = vmatmul.mubr.msk.f32.gmra.mxu1 %vm74_vm1, %v41_v45 }
  0x27   :  { %241 = vmatprep.mubr.f32.mxu0 %v5861_v4  ;;  %384 = vmatprep.mubr.f32.mxu1 %v5861_v4 }
  0x28   :  { %733 = vmatprep.subr.mxu0 %v490_v46  ;;  %876 = vmatprep.subr.mxu1 %v618_v47 }
  0x29   :  { %734 = vmatpush1.msra.mxu0 %v489_v48  ;;  %877 = vmatpush1.msra.mxu1 %v617_v49 }
  0x2a   :  { %2476 = vmatmul.mubr.msk.f32.gmra.mxu0 %vm74_vm1, %v42_v50  ;;  %2491 = vmatmul.mubr.msk.f32.gmra.mxu1 %vm74_vm1, %v42_v50 }
  0x2b   :  { %247 = vmatprep.mubr.f32.mxu0 %v5861_v4  ;;  %390 = vmatprep.mubr.f32.mxu1 %v5861_v4 }
  0x2c   :  { %735 = vmatprep.subr.mxu0 %v486_v51  ;;  %878 = vmatprep.subr.mxu1 %v614_v52 }
  0x2d   :  { %16 = vsyncpa [#allocation5], 0  ;;  %736 = vmatpush1.msra.mxu0 %v485_v53  ;;  %879 = vmatpush1.msra.mxu1 %v613_v54  ;;  %v482_v56 = vld [vmem:[%s5831_s3 + $0xa8] sm:$0xff]  ;;  %v481_v58 = vld [vmem:[%s5831_s3 + $0xa0] sm:$0xff]  ;;  %vm5886_vm2 = vcmask 1040384   ;;  %s2901_s13 = smov [#allocation2]  }
  0x2e   :  { %v610_v57 = vld [vmem:[%s5831_s3 + $0x4a8] sm:$0xff]  ;;  %2477 = vmatmul.mubr.msk.f32.gmra.mxu0 %vm74_vm1, %v43_v55  ;;  %2492 = vmatmul.mubr.msk.f32.gmra.mxu1 %vm74_vm1, %v43_v55  ;;  %v609_v59 = vld [vmem:[%s5831_s3 + $0x4a0] sm:$0xff]  ;;  %v44_v60 = vld [vmem:[%s5828_s0 + $0x58] sm:$0xff]  ;;  %s2443_s14 = sshll.u32 %s2901_s13, 4  ;;  %s2444_s14 = int_to_ptr.vmem [resolvable:$true] %s2443_s14 }
  0x2f   :  { %253 = vmatprep.mubr.f32.mxu0 %v5861_v4  ;;  %396 = vmatprep.mubr.f32.mxu1 %v5861_v4  ;;  %v478_v61 = vld [vmem:[%s5831_s3 + $0x88] sm:$0xff]  ;;  %v477_v63 = vld [vmem:[%s5831_s3 + $0x80] sm:$0xff]  ;;  %s2855_s1 = scalar_lea.vmem %s2444_s14, 32  ;;  %p2860_p1 = scmp.lt.s32.totalorder %s2444_s14, %s2444_s14 }
  0x30   :  { %737 = vmatprep.subr.mxu0 %v482_v56  ;;  %880 = vmatprep.subr.mxu1 %v610_v57  ;;  %v606_v62 = vld [vmem:[%s5831_s3 + $0x488] sm:$0xff]  ;;  %v605_v0 = vld [vmem:[%s5831_s3 + $0x480] sm:$0xff]  ;;  %p2856_p0 = scmp.ne.s32.totalorder %s2444_s14, %s2855_s1  ;;  %p2861_p2 = scmp.lt.s32.totalorder %s2855_s1, %s2855_s1 }
  0x31   :  { %738 = vmatpush1.msra.mxu0 %v481_v58  ;;  %881 = vmatpush1.msra.mxu1 %v609_v59  ;;  %v45_v1 = vld [vmem:[%s5828_s0 + $0x60] sm:$0x3]  ;;  %v474_v2 = vld [vmem:[%s5831_s3 + $0x68] sm:$0xff] }
  0x32   :  { %2478 = vmatmul.mubr.msk.f32.gmra.mxu0 %vm74_vm1, %v44_v60  ;;  %2493 = vmatmul.mubr.msk.f32.gmra.mxu1 %vm74_vm1, %v44_v60  ;;  %v602_v3 = vld [vmem:[%s5831_s3 + $0x468] sm:$0xff]  ;;  %v473_v5 = vld [vmem:[%s5831_s3 + $0x60] sm:$0xff]  ;;  %p2862_p3 = por %p2861_p2, %p2860_p1 }
  0x33   :  { %259 = vmatprep.mubr.f32.mxu0 %v5861_v4  ;;  %402 = vmatprep.mubr.f32.mxu1 %v5861_v4  ;;  %v601_v6 = vld [vmem:[%s5831_s3 + $0x460] sm:$0xff]  ;;  %v470_v7 = vld [vmem:[%s5831_s3 + $0x48] sm:$0xff]  ;;  %v468_v4 = vld [vmem:[%s5831_s3 + $0x38] sm:$0xff] }
  0x34   :  { %739 = vmatprep.subr.mxu0 %v478_v61  ;;  %882 = vmatprep.subr.mxu1 %v606_v62  ;;  %v598_v8 = vld [vmem:[%s5831_s3 + $0x448] sm:$0xff]  ;;  %v469_v9 = vld [vmem:[%s5831_s3 + $0x40] sm:$0xff]  ;;  %p2863_p4 = pnand %p2862_p3, %p2856_p0 }
  0x35   :  { %740 = vmatpush1.msra.mxu0 %v477_v63  ;;  %883 = vmatpush1.msra.mxu1 %v605_v0  ;;  %v597_v10 = vld [vmem:[%s5831_s3 + $0x440] sm:$0xff]  ;;  %v466_v11 = vld [vmem:[%s5831_s3 + $0x28] sm:$0xff] }
  0x36   :  { %2479 = vmatmul.mubr.msk.f32.gmra.mxu0 %vm74_vm1, %v45_v1  ;;  %2494 = vmatmul.mubr.msk.f32.gmra.mxu1 %vm74_vm1, %v45_v1  ;;  %v594_v12 = vld [vmem:[%s5831_s3 + $0x428] sm:$0xff]  ;;  %v465_v13 = vld [vmem:[%s5831_s3 + $0x20] sm:$0xff] }
  0x37   :  { %741 = vmatprep.subr.mxu0 %v474_v2  ;;  %884 = vmatprep.subr.mxu1 %v602_v3  ;;  %v593_v14 = vld [vmem:[%s5831_s3 + $0x420] sm:$0xff]  ;;  %v462_v15 = vld [vmem:[%s5831_s3 + $0x8] sm:$0xff] }
  0x38   :  { %742 = vmatpush1.msra.mxu0 %v473_v5  ;;  %885 = vmatpush1.msra.mxu1 %v601_v6  ;;  %v590_v16 = vld [vmem:[%s5831_s3 + $0x408] sm:$0xff]  ;;  %v461_v17 = vld [vmem:[%s5831_s3] sm:$0xff] }
  0x39   :  { %743 = vmatprep.subr.mxu0 %v470_v7  ;;  %886 = vmatprep.subr.mxu1 %v598_v8  ;;  %v589_v18 = vld [vmem:[%s5831_s3 + $0x400] sm:$0xff]  ;;  %v586_v19 = vld [vmem:[%s5831_s3 + $0x3e8] sm:$0xff] }
  0x3a   :  { %744 = vmatpush1.msra.mxu0 %v469_v9  ;;  %887 = vmatpush1.msra.mxu1 %v597_v10  ;;  %v714_v20 = vld [vmem:[%s5831_s3 + $0x7e8] sm:$0xff]  ;;  %v585_v21 = vld [vmem:[%s5831_s3 + $0x3e0] sm:$0xff] }
  0x3b   :  { %745 = vmatprep.subr.mxu0 %v466_v11  ;;  %888 = vmatprep.subr.mxu1 %v594_v12  ;;  %v713_v22 = vld [vmem:[%s5831_s3 + $0x7e0] sm:$0xff]  ;;  %v582_v23 = vld [vmem:[%s5831_s3 + $0x3c8] sm:$0xff] }
  0x3c   :  { %746 = vmatpush1.msra.mxu0 %v465_v13  ;;  %889 = vmatpush1.msra.mxu1 %v593_v14  ;;  %v710_v24 = vld [vmem:[%s5831_s3 + $0x7c8] sm:$0xff]  ;;  %v581_v25 = vld [vmem:[%s5831_s3 + $0x3c0] sm:$0xff] }
  0x3d   :  { %747 = vmatprep.subr.mxu0 %v462_v15  ;;  %890 = vmatprep.subr.mxu1 %v590_v16  ;;  %v709_v26 = vld [vmem:[%s5831_s3 + $0x7c0] sm:$0xff]  ;;  %v578_v27 = vld [vmem:[%s5831_s3 + $0x3a8] sm:$0xff] }
  0x3e   :  { %748 = vmatpush1.msra.mxu0 %v461_v17  ;;  %891 = vmatpush1.msra.mxu1 %v589_v18  ;;  %v706_v28 = vld [vmem:[%s5831_s3 + $0x7a8] sm:$0xff]  ;;  %v577_v29 = vld [vmem:[%s5831_s3 + $0x3a0] sm:$0xff] }
  0x3f   :  { %749 = vmatprep.subr.mxu0 %v586_v19  ;;  %892 = vmatprep.subr.mxu1 %v714_v20  ;;  %v705_v30 = vld [vmem:[%s5831_s3 + $0x7a0] sm:$0xff]  ;;  %v574_v31 = vld [vmem:[%s5831_s3 + $0x388] sm:$0xff]  ;;  %v524_v20 = vld [vmem:[%s5831_s3 + $0x1f8] sm:$0xff] }
  0x40   :  { %750 = vmatpush2.msra.mxu0 %v585_v21  ;;  %893 = vmatpush2.msra.mxu1 %v713_v22  ;;  %v702_v32 = vld [vmem:[%s5831_s3 + $0x788] sm:$0xff]  ;;  %v573_v33 = vld [vmem:[%s5831_s3 + $0x380] sm:$0xff]  ;;  %v652_v21 = vld [vmem:[%s5831_s3 + $0x5f8] sm:$0xff]  ;;  %v5838_v22 = vlaneseq }
  0x41   :  { %751 = vmatprep.subr.mxu0 %v582_v23  ;;  %894 = vmatprep.subr.mxu1 %v710_v24  ;;  %v701_v34 = vld [vmem:[%s5831_s3 + $0x780] sm:$0xff]  ;;  %v570_v35 = vld [vmem:[%s5831_s3 + $0x368] sm:$0xff] }
  0x42   :  { %752 = vmatpush2.msra.mxu0 %v581_v25  ;;  %895 = vmatpush2.msra.mxu1 %v709_v26  ;;  %v698_v36 = vld [vmem:[%s5831_s3 + $0x768] sm:$0xff]  ;;  %v569_v37 = vld [vmem:[%s5831_s3 + $0x360] sm:$0xff]  ;;  %v3441_v23 = vshrl.u32 %v5838_v22, 7 }
  0x43   :  { %753 = vmatprep.subr.mxu0 %v578_v27  ;;  %896 = vmatprep.subr.mxu1 %v706_v28  ;;  %v697_v38 = vld [vmem:[%s5831_s3 + $0x760] sm:$0xff]  ;;  %v566_v39 = vld [vmem:[%s5831_s3 + $0x348] sm:$0xff] }
  0x44   :  { %754 = vmatpush2.msra.mxu0 %v577_v29  ;;  %897 = vmatpush2.msra.mxu1 %v705_v30  ;;  %v694_v40 = vld [vmem:[%s5831_s3 + $0x748] sm:$0xff]  ;;  %v565_v41 = vld [vmem:[%s5831_s3 + $0x340] sm:$0xff]  ;;  %5936 = vst [vmem:[#allocation8_spill] sm:$0xff] %v3441_v23  ;;  %v52_v24 = vsub.s32 0, %v3441_v23  ;;  %v60_v25 = vsub.s32 2, %v3441_v23  ;;  %v56_v27 = vsub.s32 1, %v3441_v23 }
  0x45   :  { %755 = vmatprep.subr.mxu0 %v574_v31  ;;  %898 = vmatprep.subr.mxu1 %v702_v32  ;;  %v693_v42 = vld [vmem:[%s5831_s3 + $0x740] sm:$0xff]  ;;  %v562_v43 = vld [vmem:[%s5831_s3 + $0x328] sm:$0xff]  ;;  %v64_v28 = vsub.s32 3, %v3441_v23 }
  0x46   :  { %756 = vmatpush2.msra.mxu0 %v573_v33  ;;  %899 = vmatpush2.msra.mxu1 %v701_v34  ;;  %v690_v44 = vld [vmem:[%s5831_s3 + $0x728] sm:$0xff]  ;;  %v561_v45 = vld [vmem:[%s5831_s3 + $0x320] sm:$0xff] }
  0x47   :  { %757 = vmatprep.subr.mxu0 %v570_v35  ;;  %900 = vmatprep.subr.mxu1 %v698_v36  ;;  %v689_v46 = vld [vmem:[%s5831_s3 + $0x720] sm:$0xff]  ;;  %v558_v47 = vld [vmem:[%s5831_s3 + $0x308] sm:$0xff] }
  0x48   :  { %758 = vmatpush2.msra.mxu0 %v569_v37  ;;  %901 = vmatpush2.msra.mxu1 %v697_v38  ;;  %v686_v48 = vld [vmem:[%s5831_s3 + $0x708] sm:$0xff]  ;;  %v557_v49 = vld [vmem:[%s5831_s3 + $0x300] sm:$0xff] }
  0x49   :  { %759 = vmatprep.subr.mxu0 %v566_v39  ;;  %902 = vmatprep.subr.mxu1 %v694_v40  ;;  %v685_v50 = vld [vmem:[%s5831_s3 + $0x700] sm:$0xff]  ;;  %v554_v51 = vld [vmem:[%s5831_s3 + $0x2e8] sm:$0xff] }
  0x4a   :  { %760 = vmatpush2.msra.mxu0 %v565_v41  ;;  %903 = vmatpush2.msra.mxu1 %v693_v42  ;;  %v682_v52 = vld [vmem:[%s5831_s3 + $0x6e8] sm:$0xff]  ;;  %v553_v53 = vld [vmem:[%s5831_s3 + $0x2e0] sm:$0xff] }
  0x4b   :  { %761 = vmatprep.subr.mxu0 %v562_v43  ;;  %904 = vmatprep.subr.mxu1 %v690_v44  ;;  %v681_v54 = vld [vmem:[%s5831_s3 + $0x6e0] sm:$0xff]  ;;  %v550_v55 = vld [vmem:[%s5831_s3 + $0x2c8] sm:$0xff] }
  0x4c   :  { %762 = vmatpush2.msra.mxu0 %v561_v45  ;;  %905 = vmatpush2.msra.mxu1 %v689_v46  ;;  %v678_v56 = vld [vmem:[%s5831_s3 + $0x6c8] sm:$0xff]  ;;  %v549_v57 = vld [vmem:[%s5831_s3 + $0x2c0] sm:$0xff] }
  0x4d   :  { %763 = vmatprep.subr.mxu0 %v558_v47  ;;  %906 = vmatprep.subr.mxu1 %v686_v48  ;;  %v677_v58 = vld [vmem:[%s5831_s3 + $0x6c0] sm:$0xff]  ;;  %v546_v59 = vld [vmem:[%s5831_s3 + $0x2a8] sm:$0xff] }
  0x4e   :  { %764 = vmatpush2.msra.mxu0 %v557_v49  ;;  %907 = vmatpush2.msra.mxu1 %v685_v50  ;;  %v674_v60 = vld [vmem:[%s5831_s3 + $0x6a8] sm:$0xff]  ;;  %v545_v61 = vld [vmem:[%s5831_s3 + $0x2a0] sm:$0xff] }
  0x4f   :  { %765 = vmatprep.subr.mxu0 %v554_v51  ;;  %908 = vmatprep.subr.mxu1 %v682_v52  ;;  %v673_v62 = vld [vmem:[%s5831_s3 + $0x6a0] sm:$0xff]  ;;  %v542_v63 = vld [vmem:[%s5831_s3 + $0x288] sm:$0xff]  ;;  %v523_v51 = vld [vmem:[%s5831_s3 + $0x1f0] sm:$0xff] }
  0x50   :  { %766 = vmatpush2.msra.mxu0 %v553_v53  ;;  %909 = vmatpush2.msra.mxu1 %v681_v54  ;;  %v670_v0 = vld [vmem:[%s5831_s3 + $0x688] sm:$0xff]  ;;  %v541_v1 = vld [vmem:[%s5831_s3 + $0x280] sm:$0xff]  ;;  %v651_v52 = vld [vmem:[%s5831_s3 + $0x5f0] sm:$0xff] }
  0x51   :  { %767 = vmatprep.subr.mxu0 %v550_v55  ;;  %910 = vmatprep.subr.mxu1 %v678_v56  ;;  %v669_v2 = vld [vmem:[%s5831_s3 + $0x680] sm:$0xff]  ;;  %v538_v3 = vld [vmem:[%s5831_s3 + $0x268] sm:$0xff]  ;;  %v520_v55 = vld [vmem:[%s5831_s3 + $0x1d8] sm:$0xff] }
  0x52   :  { %768 = vmatpush2.msra.mxu0 %v549_v57  ;;  %911 = vmatpush2.msra.mxu1 %v677_v58  ;;  %v666_v5 = vld [vmem:[%s5831_s3 + $0x668] sm:$0xff]  ;;  %v537_v6 = vld [vmem:[%s5831_s3 + $0x260] sm:$0xff]  ;;  %v648_v56 = vld [vmem:[%s5831_s3 + $0x5d8] sm:$0xff] }
  0x53   :  { %769 = vmatprep.subr.mxu0 %v546_v59  ;;  %912 = vmatprep.subr.mxu1 %v674_v60  ;;  %v665_v7 = vld [vmem:[%s5831_s3 + $0x660] sm:$0xff]  ;;  %v534_v8 = vld [vmem:[%s5831_s3 + $0x248] sm:$0xff]  ;;  %v519_v59 = vld [vmem:[%s5831_s3 + $0x1d0] sm:$0xff] }
  0x54   :  { %770 = vmatpush2.msra.mxu0 %v545_v61  ;;  %913 = vmatpush2.msra.mxu1 %v673_v62  ;;  %v662_v9 = vld [vmem:[%s5831_s3 + $0x648] sm:$0xff]  ;;  %v533_v10 = vld [vmem:[%s5831_s3 + $0x240] sm:$0xff]  ;;  %v647_v60 = vld [vmem:[%s5831_s3 + $0x5d0] sm:$0xff] }
  0x55   :  { %771 = vmatprep.subr.mxu0 %v542_v63  ;;  %914 = vmatprep.subr.mxu1 %v670_v0  ;;  %v661_v11 = vld [vmem:[%s5831_s3 + $0x640] sm:$0xff]  ;;  %v530_v12 = vld [vmem:[%s5831_s3 + $0x228] sm:$0xff] }
  0x56   :  { %772 = vmatpush2.msra.mxu0 %v541_v1  ;;  %915 = vmatpush2.msra.mxu1 %v669_v2  ;;  %v658_v13 = vld [vmem:[%s5831_s3 + $0x628] sm:$0xff]  ;;  %v529_v14 = vld [vmem:[%s5831_s3 + $0x220] sm:$0xff] }
  0x57   :  { %773 = vmatprep.subr.mxu0 %v538_v3  ;;  %916 = vmatprep.subr.mxu1 %v666_v5  ;;  %v657_v15 = vld [vmem:[%s5831_s3 + $0x620] sm:$0xff]  ;;  %v526_v16 = vld [vmem:[%s5831_s3 + $0x208] sm:$0xff]  ;;  %v516_v3 = vld [vmem:[%s5831_s3 + $0x1b8] sm:$0xff] }
  0x58   :  { %774 = vmatpush2.msra.mxu0 %v537_v6  ;;  %917 = vmatpush2.msra.mxu1 %v665_v7  ;;  %v654_v17 = vld [vmem:[%s5831_s3 + $0x608] sm:$0xff]  ;;  %v525_v18 = vld [vmem:[%s5831_s3 + $0x200] sm:$0xff]  ;;  %v644_v5 = vld [vmem:[%s5831_s3 + $0x5b8] sm:$0xff] }
  0x59   :  { %775 = vmatprep.subr.mxu0 %v534_v8  ;;  %918 = vmatprep.subr.mxu1 %v662_v9  ;;  %v653_v19 = vld [vmem:[%s5831_s3 + $0x600] sm:$0xff] }
  0x5a   :  { %776 = vmatpush2.msra.mxu0 %v533_v10  ;;  %919 = vmatpush2.msra.mxu1 %v661_v11  ;;  %v48_v26 = vld [vmem:[%s5830_s2] sm:$0xf] }
  0x5b   :  { %777 = vmatprep.subr.mxu0 %v530_v12  ;;  %920 = vmatprep.subr.mxu1 %v658_v13  ;;  %v3450_v29 = vrot.slane %v48_v26, %v52_v24  ;;  %v3452_v30 = vrot.slane %v48_v26, %v60_v25  ;;  %v3454_v31 = vrot.slane %v48_v26, %v56_v27  ;;  %v515_v12 = vld [vmem:[%s5831_s3 + $0x1b0] sm:$0xff] }
  0x5c   :  { %778 = vmatpush2.msra.mxu0 %v529_v14  ;;  %921 = vmatpush2.msra.mxu1 %v657_v15  ;;  %v3456_v32 = vrot.slane %v48_v26, %v64_v28  ;;  %v643_v13 = vld [vmem:[%s5831_s3 + $0x5b0] sm:$0xff]  ;;  %v512_v14 = vld [vmem:[%s5831_s3 + $0x198] sm:$0xff] }
  0x5d   :  { %779 = vmatprep.subr.mxu0 %v526_v16  ;;  %922 = vmatprep.subr.mxu1 %v654_v17  ;;  %v640_v15 = vld [vmem:[%s5831_s3 + $0x598] sm:$0xff] }
  0x5e   :  { %780 = vmatpush2.msra.mxu0 %v525_v18  ;;  %923 = vmatpush2.msra.mxu1 %v653_v19  ;;  %v508_v28 = vld [vmem:[%s5831_s3 + $0x178] sm:$0xff] }
  0x5f   :  { %1003 = vmatprep.subr.mxu0 %v524_v20  ;;  %1146 = vmatprep.subr.mxu1 %v652_v21  ;;  %v511_v20 = vld [vmem:[%s5831_s3 + $0x190] sm:$0xff] }
  0x60   :  { %v639_v21 = vld [vmem:[%s5831_s3 + $0x590] sm:$0xff] }
  0xc6   :  { %v189_v33 = vpop.f32.mrf.mxu0  ;;  %v332_v34 = vpop.f32.mrf.mxu1 }
  0xc7   :  { %v3459_v35 = vadd.f32 %v189_v33, %v3450_v29  ;;  %v3462_v36 = vadd.f32 %v332_v34, %v3452_v30  ;;  %v636_v33 = vld [vmem:[%s5831_s3 + $0x578] sm:$0xff] }
  0xc8   :  { %v191_v37 = vpop.f32.mrf.mxu0  ;;  %v334_v38 = vpop.f32.mrf.mxu1 }
  0xc9   :  { %v3465_v39 = vadd.f32 %v191_v37, %v3454_v31  ;;  %v3468_v40 = vadd.f32 %v334_v38, %v3456_v32  ;;  %v5870_v45 = vmax.f32 %v3459_v35, 0.0  ;;  %v5867_v46 = vmax.f32 %v3462_v36, 0.0 }
  0xca   :  { %v195_v41 = vpop.f32.mrf.mxu0  ;;  %v338_v42 = vpop.f32.mrf.mxu1 }
  0xcb   :  { %v5876_v43 = vmax.f32 %v3465_v39, 0.0  ;;  %v5873_v44 = vmax.f32 %v3468_v40, 0.0  ;;  %v3475_v47 = vadd.f32 %v195_v41, %v3450_v29  ;;  %v3478_v48 = vadd.f32 %v338_v42, %v3452_v30  ;;  %v507_v42 = vld [vmem:[%s5831_s3 + $0x170] sm:$0xff] }
  0xcc   :  { %v197_v49 = vpop.f32.mrf.mxu0  ;;  %v340_v50 = vpop.f32.mrf.mxu1 }
  0xcd   :  { %v3487_v53 = vadd.f32 %v197_v49, %v3454_v31  ;;  %v3490_v54 = vadd.f32 %v340_v50, %v3456_v32  ;;  %781 = vmatprep.mubr.f32.mxu0 %v5876_v43  ;;  %924 = vmatprep.mubr.f32.mxu1 %v5873_v44  ;;  %v5858_v63 = vmax.f32 %v3475_v47, 0.0  ;;  %v5857_v0 = vmax.f32 %v3478_v48, 0.0  ;;  %v635_v49 = vld [vmem:[%s5831_s3 + $0x570] sm:$0xff]  ;;  %v580_v43 = vld [vmem:[%s5831_s3 + $0x3b8] sm:$0xff] }
  0xce   :  { %v201_v57 = vpop.f32.mrf.mxu0  ;;  %v344_v58 = vpop.f32.mrf.mxu1  ;;  %782 = vmatmul.mubr.f32.vlgmr.msra.gmra.mxu0 %v5870_v45  ;;  %925 = vmatmul.mubr.f32.vlgmr.msra.gmra.mxu1 %v5867_v46  ;;  %v588_v45 = vld [vmem:[%s5831_s3 + $0x3f8] sm:$0xff] }
  0xcf   :  { %v5866_v61 = vmax.f32 %v3487_v53, 0.0  ;;  %v5865_v62 = vmax.f32 %v3490_v54, 0.0  ;;  %1004 = vmatpush1.msra.mxu0 %v523_v51  ;;  %1147 = vmatpush1.msra.mxu1 %v651_v52  ;;  %v3529_v8 = vadd.f32 %v201_v57, %v3450_v29  ;;  %v3532_v9 = vadd.f32 %v344_v58, %v3452_v30  ;;  %v504_v52 = vld [vmem:[%s5831_s3 + $0x158] sm:$0xff]  ;;  %v503_v58 = vld [vmem:[%s5831_s3 + $0x150] sm:$0xff] }
  0xd0   :  { %1005 = vmatprep.subr.mxu0 %v520_v55  ;;  %1148 = vmatprep.subr.mxu1 %v648_v56  ;;  %v203_v1 = vpop.f32.mrf.mxu0  ;;  %v346_v2 = vpop.f32.mrf.mxu1  ;;  %v632_v55 = vld [vmem:[%s5831_s3 + $0x558] sm:$0xff] }
  0xd1   :  { %v3523_v6 = vadd.f32 %v203_v1, %v3454_v31  ;;  %v3526_v7 = vadd.f32 %v346_v2, %v3456_v32  ;;  %1006 = vmatpush1.msra.mxu0 %v519_v59  ;;  %1149 = vmatpush1.msra.mxu1 %v647_v60  ;;  %v5848_v24 = vmax.f32 %v3529_v8, 0.0  ;;  %v5847_v25 = vmax.f32 %v3532_v9, 0.0  ;;  %v631_v59 = vld [vmem:[%s5831_s3 + $0x550] sm:$0xff] }
  0xd2   :  { %787 = vmatprep.mubr.f32.mxu0 %v5866_v61  ;;  %930 = vmatprep.mubr.f32.mxu1 %v5865_v62  ;;  %v207_v10 = vpop.f32.mrf.mxu0  ;;  %v350_v11 = vpop.f32.mrf.mxu1 }
  0xd3   :  { %1007 = vmatprep.subr.mxu0 %v516_v3  ;;  %1150 = vmatprep.subr.mxu1 %v644_v5  ;;  %v5854_v16 = vmax.f32 %v3523_v6, 0.0  ;;  %v5851_v17 = vmax.f32 %v3526_v7, 0.0  ;;  %v3577_v38 = vadd.f32 %v207_v10, %v3450_v29  ;;  %v3580_v41 = vadd.f32 %v350_v11, %v3452_v30  ;;  %v500_v11 = vld [vmem:[%s5831_s3 + $0x138] sm:$0xff] }
  0xd4   :  { %788 = vmatmul.mubr.f32.gmra.mxu0 %v5858_v63  ;;  %931 = vmatmul.mubr.f32.gmra.mxu1 %v5857_v0  ;;  %v209_v18 = vpop.f32.mrf.mxu0  ;;  %v352_v19 = vpop.f32.mrf.mxu1 }
  0xd5   :  { %1008 = vmatpush1.msra.mxu0 %v515_v12  ;;  %1151 = vmatpush1.msra.mxu1 %v643_v13  ;;  %v3565_v26 = vadd.f32 %v209_v18, %v3454_v31  ;;  %v3568_v27 = vadd.f32 %v352_v19, %v3456_v32  ;;  %v5842_v2 = vmax.f32 %v3577_v38, 0.0  ;;  %v5841_v3 = vmax.f32 %v3580_v41, 0.0  ;;  %v628_v12 = vld [vmem:[%s5831_s3 + $0x538] sm:$0xff]  ;;  %v499_v19 = vld [vmem:[%s5831_s3 + $0x130] sm:$0xff] }
  0xd6   :  { %1009 = vmatprep.subr.mxu0 %v512_v14  ;;  %1152 = vmatprep.subr.mxu1 %v640_v15  ;;  %v213_v34 = vpop.f32.mrf.mxu0  ;;  %v356_v37 = vpop.f32.mrf.mxu1 }
  0xd7   :  { %1010 = vmatpush1.msra.mxu0 %v511_v20  ;;  %1153 = vmatpush1.msra.mxu1 %v639_v21  ;;  %v5846_v56 = vmax.f32 %v3565_v26, 0.0  ;;  %v5843_v57 = vmax.f32 %v3568_v27, 0.0  ;;  %v3625_v15 = vadd.f32 %v213_v34, %v3450_v29  ;;  %v3628_v18 = vadd.f32 %v356_v37, %v3452_v30  ;;  %v627_v20 = vld [vmem:[%s5831_s3 + $0x530] sm:$0xff]  ;;  %v624_v34 = vld [vmem:[%s5831_s3 + $0x518] sm:$0xff] }
  0xd8   :  { %793 = vmatprep.mubr.f32.mxu0 %v5854_v16  ;;  %936 = vmatprep.mubr.f32.mxu1 %v5851_v17  ;;  %v215_v50 = vpop.f32.mrf.mxu0  ;;  %v358_v51 = vpop.f32.mrf.mxu1 }
  0xd9   :  { %1011 = vmatprep.subr.mxu0 %v508_v28  ;;  %1154 = vmatprep.subr.mxu1 %v636_v33  ;;  %v3613_v5 = vadd.f32 %v215_v50, %v3454_v31  ;;  %v3616_v10 = vadd.f32 %v358_v51, %v3456_v32  ;;  %v496_v33 = vld [vmem:[%s5831_s3 + $0x118] sm:$0xff]  ;;  %v623_v50 = vld [vmem:[%s5831_s3 + $0x510] sm:$0xff] }
  0xda   :  { %794 = vmatmul.mubr.f32.gmra.mxu0 %v5848_v24  ;;  %937 = vmatmul.mubr.f32.gmra.mxu1 %v5847_v25  ;;  %v219_v60 = vpop.f32.mrf.mxu0  ;;  %v362_v1 = vpop.f32.mrf.mxu1  ;;  %v484_v25 = vld [vmem:[%s5831_s3 + $0xb8] sm:$0xff] }
  0xdb   :  { %1012 = vmatpush1.msra.mxu0 %v507_v42  ;;  %1155 = vmatpush1.msra.mxu1 %v635_v49  ;;  %v5840_v37 = vmax.f32 %v3613_v5, 0.0  ;;  %v5839_v42 = vmax.f32 %v3616_v10, 0.0  ;;  %v495_v49 = vld [vmem:[%s5831_s3 + $0x110] sm:$0xff] }
  0xdc   :  { %1013 = vmatprep.subr.mxu0 %v504_v52  ;;  %1156 = vmatprep.subr.mxu1 %v632_v55  ;;  %v221_v13 = vpop.f32.mrf.mxu0  ;;  %v364_v14 = vpop.f32.mrf.mxu1  ;;  %v5844_v55 = vmax.f32 %v3625_v15, 0.0 }
  0xdd   :  { %1014 = vmatpush1.msra.mxu0 %v503_v58  ;;  %1157 = vmatpush1.msra.mxu1 %v631_v59  ;;  %v5845_v58 = vmax.f32 %v3628_v18, 0.0  ;;  %v3661_v59 = vadd.f32 %v221_v13, %v3454_v31  ;;  %v3677_v13 = vadd.f32 %v219_v60, %v3450_v29 }
  0xde   :  { %799 = vmatprep.mubr.f32.mxu0 %v5846_v56  ;;  %942 = vmatprep.mubr.f32.mxu1 %v5843_v57  ;;  %v225_v21 = vpop.f32.mrf.mxu0  ;;  %v368_v28 = vpop.f32.mrf.mxu1 }
  0xdf   :  { %1015 = vmatprep.subr.mxu0 %v500_v11  ;;  %1158 = vmatprep.subr.mxu1 %v628_v12  ;;  %v3664_v11 = vadd.f32 %v364_v14, %v3456_v32  ;;  %v492_v12 = vld [vmem:[%s5831_s3 + $0xf8] sm:$0xff]  ;;  %v3680_v14 = vadd.f32 %v362_v1, %v3452_v30  ;;  %v5852_v57 = vmax.f32 %v3677_v13, 0.0 }
  0xe0   :  { %800 = vmatmul.mubr.f32.gmra.mxu0 %v5842_v2  ;;  %943 = vmatmul.mubr.f32.gmra.mxu1 %v5841_v3  ;;  %v227_v51 = vpop.f32.mrf.mxu0  ;;  %v370_v52 = vpop.f32.mrf.mxu1  ;;  %v488_v1 = vld [vmem:[%s5831_s3 + $0xd8] sm:$0xff] }
  0xe1   :  { %1016 = vmatpush1.msra.mxu0 %v499_v19  ;;  %1159 = vmatpush1.msra.mxu1 %v627_v20  ;;  %v620_v19 = vld [vmem:[%s5831_s3 + $0x4f8] sm:$0xff]  ;;  %v3720_v56 = vadd.f32 %v370_v52, %v3456_v32  ;;  %v483_v52 = vld [vmem:[%s5831_s3 + $0xb0] sm:$0xff] }
  0xe2   :  { %1017 = vmatprep.subr.mxu0 %v496_v33  ;;  %1160 = vmatprep.subr.mxu1 %v624_v34  ;;  %v3672_v20 = vpop.f32.mrf.mxu0  ;;  %v3674_v22 = vpop.f32.mrf.mxu1  ;;  %v491_v33 = vld [vmem:[%s5831_s3 + $0xf0] sm:$0xff] }
  0xe3   :  { %1018 = vmatpush1.msra.mxu0 %v495_v49  ;;  %1161 = vmatpush1.msra.mxu1 %v623_v50  ;;  %v619_v34 = vld [vmem:[%s5831_s3 + $0x4f0] sm:$0xff]  ;;  %v616_v50 = vld [vmem:[%s5831_s3 + $0x4d8] sm:$0xff] }
  0xe4   :  { %805 = vmatprep.mubr.f32.mxu0 %v5840_v37  ;;  %948 = vmatprep.mubr.f32.mxu1 %v5839_v42  ;;  %v233_v49 = vpop.f32.mrf.mxu0  ;;  %v376_v60 = vpop.f32.mrf.mxu1  ;;  %v5850_v42 = vmax.f32 %v3661_v59, 0.0  ;;  %v5849_v37 = vmax.f32 %v3664_v11, 0.0 }
  0xe5   :  { %1019 = vmatprep.subr.mxu0 %v492_v12  ;;  %1162 = vmatprep.subr.mxu1 %v620_v19  ;;  %v487_v12 = vld [vmem:[%s5831_s3 + $0xd0] sm:$0xff]  ;;  %v3772_v16 = vadd.f32 %v376_v60, %v3456_v32 }
  0xe6   :  { %806 = vmatmul.mubr.f32.gmra.mxu0 %v5844_v55  ;;  %949 = vmatmul.mubr.f32.gmra.mxu1 %v5845_v58  ;;  %v615_v19 = vld [vmem:[%s5831_s3 + $0x4d0] sm:$0xff]  ;;  %v3710_v3 = vpop.f32.mrf.mxu0  ;;  %v3712_v2 = vpop.f32.mrf.mxu1  ;;  %v5853_v55 = vmax.f32 %v3680_v14, 0.0  ;;  %v3717_v58 = vadd.f32 %v227_v51, %v3454_v31  ;;  %v3732_v51 = vadd.f32 %v368_v28, %v3452_v30  ;;  %v608_v28 = vld [vmem:[%s5831_s3 + $0x498] sm:$0xff] }
  0xe7   :  { %1020 = vmatpush1.msra.mxu0 %v491_v33  ;;  %1163 = vmatpush1.msra.mxu1 %v619_v34  ;;  %v612_v33 = vld [vmem:[%s5831_s3 + $0x4b8] sm:$0xff]  ;;  %v475_v60 = vld [vmem:[%s5831_s3 + $0x70] sm:$0xff] }
  0xe8   :  { %1021 = vmatprep.subr.mxu0 %v488_v1  ;;  %1164 = vmatprep.subr.mxu1 %v616_v50  ;;  %v239_v34 = vpop.f32.mrf.mxu0  ;;  %v382_v24 = vpop.f32.mrf.mxu1  ;;  %v3729_v1 = vadd.f32 %v225_v21, %v3450_v29  ;;  %v611_v50 = vld [vmem:[%s5831_s3 + $0x4b0] sm:$0xff]  ;;  %v480_v21 = vld [vmem:[%s5831_s3 + $0x98] sm:$0xff] }
  0xe9   :  { %1022 = vmatpush1.msra.mxu0 %v487_v12  ;;  %1165 = vmatpush1.msra.mxu1 %v615_v19  ;;  %v5856_v12 = vmax.f32 %v3717_v58, 0.0  ;;  %v5855_v19 = vmax.f32 %v3720_v56, 0.0 }
  0xea   :  { %811 = vmatprep.mubr.f32.mxu0 %v5850_v42  ;;  %954 = vmatprep.mubr.f32.mxu1 %v5849_v37  ;;  %v3762_v37 = vpop.f32.mrf.mxu0  ;;  %v3764_v42 = vpop.f32.mrf.mxu1  ;;  %v5859_v17 = vmax.f32 %v3729_v1, 0.0 }
  0xeb   :  { %1023 = vmatprep.subr.mxu0 %v484_v25  ;;  %1166 = vmatprep.subr.mxu1 %v612_v33  ;;  %v479_v25 = vld [vmem:[%s5831_s3 + $0x90] sm:$0xff] }
  0xec   :  { %812 = vmatmul.mubr.f32.gmra.mxu0 %v5852_v57  ;;  %955 = vmatmul.mubr.f32.gmra.mxu1 %v5853_v55  ;;  %v607_v33 = vld [vmem:[%s5831_s3 + $0x490] sm:$0xff]  ;;  %v5860_v57 = vmax.f32 %v3732_v51, 0.0  ;;  %v3769_v55 = vadd.f32 %v233_v49, %v3454_v31  ;;  %v3786_v49 = vadd.f32 %v3674_v22, %v3452_v30  ;;  %v472_v22 = vld [vmem:[%s5831_s3 + $0x58] sm:$0xff] }
  0xed   :  { %1024 = vmatpush1.msra.mxu0 %v483_v52  ;;  %1167 = vmatpush1.msra.mxu1 %v611_v50  ;;  %v476_v52 = vld [vmem:[%s5831_s3 + $0x78] sm:$0xff] }
  0xee   :  { %1025 = vmatprep.subr.mxu0 %v480_v21  ;;  %1168 = vmatprep.subr.mxu1 %v608_v28  ;;  %v604_v50 = vld [vmem:[%s5831_s3 + $0x478] sm:$0xff]  ;;  %v3782_v21 = vadd.f32 %v3672_v20, %v3450_v29  ;;  %v603_v28 = vld [vmem:[%s5831_s3 + $0x470] sm:$0xff]  ;;  %v5868_v63 = vmax.f32 %v3786_v49, 0.0 }
  0xef   :  { %1026 = vmatpush1.msra.mxu0 %v479_v25  ;;  %1169 = vmatpush1.msra.mxu1 %v607_v33  ;;  %v600_v20 = vld [vmem:[%s5831_s3 + $0x458] sm:$0xff]  ;;  %v245_v25 = vpop.f32.mrf.mxu0  ;;  %v388_v33 = vpop.f32.mrf.mxu1 }
  0xf0   :  { %817 = vmatprep.mubr.f32.mxu0 %v5856_v12  ;;  %960 = vmatprep.mubr.f32.mxu1 %v5855_v19  ;;  %v5864_v19 = vmax.f32 %v3769_v55, 0.0  ;;  %v5863_v12 = vmax.f32 %v3772_v16, 0.0  ;;  %v5869_v0 = vmax.f32 %v3782_v21, 0.0 }
  0xf1   :  { %1027 = vmatprep.subr.mxu0 %v476_v52  ;;  %1170 = vmatprep.subr.mxu1 %v604_v50  ;;  %v471_v52 = vld [vmem:[%s5831_s3 + $0x50] sm:$0xff] }
  0xf2   :  { %818 = vmatmul.mubr.f32.gmra.mxu0 %v5859_v17  ;;  %961 = vmatmul.mubr.f32.gmra.mxu1 %v5860_v57  ;;  %v599_v50 = vld [vmem:[%s5831_s3 + $0x450] sm:$0xff]  ;;  %v3819_v17 = vadd.f32 %v239_v34, %v3454_v31  ;;  %v3822_v57 = vadd.f32 %v382_v24, %v3456_v32  ;;  %v3836_v34 = vadd.f32 %v3710_v3, %v3450_v29  ;;  %v592_v3 = vld [vmem:[%s5831_s3 + $0x418] sm:$0xff] }
  0xf3   :  { %1028 = vmatpush1.msra.mxu0 %v475_v60  ;;  %1171 = vmatpush1.msra.mxu1 %v603_v28  ;;  %v596_v60 = vld [vmem:[%s5831_s3 + $0x438] sm:$0xff]  ;;  %v3830_v28 = vpop.f32.mrf.mxu0  ;;  %v3840_v24 = vadd.f32 %v3712_v2, %v3452_v30 }
  0xf4   :  { %1029 = vmatprep.subr.mxu0 %v472_v22  ;;  %1172 = vmatprep.subr.mxu1 %v600_v20  ;;  %v3832_v22 = vpop.f32.mrf.mxu1  ;;  %v467_v20 = vld [vmem:[%s5831_s3 + $0x30] sm:$0xff]  ;;  %v464_v2 = vld [vmem:[%s5831_s3 + $0x18] sm:$0xff]  ;;  %v5874_v61 = vmax.f32 %v3836_v34, 0.0 }
  0xf5   :  { %1030 = vmatpush1.msra.mxu0 %v471_v52  ;;  %1173 = vmatpush1.msra.mxu1 %v599_v50  ;;  %v595_v52 = vld [vmem:[%s5831_s3 + $0x430] sm:$0xff]  ;;  %v5872_v50 = vmax.f32 %v3819_v17, 0.0  ;;  %v5875_v46 = vmax.f32 %v3840_v24, 0.0 }
  0xf6   :  { %823 = vmatprep.mubr.f32.mxu0 %v5864_v19  ;;  %966 = vmatprep.mubr.f32.mxu1 %v5863_v12  ;;  %v5871_v12 = vmax.f32 %v3822_v57, 0.0  ;;  %v251_v19 = vpop.f32.mrf.mxu0  ;;  %v394_v62 = vpop.f32.mrf.mxu1 }
  0xf7   :  { %1031 = vmatprep.subr.mxu0 %v468_v4  ;;  %1174 = vmatprep.subr.mxu1 %v596_v60  ;;  %v463_v4 = vld [vmem:[%s5831_s3 + $0x10] sm:$0xff] }
  0xf8   :  { %824 = vmatmul.mubr.f32.gmra.mxu0 %v5869_v0  ;;  %967 = vmatmul.mubr.f32.gmra.mxu1 %v5868_v63  ;;  %v591_v60 = vld [vmem:[%s5831_s3 + $0x410] sm:$0xff]  ;;  %v3873_v63 = vadd.f32 %v245_v25, %v3454_v31  ;;  %v3876_v0 = vadd.f32 %v388_v33, %v3456_v32  ;;  %v3890_v25 = vadd.f32 %v3764_v42, %v3452_v30  ;;  %v712_v42 = vld [vmem:[%s5831_s3 + $0x7d8] sm:$0xff] }
  0xf9   :  { %1032 = vmatpush1.msra.mxu0 %v467_v20  ;;  %1175 = vmatpush1.msra.mxu1 %v595_v52  ;;  %v716_v20 = vld [vmem:[%s5831_s3 + $0x7f8] sm:$0xff]  ;;  %v3886_v52 = vadd.f32 %v3762_v37, %v3450_v29  ;;  %v587_v33 = vld [vmem:[%s5831_s3 + $0x3f0] sm:$0xff] }
  0xfa   :  { %1033 = vmatprep.subr.mxu0 %v464_v2  ;;  %1176 = vmatprep.subr.mxu1 %v592_v3  ;;  %5937 = vst [vmem:[#allocation9_spill] sm:$0xff] %v3890_v25  ;;  %v715_v2 = vld [vmem:[%s5831_s3 + $0x7f0] sm:$0xff]  ;;  %v584_v37 = vld [vmem:[%s5831_s3 + $0x3d8] sm:$0xff]  ;;  %v255_v3 = vpop.f32.mrf.mxu0 }
  0xfb   :  { %1034 = vmatpush1.msra.mxu0 %v463_v4  ;;  %1177 = vmatpush1.msra.mxu1 %v591_v60  ;;  %v398_v4 = vpop.f32.mrf.mxu1  ;;  %v5878_v60 = vmax.f32 %v3873_v63, 0.0 }
  0xfc   :  { %829 = vmatprep.mubr.f32.mxu0 %v5872_v50  ;;  %972 = vmatprep.mubr.f32.mxu1 %v5871_v12  ;;  %v5877_v12 = vmax.f32 %v3876_v0, 0.0  ;;  %v5881_v50 = vmax.f32 %v3886_v52, 0.0 }
  0xfd   :  { %1035 = vmatprep.subr.mxu0 %v588_v45  ;;  %1178 = vmatprep.subr.mxu1 %v716_v20  ;;  %v583_v45 = vld [vmem:[%s5831_s3 + $0x3d0] sm:$0xff]  ;;  %v400_v44 = vpop.f32.mrf.mxu1 }
  0xfe   :  { %830 = vmatmul.mubr.f32.gmra.mxu0 %v5874_v61  ;;  %973 = vmatmul.mubr.f32.gmra.mxu1 %v5875_v46  ;;  %v711_v20 = vld [vmem:[%s5831_s3 + $0x7d0] sm:$0xff]  ;;  %v3923_v61 = vadd.f32 %v251_v19, %v3454_v31  ;;  %v3926_v46 = vadd.f32 %v394_v62, %v3456_v32  ;;  %v3940_v62 = vadd.f32 %v3832_v22, %v3452_v30  ;;  %v704_v22 = vld [vmem:[%s5831_s3 + $0x798] sm:$0xff] }
  0xff   :  { %1036 = vmatpush2.msra.mxu0 %v587_v33  ;;  %1179 = vmatpush2.msra.mxu1 %v715_v2  ;;  %v708_v33 = vld [vmem:[%s5831_s3 + $0x7b8] sm:$0xff]  ;;  %v257_v2 = vpop.f32.mrf.mxu0  ;;  %v579_v19 = vld [vmem:[%s5831_s3 + $0x3b0] sm:$0xff] }
 0x100   :  { %1037 = vmatprep.subr.mxu0 %v584_v37  ;;  %1180 = vmatprep.subr.mxu1 %v712_v42  ;;  %5938 = vst [vmem:[#allocation10_spill] sm:$0xff] %v3926_v46  ;;  %v3936_v37 = vadd.f32 %v3830_v28, %v3450_v29  ;;  %5939 = vst [vmem:[#allocation11_spill] sm:$0xff] %v3940_v62  ;;  %v707_v42 = vld [vmem:[%s5831_s3 + $0x7b0] sm:$0xff]  ;;  %v576_v28 = vld [vmem:[%s5831_s3 + $0x398] sm:$0xff] }
 0x101   :  { %1038 = vmatpush2.msra.mxu0 %v583_v45  ;;  %1181 = vmatpush2.msra.mxu1 %v711_v20  ;;  %v404_v45 = vpop.f32.mrf.mxu1 }
 0x102   :  { %835 = vmatprep.mubr.f32.mxu0 %v5878_v60  ;;  %978 = vmatprep.mubr.f32.mxu1 %v5877_v12  ;;  %v5940_v12 = vmax.f32 %v3890_v25, 0.0  ;;  %v261_v60 = vpop.f32.mrf.mxu0  ;;  %v5884_v20 = vmax.f32 %v3936_v37, 0.0  ;;  %v572_v25 = vld [vmem:[%s5831_s3 + $0x378] sm:$0xff] }
 0x103   :  { %1039 = vmatprep.subr.mxu0 %v580_v43  ;;  %1182 = vmatprep.subr.mxu1 %v708_v33  ;;  %v575_v43 = vld [vmem:[%s5831_s3 + $0x390] sm:$0xff] }
 0x104   :  { %836 = vmatmul.mubr.f32.gmra.mxu0 %v5881_v50  ;;  %979 = vmatmul.mubr.f32.gmra.mxu1 %v5940_v12  ;;  %v703_v33 = vld [vmem:[%s5831_s3 + $0x790] sm:$0xff]  ;;  %v3973_v12 = vadd.f32 %v257_v2, %v3454_v31  ;;  %v3976_v50 = vadd.f32 %v400_v44, %v3456_v32  ;;  %v5941_v2 = vmax.f32 %v3923_v61, 0.0  ;;  %v5942_v44 = vmax.f32 %v3926_v46, 0.0 }
 0x105   :  { %1040 = vmatpush2.msra.mxu0 %v579_v19  ;;  %1183 = vmatpush2.msra.mxu1 %v707_v42  ;;  %v700_v19 = vld [vmem:[%s5831_s3 + $0x778] sm:$0xff]  ;;  %v3985_v42 = vadd.f32 %v255_v3, %v3450_v29  ;;  %v695_v46 = vld [vmem:[%s5831_s3 + $0x750] sm:$0xff] }
 0x106   :  { %1041 = vmatprep.subr.mxu0 %v576_v28  ;;  %1184 = vmatprep.subr.mxu1 %v704_v22  ;;  %v3988_v28 = vadd.f32 %v398_v4, %v3452_v30  ;;  %v571_v22 = vld [vmem:[%s5831_s3 + $0x370] sm:$0xff]  ;;  %v568_v3 = vld [vmem:[%s5831_s3 + $0x358] sm:$0xff] }
 0x107   :  { %1042 = vmatpush2.msra.mxu0 %v575_v43  ;;  %1185 = vmatpush2.msra.mxu1 %v703_v33  ;;  %v699_v43 = vld [vmem:[%s5831_s3 + $0x770] sm:$0xff]  ;;  %v696_v4 = vld [vmem:[%s5831_s3 + $0x758] sm:$0xff]  ;;  %v263_v33 = vpop.f32.mrf.mxu0 }
 0x108   :  { %841 = vmatprep.mubr.f32.mxu0 %v5941_v2  ;;  %984 = vmatprep.mubr.f32.mxu1 %v5942_v44  ;;  %v406_v2 = vpop.f32.mrf.mxu1  ;;  %v453_v44 = vmax.f32 %v3985_v42, 0.0  ;;  %v455_v23 = vmax.f32 %v3988_v28, 0.0  ;;  %v1584_v42 = vld [vmem:[%s5832_s4 + $0x18] sm:$0xff]  ;;  %v1617_v28 = vld [vmem:[%s5832_s4 + $0x120] sm:$0xff] }
 0x109   :  { %1043 = vmatprep.subr.mxu0 %v572_v25  ;;  %1186 = vmatprep.subr.mxu1 %v700_v19  ;;  %v5943_v25 = vmax.f32 %v3940_v62, 0.0  ;;  %v567_v19 = vld [vmem:[%s5831_s3 + $0x350] sm:$0xff]  ;;  %v564_v62 = vld [vmem:[%s5831_s3 + $0x338] sm:$0xff] }
 0x10a   :  { %842 = vmatmul.mubr.f32.gmra.mxu0 %v5884_v20  ;;  %1187 = vmatpush2.msra.mxu1 %v699_v43  ;;  %v4021_v20 = vadd.f32 %v263_v33, %v3454_v31  ;;  %v4033_v43 = vadd.f32 %v261_v60, %v3450_v29  ;;  %v5944_v31 = vmax.f32 %v3973_v12, 0.0  ;;  %v560_v29 = vld [vmem:[%s5831_s3 + $0x318] sm:$0xff]  ;;  %v687_v33 = vld [vmem:[%s5831_s3 + $0x710] sm:$0xff] }
 0x10b   :  { %985 = vmatmul.mubr.f32.gmra.mxu1 %v5943_v25  ;;  %1044 = vmatpush2.msra.mxu0 %v571_v22  ;;  %v4024_v25 = vadd.f32 %v406_v2, %v3456_v32  ;;  %v692_v22 = vld [vmem:[%s5831_s3 + $0x738] sm:$0xff]  ;;  %v5945_v32 = vmax.f32 %v3976_v50, 0.0 }
 0x10c   :  { %1045 = vmatprep.subr.mxu0 %v568_v3  ;;  %1188 = vmatprep.subr.mxu1 %v696_v4  ;;  %v4036_v3 = vadd.f32 %v404_v45, %v3452_v30  ;;  %v563_v4 = vld [vmem:[%s5831_s3 + $0x330] sm:$0xff]  ;;  %v688_v30 = vld [vmem:[%s5831_s3 + $0x718] sm:$0xff]  ;;  %v458_v60 = vmax.f32 %v4021_v20, 0.0  ;;  %v457_v2 = vmax.f32 %v4033_v43, 0.0 }
 0x10d   :  { %1046 = vmatpush2.msra.mxu0 %v567_v19  ;;  %1189 = vmatpush2.msra.mxu1 %v695_v46  ;;  %v691_v46 = vld [vmem:[%s5831_s3 + $0x730] sm:$0xff]  ;;  %v460_v45 = vmax.f32 %v4024_v25, 0.0  ;;  %v1598_v25 = vld [vmem:[%s5832_s4 + $0x88] sm:$0xff]  ;;  %v1616_v43 = vld [vmem:[%s5832_s4 + $0x118] sm:$0xff] }
 0x10e   :  { %847 = vmatprep.mubr.f32.mxu0 %v5944_v31  ;;  %990 = vmatprep.mubr.f32.mxu1 %v5945_v32  ;;  %v459_v19 = vmax.f32 %v4036_v3, 0.0  ;;  %v684_v31 = vld [vmem:[%s5831_s3 + $0x6f8] sm:$0xff]  ;;  %v555_v32 = vld [vmem:[%s5831_s3 + $0x2f0] sm:$0xff]  ;;  %v1582_v3 = vld [vmem:[%s5832_s4 + $0x8] sm:$0xff] }
 0x10f   :  { %1047 = vmatprep.subr.mxu0 %v564_v62  ;;  %1190 = vmatprep.subr.mxu1 %v692_v22  ;;  %v559_v62 = vld [vmem:[%s5831_s3 + $0x310] sm:$0xff]  ;;  %v556_v22 = vld [vmem:[%s5831_s3 + $0x2f8] sm:$0xff] }
 0x110   :  { %848 = vmatmul.mubr.f32.gmra.mxu0 %v453_v44  ;;  %991 = vmatmul.mubr.f32.gmra.mxu1 %v455_v23  ;;  %v1599_v20 = vld [vmem:[%s5832_s4 + $0x90] sm:$0xff] }
 0x111   :  { %1048 = vmatpush2.msra.mxu0 %v563_v4  ;;  %1191 = vmatpush2.msra.mxu1 %v691_v46  ;;  %v683_v4 = vld [vmem:[%s5831_s3 + $0x6f0] sm:$0xff]  ;;  %v552_v46 = vld [vmem:[%s5831_s3 + $0x2d8] sm:$0xff] }
 0x112   :  { %1049 = vmatprep.subr.mxu0 %v560_v29  ;;  %1192 = vmatprep.subr.mxu1 %v688_v30  ;;  %v680_v29 = vld [vmem:[%s5831_s3 + $0x6d8] sm:$0xff]  ;;  %v551_v30 = vld [vmem:[%s5831_s3 + $0x2d0] sm:$0xff] }
 0x113   :  { %1050 = vmatpush2.msra.mxu0 %v559_v62  ;;  %1193 = vmatpush2.msra.mxu1 %v687_v33  ;;  %v679_v62 = vld [vmem:[%s5831_s3 + $0x6d0] sm:$0xff]  ;;  %v5946_v33 = vmax.f32 %v3465_v39, 0.0 }
 0x114   :  { %853 = vmatprep.mubr.f32.mxu0 %v458_v60  ;;  %996 = vmatprep.mubr.f32.mxu1 %v460_v45  ;;  %v675_v39 = vld [vmem:[%s5831_s3 + $0x6b0] sm:$0xff] }
 0x115   :  { %1051 = vmatprep.subr.mxu0 %v556_v22  ;;  %1194 = vmatprep.subr.mxu1 %v684_v31  ;;  %v548_v22 = vld [vmem:[%s5831_s3 + $0x2b8] sm:$0xff] }
 0x116   :  { %854 = vmatmul.mubr.f32.gmra.mxu0 %v457_v2  ;;  %997 = vmatmul.mubr.f32.gmra.mxu1 %v459_v19  ;;  %v676_v31 = vld [vmem:[%s5831_s3 + $0x6b8] sm:$0xff] }
 0x117   :  { %1052 = vmatpush2.msra.mxu0 %v555_v32  ;;  %1195 = vmatpush2.msra.mxu1 %v683_v4  ;;  %v5947_v32 = vmax.f32 %v3468_v40, 0.0  ;;  %v547_v4 = vld [vmem:[%s5831_s3 + $0x2b0] sm:$0xff] }
 0x118   :  { %1053 = vmatprep.subr.mxu0 %v552_v46  ;;  %1067 = vmatprep.mubr.f32.mxu0 %v5946_v33  ;;  %v544_v46 = vld [vmem:[%s5831_s3 + $0x298] sm:$0xff]  ;;  %v543_v40 = vld [vmem:[%s5831_s3 + $0x290] sm:$0xff] }
 0x119   :  { %1196 = vmatprep.subr.mxu1 %v680_v29  ;;  %1210 = vmatprep.mubr.f32.mxu1 %v5947_v32  ;;  %v672_v29 = vld [vmem:[%s5831_s3 + $0x698] sm:$0xff]  ;;  %v671_v33 = vld [vmem:[%s5831_s3 + $0x690] sm:$0xff] }
 0x11a   :  { %1054 = vmatpush2.msra.mxu0 %v551_v30  ;;  %1197 = vmatpush2.msra.mxu1 %v679_v62  ;;  %v540_v30 = vld [vmem:[%s5831_s3 + $0x278] sm:$0xff] }
 0x11b   :  { %1055 = vmatprep.subr.mxu0 %v548_v22  ;;  %1198 = vmatprep.subr.mxu1 %v676_v31  ;;  %v668_v62 = vld [vmem:[%s5831_s3 + $0x678] sm:$0xff]  ;;  %v539_v22 = vld [vmem:[%s5831_s3 + $0x270] sm:$0xff] }
 0x11c   :  { %1056 = vmatpush2.msra.mxu0 %v547_v4  ;;  %1199 = vmatpush2.msra.mxu1 %v675_v39  ;;  %v667_v31 = vld [vmem:[%s5831_s3 + $0x670] sm:$0xff]  ;;  %v536_v32 = vld [vmem:[%s5831_s3 + $0x258] sm:$0xff] }
 0x11d   :  { %1057 = vmatprep.subr.mxu0 %v544_v46  ;;  %1200 = vmatprep.subr.mxu1 %v672_v29  ;;  %v664_v4 = vld [vmem:[%s5831_s3 + $0x658] sm:$0xff]  ;;  %v535_v39 = vld [vmem:[%s5831_s3 + $0x250] sm:$0xff] }
 0x11e   :  { %1058 = vmatpush2.msra.mxu0 %v543_v40  ;;  %1201 = vmatpush2.msra.mxu1 %v671_v33  ;;  %v663_v46 = vld [vmem:[%s5831_s3 + $0x650] sm:$0xff]  ;;  %v532_v29 = vld [vmem:[%s5831_s3 + $0x238] sm:$0xff] }
 0x11f   :  { %1059 = vmatprep.subr.mxu0 %v540_v30  ;;  %1202 = vmatprep.subr.mxu1 %v668_v62  ;;  %v660_v40 = vld [vmem:[%s5831_s3 + $0x638] sm:$0xff]  ;;  %v531_v33 = vld [vmem:[%s5831_s3 + $0x230] sm:$0xff] }
 0x120   :  { %1060 = vmatpush2.msra.mxu0 %v539_v22  ;;  %1203 = vmatpush2.msra.mxu1 %v667_v31  ;;  %v659_v30 = vld [vmem:[%s5831_s3 + $0x630] sm:$0xff]  ;;  %v528_v62 = vld [vmem:[%s5831_s3 + $0x218] sm:$0xff] }
 0x121   :  { %1061 = vmatprep.subr.mxu0 %v536_v32  ;;  %1204 = vmatprep.subr.mxu1 %v664_v4  ;;  %v656_v22 = vld [vmem:[%s5831_s3 + $0x618] sm:$0xff]  ;;  %v527_v31 = vld [vmem:[%s5831_s3 + $0x210] sm:$0xff] }
 0x122   :  { %1062 = vmatpush2.msra.mxu0 %v535_v39  ;;  %1205 = vmatpush2.msra.mxu1 %v663_v46  ;;  %v655_v32 = vld [vmem:[%s5831_s3 + $0x610] sm:$0xff]  ;;  %v1612_v4 = vld [vmem:[%s5832_s4 + $0xf8] sm:$0xff]  ;;  %v5948_v39 = vmax.f32 %v3459_v35, 0.0  ;;  %v5949_v46 = vmax.f32 %v3462_v36, 0.0  ;;  %v5953_v36 = vmax.f32 %v3475_v47, 0.0  ;;  %v1610_v47 = vld [vmem:[%s5832_s4 + $0xe8] sm:$0xff] }
 0x123   :  { %1063 = vmatprep.subr.mxu0 %v532_v29  ;;  %1206 = vmatprep.subr.mxu1 %v660_v40  ;;  %v1596_v29 = vld [vmem:[%s5832_s4 + $0x78] sm:$0xff]  ;;  %v5950_v40 = vmax.f32 %v3487_v53, 0.0  ;;  %v1611_v35 = vld [vmem:[%s5832_s4 + $0xf0] sm:$0xff] }
 0x124   :  { %1064 = vmatpush2.msra.mxu0 %v531_v33  ;;  %1207 = vmatpush2.msra.mxu1 %v659_v30  ;;  %v5951_v33 = vmax.f32 %v3490_v54, 0.0  ;;  %v5952_v30 = vmov 0.0   ;;  %v1595_v53 = vld [vmem:[%s5832_s4 + $0x70] sm:$0xff]  ;;  %v5955_v54 = vmax.f32 %v3523_v6, 0.0  ;;  %v1594_v6 = vld [vmem:[%s5832_s4 + $0x68] sm:$0xff] }
 0x125   :  { %1065 = vmatprep.subr.mxu0 %v528_v62  ;;  %1208 = vmatprep.subr.mxu1 %v656_v22  ;;  %v5954_v62 = vmax.f32 %v3478_v48, 0.0  ;;  %v5956_v22 = vmax.f32 %v3526_v7, 0.0  ;;  %v5958_v48 = vmax.f32 %v3532_v9, 0.0  ;;  %v1628_v7 = vld [vmem:[%s5832_s4 + $0x178] sm:$0xff]  ;;  %v5961_v9 = vmax.f32 %v3577_v38, 0.0 }
 0x126   :  { %1066 = vmatpush2.msra.mxu0 %v527_v31  ;;  %1209 = vmatpush2.msra.mxu1 %v655_v32  ;;  %v5957_v31 = vmax.f32 %v3529_v8, 0.0  ;;  %v5959_v32 = vmax.f32 %v3565_v26, 0.0  ;;  %v1609_v8 = vld [vmem:[%s5832_s4 + $0xe0] sm:$0xff]  ;;  %v1608_v38 = vld [vmem:[%s5832_s4 + $0xd8] sm:$0xff] }
 0x127   :  { %1068 = vmatmul.mubr.f32.vlgmr.msra.gmra.mxu0 %v5948_v39  ;;  %1211 = vmatmul.mubr.f32.vlgmr.msra.gmra.mxu1 %v5949_v46  ;;  %v5962_v39 = vmax.f32 %v3580_v41, 0.0  ;;  %v1593_v26 = vld [vmem:[%s5832_s4 + $0x60] sm:$0xff]  ;;  %v5963_v46 = vmax.f32 %v3613_v5, 0.0  ;;  %v1626_v41 = vld [vmem:[%s5832_s4 + $0x168] sm:$0xff]  ;;  %v5966_v5 = vmax.f32 %v3628_v18, 0.0 }
 0x128   :  { %1073 = vmatprep.mubr.f32.mxu0 %v5950_v40  ;;  %1216 = vmatprep.mubr.f32.mxu1 %v5951_v33  ;;  %v5965_v40 = vmax.f32 %v3625_v15, 0.0  ;;  %v5967_v33 = vmax.f32 %v3661_v59, 0.0  ;;  %v1607_v15 = vld [vmem:[%s5832_s4 + $0xd0] sm:$0xff]  ;;  %v1625_v18 = vld [vmem:[%s5832_s4 + $0x160] sm:$0xff]  ;;  %v5970_v59 = vmax.f32 %v3680_v14, 0.0  ;;  %v1624_v14 = vld [vmem:[%s5832_s4 + $0x158] sm:$0xff] }
 0x129   :  { %2621 = vmatprep.subr.mxu0 %v1612_v4  ;;  %1811 = vmatprep.subr.mxu1 %v5952_v30  ;;  %v5960_v4 = vmax.f32 %v3568_v27, 0.0  ;;  %v1627_v27 = vld [vmem:[%s5832_s4 + $0x170] sm:$0xff] }
 0x12a   :  { %2622 = vmatpush3.msra.mxu0 %v1596_v29  ;;  %1812 = vmatpush1.msra.mxu1 %v1628_v7  ;;  %v5964_v29 = vmax.f32 %v3616_v10, 0.0  ;;  %v1592_v10 = vld [vmem:[%s5832_s4 + $0x58] sm:$0xff]  ;;  %v5981_v7 = vmax.f32 %v3836_v34, 0.0  ;;  %v1603_v34 = vld [vmem:[%s5832_s4 + $0xb0] sm:$0xff] }
 0x12b   :  { %1074 = vmatmul.mubr.f32.gmra.mxu0 %v5953_v36  ;;  %1217 = vmatmul.mubr.f32.gmra.mxu1 %v5954_v62  ;;  %v5969_v36 = vmax.f32 %v3677_v13, 0.0  ;;  %v5971_v62 = vmax.f32 %v3717_v58, 0.0  ;;  %v1606_v13 = vld [vmem:[%s5832_s4 + $0xc8] sm:$0xff]  ;;  %v5974_v58 = vmax.f32 %v3732_v51, 0.0  ;;  %v1623_v51 = vld [vmem:[%s5832_s4 + $0x150] sm:$0xff] }
 0x12c   :  { %1079 = vmatprep.mubr.f32.mxu0 %v5955_v54  ;;  %1222 = vmatprep.mubr.f32.mxu1 %v5956_v22  ;;  %v5973_v54 = vmax.f32 %v3729_v1, 0.0  ;;  %v5975_v22 = vmax.f32 %v3769_v55, 0.0  ;;  %v1605_v1 = vld [vmem:[%s5832_s4 + $0xc0] sm:$0xff]  ;;  %v5978_v55 = vmax.f32 %v3786_v49, 0.0  ;;  %v1622_v49 = vld [vmem:[%s5832_s4 + $0x148] sm:$0xff] }
 0x12d   :  { %2623 = vmatprep.subr.mxu0 %v1611_v35  ;;  %1813 = vmatprep.subr.mxu1 %v5952_v30  ;;  %v5968_v35 = vmax.f32 %v3664_v11, 0.0  ;;  %v1591_v11 = vld [vmem:[%s5832_s4 + $0x50] sm:$0xff] }
 0x12e   :  { %2624 = vmatpush3.msra.mxu0 %v1595_v53  ;;  %1814 = vmatpush1.msra.mxu1 %v1627_v27  ;;  %v5972_v53 = vmax.f32 %v3720_v56, 0.0  ;;  %v1590_v56 = vld [vmem:[%s5832_s4 + $0x48] sm:$0xff] }
 0x12f   :  { %1080 = vmatmul.mubr.f32.gmra.mxu0 %v5957_v31  ;;  %1223 = vmatmul.mubr.f32.gmra.mxu1 %v5958_v48  ;;  %v5977_v31 = vmax.f32 %v3782_v21, 0.0  ;;  %v5979_v48 = vmax.f32 %v3819_v17, 0.0  ;;  %v1604_v21 = vld [vmem:[%s5832_s4 + $0xb8] sm:$0xff]  ;;  %v5982_v17 = vmax.f32 %v3840_v24, 0.0  ;;  %v1621_v24 = vld [vmem:[%s5832_s4 + $0x140] sm:$0xff] }
 0x130   :  { %1085 = vmatprep.mubr.f32.mxu0 %v5959_v32  ;;  %1228 = vmatprep.mubr.f32.mxu1 %v5960_v4  ;;  %v5983_v32 = vmax.f32 %v3873_v63, 0.0  ;;  %v5984_v4 = vmax.f32 %v3876_v0, 0.0  ;;  %v5986_v63 = vld [vmem:[#allocation9_spill] sm:$0xff] }
 0x131   :  { %2625 = vmatprep.subr.mxu0 %v1610_v47  ;;  %1815 = vmatprep.subr.mxu1 %v5952_v30  ;;  %v5976_v47 = vmax.f32 %v3772_v16, 0.0  ;;  %v1589_v16 = vld [vmem:[%s5832_s4 + $0x40] sm:$0xff]  ;;  %v1587_v0 = vld [vmem:[%s5832_s4 + $0x30] sm:$0xff] }
 0x132   :  { %2626 = vmatpush3.msra.mxu0 %v1594_v6  ;;  %1816 = vmatpush1.msra.mxu1 %v1626_v41  ;;  %v5980_v6 = vmax.f32 %v3822_v57, 0.0  ;;  %v1588_v57 = vld [vmem:[%s5832_s4 + $0x38] sm:$0xff]  ;;  %v1586_v41 = vld [vmem:[%s5832_s4 + $0x28] sm:$0xff] }
 0x133   :  { %1086 = vmatmul.mubr.f32.gmra.mxu0 %v5961_v9  ;;  %1229 = vmatmul.mubr.f32.gmra.mxu1 %v5962_v39  ;;  %v5987_v9 = vmax.f32 %v5986_v63, 0.0  ;;  %v5988_v39 = vmax.f32 %v3923_v61, 0.0  ;;  %v5992_v61 = vld [vmem:[#allocation11_spill] sm:$0xff] }
 0x134   :  { %1091 = vmatprep.mubr.f32.mxu0 %v5963_v46  ;;  %1234 = vmatprep.mubr.f32.mxu1 %v5964_v29  ;;  %v1620_v46 = vld [vmem:[%s5832_s4 + $0x138] sm:$0xff]  ;;  %v5991_v29 = vmax.f32 %v3936_v37, 0.0  ;;  %v1601_v37 = vld [vmem:[%s5832_s4 + $0xa0] sm:$0xff] }
 0x135   :  { %2627 = vmatprep.subr.mxu0 %v1609_v8  ;;  %1817 = vmatprep.subr.mxu1 %v5952_v30  ;;  %v5985_v8 = vmax.f32 %v3886_v52, 0.0  ;;  %v1602_v52 = vld [vmem:[%s5832_s4 + $0xa8] sm:$0xff] }
 0x136   :  { %2628 = vmatpush3.msra.mxu0 %v1593_v26  ;;  %1818 = vmatpush1.msra.mxu1 %v1625_v18  ;;  %v5989_v26 = vld [vmem:[#allocation10_spill] sm:$0xff] }
 0x137   :  { %1092 = vmatmul.mubr.f32.gmra.mxu0 %v5965_v40  ;;  %1235 = vmatmul.mubr.f32.gmra.mxu1 %v5966_v5  ;;  %v5990_v27 = vmax.f32 %v5989_v26, 0.0  ;;  %v5994_v40 = vmax.f32 %v3973_v12, 0.0  ;;  %v5995_v5 = vmax.f32 %v3976_v50, 0.0  ;;  %v1585_v50 = vld [vmem:[%s5832_s4 + $0x20] sm:$0xff]  ;;  %v1600_v12 = vld [vmem:[%s5832_s4 + $0x98] sm:$0xff]  ;;  %v1635_v18 = vld [vmem:[%s5832_s4 + $0x1b0] sm:$0xff] }
 0x138   :  { %1097 = vmatprep.mubr.f32.mxu0 %v5967_v33  ;;  %1240 = vmatprep.mubr.f32.mxu1 %v5968_v35  ;;  %v1614_v33 = vld [vmem:[%s5832_s4 + $0x108] sm:$0xff]  ;;  %v1613_v35 = vld [vmem:[%s5832_s4 + $0x100] sm:$0xff] }
 0x139   :  { %2629 = vmatprep.subr.mxu0 %v1608_v38  ;;  %1819 = vmatprep.subr.mxu1 %v5952_v30  ;;  %v5993_v38 = vmax.f32 %v5992_v61, 0.0 }
 0x13a   :  { %2630 = vmatpush3.msra.mxu0 %v1592_v10  ;;  %1820 = vmatpush1.msra.mxu1 %v1624_v14  ;;  %v1619_v10 = vld [vmem:[%s5832_s4 + $0x130] sm:$0xff]  ;;  %v5996_v14 = vlaneseq }
 0x13b   :  { %1098 = vmatmul.mubr.f32.gmra.mxu0 %v5969_v36  ;;  %1241 = vmatmul.mubr.f32.gmra.mxu1 %v5970_v59  ;;  %v1634_v36 = vld [vmem:[%s5832_s4 + $0x1a8] sm:$0xff]  ;;  %v1633_v59 = vld [vmem:[%s5832_s4 + $0x1a0] sm:$0xff] }
 0x13c   :  { %1103 = vmatprep.mubr.f32.mxu0 %v5971_v62  ;;  %1246 = vmatprep.mubr.f32.mxu1 %v5972_v53  ;;  %v1631_v62 = vld [vmem:[%s5832_s4 + $0x190] sm:$0xff]  ;;  %v1630_v53 = vld [vmem:[%s5832_s4 + $0x188] sm:$0xff] }
 0x13d   :  { %2631 = vmatprep.subr.mxu0 %v1607_v15  ;;  %1821 = vmatprep.subr.mxu1 %v5952_v30  ;;  %v1636_v15 = vld [vmem:[%s5832_s4 + $0x1b8] sm:$0x1] }
 0x13e   :  { %2632 = vmatpush3.msra.mxu0 %v1591_v11  ;;  %1822 = vmatpush1.msra.mxu1 %v1623_v51  ;;  %v1632_v11 = vld [vmem:[%s5832_s4 + $0x198] sm:$0xff] }
 0x13f   :  { %1104 = vmatmul.mubr.f32.gmra.mxu0 %v5973_v54  ;;  %1247 = vmatmul.mubr.f32.gmra.mxu1 %v5974_v58  ;;  %v4474_v54 = vand.u32 127, %v5996_v14  ;;  %v5997_v58 = vld [vmem:[#allocation8_spill] sm:$0xff] }
 0x140   :  { %1109 = vmatprep.mubr.f32.mxu0 %v5975_v22  ;;  %1252 = vmatprep.mubr.f32.mxu1 %v5976_v47  ;;  %v1291_v22 = vadd.s32 8, %v5997_v58 }
 0x141   :  { %2633 = vmatprep.subr.mxu0 %v1606_v13  ;;  %1823 = vmatprep.subr.mxu1 %v5952_v30  ;;  %v1629_v13 = vld [vmem:[%s5832_s4 + $0x180] sm:$0xff]  ;;  %v4481_v47 = vadd.s32 128, %v4474_v54 }
 0x142   :  { %2634 = vmatpush3.msra.mxu0 %v1590_v56  ;;  %1824 = vmatpush1.msra.mxu1 %v1622_v49  ;;  %v4477_v56 = vmul.u32 9, %v5997_v58  ;;  %v4486_v51 = vmul.u32 9, %v1291_v22 }
 0x143   :  { %1110 = vmatmul.mubr.f32.gmra.mxu0 %v5977_v31  ;;  %1253 = vmatmul.mubr.f32.gmra.mxu1 %v5978_v55  ;;  %v1292_v31 = vadd.s32 16, %v5997_v58 }
 0x144   :  { %1115 = vmatprep.mubr.f32.mxu0 %v5979_v48  ;;  %1258 = vmatprep.mubr.f32.mxu1 %v5980_v6  ;;  %vm1361_vm3 = vcmp.ge.s32.totalorder %v4481_v47, %v4477_v56  ;;  %vm1360_vm5 = vcmp.ge.s32.totalorder %v4474_v54, %v4477_v56  ;;  %v4498_v48 = vadd.s32 9, %v4486_v51  ;;  %vm1365_vm9 = vcmp.ge.s32.totalorder %v4481_v47, %v4486_v51 }
 0x145   :  { %2635 = vmatprep.subr.mxu0 %v1605_v1  ;;  %1825 = vmatprep.subr.mxu1 %v5952_v30  ;;  %v4484_v1 = vadd.s32 9, %v4477_v56  ;;  %vm1364_vm11 = vcmp.ge.s32.totalorder %v4474_v54, %v4486_v51 }
 0x146   :  { %2636 = vmatpush3.msra.mxu0 %v1589_v16  ;;  %1826 = vmatpush1.msra.mxu1 %v1621_v24  ;;  %vm1430_vm10 = vcmp.lt.s32.totalorder %v4481_v47, %v4498_v48  ;;  %v1971_v24 = vld [vmem:[%s5833_s5 + $0xf0] sm:$0xff]  ;;  %vm1429_vm12 = vcmp.lt.s32.totalorder %v4474_v54, %v4498_v48 }
 0x147   :  { %1116 = vmatmul.mubr.f32.gmra.mxu0 %v5981_v7  ;;  %1259 = vmatmul.mubr.f32.gmra.mxu1 %v5982_v17  ;;  %vm1426_vm4 = vcmp.lt.s32.totalorder %v4481_v47, %v4484_v1  ;;  %vm1425_vm6 = vcmp.lt.s32.totalorder %v4474_v54, %v4484_v1  ;;  %vm4552_vm13 = vmand %vm1365_vm9, %vm1430_vm10 }
 0x148   :  { %1121 = vmatprep.mubr.f32.mxu0 %v5983_v32  ;;  %1264 = vmatprep.mubr.f32.mxu1 %v5984_v4  ;;  %vm4500_vm7 = vmand %vm1361_vm3, %vm1426_vm4  ;;  %v1956_v4 = vld [vmem:[%s5833_s5 + $0x78] sm:$0xff] }
 0x149   :  { %2637 = vmatprep.subr.mxu0 %v1604_v21  ;;  %1827 = vmatprep.subr.mxu1 %v5952_v30  ;;  %vm4506_vm8 = vmand %vm1360_vm5, %vm1425_vm6 }
 0x14a   :  { %2638 = vmatpush3.msra.mxu0 %v1588_v57  ;;  %1828 = vmatpush1.msra.mxu1 %v1620_v46  ;;  %v4510_v57 = vmul.u32 9, %v1292_v31  ;;  %vm4561_vm14 = vmand %vm1364_vm11, %vm1429_vm12 }
 0x14b   :  { %1122 = vmatmul.mubr.f32.gmra.mxu0 %v5985_v8  ;;  %1265 = vmatmul.mubr.f32.gmra.mxu1 %v5987_v9  ;;  %v1955_v9 = vld [vmem:[%s5833_s5 + $0x70] sm:$0xff] }
 0x14c   :  { %1127 = vmatprep.mubr.f32.mxu0 %v5988_v39  ;;  %1270 = vmatprep.mubr.f32.mxu1 %v5990_v27  ;;  %v1970_v39 = vld [vmem:[%s5833_s5 + $0xe8] sm:$0xff]  ;;  %vm1369_vm15 = vcmp.ge.s32.totalorder %v4481_v47, %v4510_v57  ;;  %vm1368_vm1 = vcmp.ge.s32.totalorder %v4474_v54, %v4510_v57 }
 0x14d   :  { %2639 = vmatprep.subr.mxu0 %v1603_v34  ;;  %1829 = vmatprep.subr.mxu1 %v5952_v30  ;;  %v1293_v34 = vadd.s32 24, %v5997_v58 }
 0x14e   :  { %2640 = vmatpush3.msra.mxu0 %v1587_v0  ;;  %1830 = vmatpush1.msra.mxu1 %v1619_v10  ;;  %v4539_v0 = vadd.s32 9, %v4510_v57  ;;  %v1968_v10 = vld [vmem:[%s5833_s5 + $0xd8] sm:$0xff] }
 0x14f   :  { %1128 = vmatmul.mubr.f32.gmra.mxu0 %v5991_v29  ;;  %1271 = vmatmul.mubr.f32.gmra.mxu1 %v5993_v38  ;;  %v1954_v29 = vld [vmem:[%s5833_s5 + $0x68] sm:$0xff] }
 0x150   :  { %1133 = vmatprep.mubr.f32.mxu0 %v5994_v40  ;;  %1276 = vmatprep.mubr.f32.mxu1 %v5995_v5  ;;  %v1969_v40 = vld [vmem:[%s5833_s5 + $0xe0] sm:$0xff]  ;;  %vm1434_vm0 = vcmp.lt.s32.totalorder %v4481_v47, %v4539_v0  ;;  %vm1433_vm3 = vcmp.lt.s32.totalorder %v4474_v54, %v4539_v0 }
 0x151   :  { %2641 = vmatprep.subr.mxu0 %v1602_v52  ;;  %1831 = vmatprep.subr.mxu1 %v5952_v30  ;;  %v1953_v5 = vld [vmem:[%s5833_s5 + $0x60] sm:$0xff]  ;;  %vm4608_vm4 = vmand %vm1369_vm15, %vm1434_vm0 }
 0x152   :  { %2642 = vmatpush3.msra.mxu0 %v1586_v41  ;;  %v4565_v41 = vmul.u32 9, %v1293_v34  ;;  %vm4617_vm5 = vmand %vm1368_vm1, %vm1433_vm3  ;;  %v1963_v34 = vld [vmem:[%s5833_s5 + $0xb0] sm:$0xff] }
 0x153   :  { %1134 = vmatmul.mubr.f32.gmra.mxu0 %v453_v44  ;;  %1277 = vmatmul.mubr.f32.gmra.mxu1 %v455_v23  ;;  %v1618_v23 = vld [vmem:[%s5832_s4 + $0x128] sm:$0xff]  ;;  %v1583_v44 = vld [vmem:[%s5832_s4 + $0x10] sm:$0xff] }
 0x154   :  { %1139 = vmatprep.mubr.f32.mxu0 %v458_v60  ;;  %1282 = vmatprep.mubr.f32.mxu1 %v460_v45  ;;  %v1597_v60 = vld [vmem:[%s5832_s4 + $0x80] sm:$0xff]  ;;  %v1615_v45 = vld [vmem:[%s5832_s4 + $0x110] sm:$0xff]  ;;  %vm1373_vm6 = vcmp.ge.s32.totalorder %v4481_v47, %v4565_v41  ;;  %vm1372_vm10 = vcmp.ge.s32.totalorder %v4474_v54, %v4565_v41 }
 0x155   :  { %2643 = vmatprep.subr.mxu0 %v1601_v37  ;;  %1832 = vmatpush1.msra.mxu1 %v1618_v23  ;;  %v1294_v37 = vadd.s32 32, %v5997_v58  ;;  %v1952_v23 = vld [vmem:[%s5833_s5 + $0x58] sm:$0xff] }
 0x156   :  { %2644 = vmatpush3.msra.mxu0 %v1585_v50  ;;  %1833 = vmatprep.subr.mxu1 %v5952_v30 }
 0x157   :  { %1140 = vmatmul.mubr.f32.gmra.mxu0 %v457_v2  ;;  %1283 = vmatmul.mubr.f32.gmra.mxu1 %v459_v19  ;;  %v1581_v2 = vld [vmem:[%s5832_s4] sm:$0xff]  ;;  %v1972_v19 = vld [vmem:[%s5833_s5 + $0xf8] sm:$0xff] }
 0x158   :  { %2645 = vmatprep.subr.mxu0 %v1600_v12  ;;  %1834 = vmatpush1.msra.mxu1 %v1617_v28 }
 0x159   :  { %2646 = vmatpush3.msra.mxu0 %v1584_v42  ;;  %1835 = vmatprep.subr.mxu1 %v5952_v30  ;;  %v4595_v42 = vadd.s32 9, %v4565_v41 }
 0x15a   :  { %2647 = vmatprep.subr.mxu0 %v1599_v20  ;;  %1836 = vmatpush1.msra.mxu1 %v1616_v43  ;;  %v1967_v20 = vld [vmem:[%s5833_s5 + $0xd0] sm:$0xff] }
 0x15b   :  { %2648 = vmatpush3.msra.mxu0 %v1583_v44  ;;  %1837 = vmatprep.subr.mxu1 %v5952_v30  ;;  %vm1438_vm9 = vcmp.lt.s32.totalorder %v4481_v47, %v4595_v42  ;;  %vm1437_vm11 = vcmp.lt.s32.totalorder %v4474_v54, %v4595_v42 }
 0x15c   :  { %2649 = vmatprep.subr.mxu0 %v1598_v25  ;;  %1838 = vmatpush1.msra.mxu1 %v1615_v45  ;;  %vm4665_vm12 = vmand %vm1373_vm6, %vm1438_vm9 }
 0x15d   :  { %2650 = vmatpush3.msra.mxu0 %v1582_v3  ;;  %1839 = vmatprep.subr.mxu1 %v5952_v30  ;;  %v1951_v3 = vld [vmem:[%s5833_s5 + $0x50] sm:$0xff]  ;;  %vm4677_vm15 = vmand %vm1372_vm10, %vm1437_vm11 }
 0x15e   :  { %2651 = vmatprep.subr.mxu0 %v1597_v60  ;;  %1840 = vmatpush1.msra.mxu1 %v1614_v33  ;;  %v1296_v33 = vadd.s32 48, %v5997_v58 }
 0x15f   :  { %2652 = vmatpush3.msra.mxu0 %v1581_v2  ;;  %1841 = vmatprep.subr.mxu1 %v5952_v30  ;;  %v4621_v2 = vmul.u32 9, %v1294_v37 }
 0x160   :  { %2692 = vmatprep.subr.mxu0 %v1972_v19  ;;  %1842 = vmatpush1.msra.mxu1 %v1613_v35  ;;  %v1966_v19 = vld [vmem:[%s5833_s5 + $0xc8] sm:$0xff]  ;;  %vm1314_vm0 = vcmp.ge.s32.totalorder %v1296_v33, 49 }
 0x161   :  { %1859 = vmatprep.subr.mxu1 %v5952_v30  ;;  %v1950_v35 = vld [vmem:[%s5833_s5 + $0x48] sm:$0xff]  ;;  %vm1377_vm1 = vcmp.ge.s32.totalorder %v4481_v47, %v4621_v2  ;;  %vm1376_vm6 = vcmp.ge.s32.totalorder %v4474_v54, %v4621_v2 }
 0x162   :  { %2534 = vmatpush2.msk.msra.mxu1 %vm5886_vm2, %v1636_v15  ;;  %v1295_v15 = vadd.s32 40, %v5997_v58 }
 0x163   :  { %1861 = vmatprep.subr.mxu1 %v5952_v30 }
 0x164   :  { %1862 = vmatpush2.msra.mxu1 %v1635_v18  ;;  %v1965_v18 = vld [vmem:[%s5833_s5 + $0xc0] sm:$0xff] }
 0x165   :  { %1863 = vmatprep.subr.mxu1 %v5952_v30 }
 0x166   :  { %1864 = vmatpush2.msra.mxu1 %v1634_v36 }
 0x167   :  { %1865 = vmatprep.subr.mxu1 %v5952_v30 }
 0x168   :  { %1866 = vmatpush2.msra.mxu1 %v1633_v59 }
 0x169   :  { %1867 = vmatprep.subr.mxu1 %v5952_v30 }
 0x16a   :  { %1868 = vmatpush2.msra.mxu1 %v1632_v11  ;;  %v1949_v11 = vld [vmem:[%s5833_s5 + $0x40] sm:$0xff] }
 0x16b   :  { %1869 = vmatprep.subr.mxu1 %v5952_v30 }
 0x16c   :  { %1870 = vmatpush2.msra.mxu1 %v1631_v62  ;;  %v4652_v62 = vadd.s32 9, %v4621_v2 }
 0x16d   :  { %1871 = vmatprep.subr.mxu1 %v5952_v30 }
 0x16e   :  { %1872 = vmatpush2.msra.mxu1 %v1630_v53  ;;  %v1964_v53 = vld [vmem:[%s5833_s5 + $0xb8] sm:$0xff]  ;;  %vm1442_vm3 = vcmp.lt.s32.totalorder %v4481_v47, %v4652_v62  ;;  %vm1441_vm9 = vcmp.lt.s32.totalorder %v4474_v54, %v4652_v62 }
 0x16f   :  { %1873 = vmatprep.subr.mxu1 %v5952_v30  ;;  %vm4724_vm10 = vmand %vm1377_vm1, %vm1442_vm3 }
 0x170   :  { %1874 = vmatpush2.msra.mxu1 %v1629_v13  ;;  %vm4739_vm11 = vmand %vm1376_vm6, %vm1441_vm9 }
 0x171   :  { %2130 = vmatprep.subr.mxu1 %v5952_v30 }
 0x18e   :  { %v783_v55 = vpop.f32.mrf.mxu0  ;;  %v926_v16 = vpop.f32.mrf.mxu1 }
 0x18f   :  { %v4512_v32 = vadd.f32 %v926_v16, %v783_v55  ;;  %v2501_v55 = vadd.s32 4294967247, %v1296_v33  ;;  %v1948_v16 = vld [vmem:[%s5833_s5 + $0x38] sm:$0xff] }
 0x190   :  { %v785_v6 = vpop.f32.mrf.mxu0  ;;  %v928_v21 = vpop.f32.mrf.mxu1 }
 0x191   :  { %v4504_v7 = vadd.f32 %v928_v21, %v785_v6  ;;  %v1987_v21 = vld [vmem:[%s5833_s5 + $0x170] sm:$0xff] }
 0x193   :  { %2508 = vmatprep.mubr.msk.f32.mxu0 %vm4500_vm7, %v4504_v7 }
 0x194   :  { %v789_v8 = vpop.f32.mrf.mxu0  ;;  %v932_v63 = vpop.f32.mrf.mxu1  ;;  %2509 = vmatmul.mubr.msk.f32.vlgmr.msra.gmra.mxu0 %vm4506_vm8, %v4512_v32 }
 0x195   :  { %2693 = vmatpush3.msra.mxu0 %v1956_v4  ;;  %v4544_v26 = vadd.f32 %v932_v63, %v789_v8  ;;  %v4681_v4 = vmul.u32 9, %v1295_v15  ;;  %v1962_v8 = vld [vmem:[%s5833_s5 + $0xa8] sm:$0xff] }
 0x196   :  { %v791_v27 = vpop.f32.mrf.mxu0  ;;  %v934_v52 = vpop.f32.mrf.mxu1  ;;  %2694 = vmatprep.subr.mxu0 %v1971_v24  ;;  %v1947_v24 = vld [vmem:[%s5833_s5 + $0x30] sm:$0xff] }
 0x197   :  { %v4559_v61 = vadd.f32 %v934_v52, %v791_v27  ;;  %2695 = vmatpush3.msra.mxu0 %v1955_v9  ;;  %v1946_v27 = vld [vmem:[%s5833_s5 + $0x28] sm:$0xff]  ;;  %v4710_v52 = vadd.s32 9, %v4681_v4  ;;  %vm1380_vm3 = vcmp.ge.s32.totalorder %v4474_v54, %v4681_v4 }
 0x198   :  { %2696 = vmatprep.subr.mxu0 %v1970_v39  ;;  %v1340_v39 = vsel %vm1314_vm0, %v2501_v55, %v1296_v33  ;;  %vm1381_vm0 = vcmp.ge.s32.totalorder %v4481_v47, %v4681_v4  ;;  %v1959_v33 = vld [vmem:[%s5833_s5 + $0x90] sm:$0xff]  ;;  %v6018_v55 = vmov 0 }
 0x199   :  { %2510 = vmatprep.mubr.msk.f32.mxu0 %vm4552_vm13, %v4559_v61  ;;  %2697 = vmatpush3.msra.mxu0 %v1954_v29  ;;  %v1297_v29 = vadd.s32 56, %v5997_v58  ;;  %vm1446_vm1 = vcmp.lt.s32.totalorder %v4481_v47, %v4710_v52  ;;  %vm1445_vm6 = vcmp.lt.s32.totalorder %v4474_v54, %v4710_v52 }
 0x19a   :  { %v795_v50 = vpop.f32.mrf.mxu0  ;;  %v938_v12 = vpop.f32.mrf.mxu1  ;;  %2511 = vmatmul.mubr.msk.f32.gmra.mxu0 %vm4561_vm14, %v4544_v26  ;;  %2698 = vmatprep.subr.mxu0 %v1969_v40  ;;  %v1961_v40 = vld [vmem:[%s5833_s5 + $0xa0] sm:$0xff]  ;;  %vm4786_vm9 = vmand %vm1381_vm0, %vm1446_vm1 }
 0x19b   :  { %2699 = vmatpush3.msra.mxu0 %v1953_v5  ;;  %v4600_v28 = vadd.f32 %v938_v12, %v795_v50  ;;  %v6014_v50 = vmov 0  ;;  %v1945_v12 = vld [vmem:[%s5833_s5 + $0x20] sm:$0xff]  ;;  %v6019_v55 = vsel %vm4786_vm9, 4294967295, %v6018_v55  ;;  %vm4798_vm2 = vmand %vm1380_vm3, %vm1445_vm6 }
 0x19c   :  { %v797_v44 = vpop.f32.mrf.mxu0  ;;  %v940_v25 = vpop.f32.mrf.mxu1  ;;  %2700 = vmatprep.subr.mxu0 %v1968_v10  ;;  %v6015_v50 = vsel %vm4724_vm10, 4294967295, %v6014_v50 }
 0x19d   :  { %v4615_v60 = vadd.f32 %v940_v25, %v797_v44  ;;  %2701 = vmatpush3.msra.mxu0 %v1952_v23  ;;  %v4743_v44 = vmul.u32 9, %v1340_v39  ;;  %v1960_v25 = vld [vmem:[%s5833_s5 + $0x98] sm:$0xff] }
 0x19e   :  { %2702 = vmatprep.subr.mxu0 %v1967_v20  ;;  %v6016_v20 = vmov 0 }
 0x19f   :  { %2512 = vmatprep.mubr.msk.f32.mxu0 %vm4608_vm4, %v4615_v60  ;;  %2703 = vmatpush3.msra.mxu0 %v1951_v3  ;;  %v6017_v20 = vsel %vm4739_vm11, 4294967295, %v6016_v20  ;;  %v1944_v3 = vld [vmem:[%s5833_s5 + $0x18] sm:$0xff]  ;;  %vm1385_vm0 = vcmp.ge.s32.totalorder %v4481_v47, %v4743_v44  ;;  %vm1384_vm3 = vcmp.ge.s32.totalorder %v4474_v54, %v4743_v44 }
 0x1a0   :  { %v801_v36 = vpop.f32.mrf.mxu0  ;;  %v944_v59 = vpop.f32.mrf.mxu1  ;;  %2513 = vmatmul.mubr.msk.f32.gmra.mxu0 %vm4617_vm5, %v4600_v28  ;;  %2704 = vmatprep.subr.mxu0 %v1966_v19  ;;  %v2502_v19 = vadd.s32 4294967247, %v1297_v29 }
 0x1a1   :  { %2705 = vmatpush3.msra.mxu0 %v1950_v35  ;;  %v4657_v13 = vadd.f32 %v944_v59, %v801_v36  ;;  %v4772_v36 = vadd.s32 9, %v4743_v44  ;;  %v1298_v59 = vadd.s32 64, %v5997_v58 }
 0x1a2   :  { %v803_v14 = vpop.f32.mrf.mxu0  ;;  %v946_v22 = vpop.f32.mrf.mxu1  ;;  %2706 = vmatprep.subr.mxu0 %v1965_v18  ;;  %v1943_v18 = vld [vmem:[%s5833_s5 + $0x10] sm:$0xff] }
 0x1a3   :  { %v4672_v6 = vadd.f32 %v946_v22, %v803_v14  ;;  %2707 = vmatpush3.msra.mxu0 %v1949_v11  ;;  %v1958_v11 = vld [vmem:[%s5833_s5 + $0x88] sm:$0xff]  ;;  %vm1450_vm1 = vcmp.lt.s32.totalorder %v4481_v47, %v4772_v36  ;;  %v2503_v39 = vadd.s32 4294967247, %v1298_v59  ;;  %vm1449_vm6 = vcmp.lt.s32.totalorder %v4474_v54, %v4772_v36 }
 0x1a4   :  { %2708 = vmatprep.subr.mxu0 %v1964_v53 }
 0x1a5   :  { %2514 = vmatprep.mubr.msk.f32.mxu0 %vm4665_vm12, %v4672_v6  ;;  %2709 = vmatpush3.msra.mxu0 %v1948_v16  ;;  %v1942_v16 = vld [vmem:[%s5833_s5 + $0x8] sm:$0xff] }
 0x1a6   :  { %v807_v63 = vpop.f32.mrf.mxu0  ;;  %v950_v9 = vpop.f32.mrf.mxu1  ;;  %2515 = vmatmul.mubr.msk.f32.gmra.mxu0 %vm4677_vm15, %v4657_v13  ;;  %2710 = vmatprep.subr.mxu0 %v1963_v34 }
 0x1a7   :  { %2711 = vmatpush3.msra.mxu0 %v1947_v24  ;;  %v4716_v5 = vadd.f32 %v950_v9, %v807_v63  ;;  %v6020_v24 = vmov 0  ;;  %v1957_v63 = vld [vmem:[%s5833_s5 + $0x80] sm:$0xff] }
 0x1a8   :  { %v809_v37 = vpop.f32.mrf.mxu0  ;;  %v952_v10 = vpop.f32.mrf.mxu1  ;;  %2712 = vmatprep.subr.mxu0 %v1962_v8  ;;  %v6021_v24 = vsel %vm4798_vm2, 4294967295, %v6020_v24  ;;  %v4802_v8 = vmul.u32 9, %v2502_v19  ;;  %v1941_v9 = vld [vmem:[%s5833_s5] sm:$0xff] }
 0x1a9   :  { %v4731_v23 = vadd.f32 %v952_v10, %v809_v37  ;;  %2713 = vmatpush3.msra.mxu0 %v1946_v27  ;;  %v1299_v37 = vadd.s32 72, %v5997_v58 }
 0x1aa   :  { %2714 = vmatprep.subr.mxu0 %v1961_v40  ;;  %6022 = vst [vmem:[#allocation9_spill] sm:$0xff] %v4802_v8  ;;  %v4825_v40 = vadd.s32 9, %v4802_v8 }
 0x1ab   :  { %2516 = vmatprep.mubr.msk.f32.mxu0 %vm4724_vm10, %v4731_v23  ;;  %2715 = vmatpush3.msra.mxu0 %v1945_v12 }
 0x1ac   :  { %v813_v35 = vpop.f32.mrf.mxu0  ;;  %v956_v15 = vpop.f32.mrf.mxu1  ;;  %2517 = vmatmul.mubr.msk.f32.gmra.mxu0 %vm4739_vm11, %v4716_v5  ;;  %2716 = vmatprep.subr.mxu0 %v1960_v25  ;;  %6023 = vst [vmem:[#allocation10_spill] sm:$0xff] %v4825_v40 }
 0x1ad   :  { %2717 = vmatpush3.msra.mxu0 %v1944_v3  ;;  %v4778_v53 = vadd.f32 %v956_v15, %v813_v35  ;;  %v6024_v3 = vmov 0  ;;  %v4847_v35 = vmul.u32 9, %v2503_v39  ;;  %v2504_v15 = vadd.s32 4294967247, %v1299_v37 }
 0x1ae   :  { %v815_v14 = vpop.f32.mrf.mxu0  ;;  %v958_v22 = vpop.f32.mrf.mxu1  ;;  %2718 = vmatprep.subr.mxu0 %v1959_v33  ;;  %v6026_v33 = vmov 0 }
 0x1af   :  { %v4793_v34 = vadd.f32 %v958_v22, %v815_v14  ;;  %2719 = vmatpush3.msra.mxu0 %v1943_v18  ;;  %6028 = vst [vmem:[#allocation11_spill] sm:$0xff] %v4847_v35  ;;  %v1300_v14 = vadd.s32 80, %v5997_v58  ;;  %vm1393_vm11 = vcmp.ge.s32.totalorder %v4481_v47, %v4847_v35 }
 0x1b0   :  { %2720 = vmatprep.subr.mxu0 %v1958_v11  ;;  %v4864_v11 = vadd.s32 9, %v4847_v35 }
 0x1b1   :  { %2518 = vmatprep.mubr.msk.f32.mxu0 %vm4786_vm9, %v4793_v34  ;;  %2721 = vmatpush3.msra.mxu0 %v1942_v16  ;;  %vm4843_vm9 = vmand %vm1384_vm3, %vm1449_vm6  ;;  %vm1388_vm3 = vcmp.ge.s32.totalorder %v4474_v54, %v4802_v8  ;;  %vm1453_vm6 = vcmp.lt.s32.totalorder %v4474_v54, %v4825_v40  ;;  %v2505_v37 = vadd.s32 4294967247, %v1300_v14 }
 0x1b2   :  { %v819_v27 = vpop.f32.mrf.mxu0  ;;  %v962_v29 = vpop.f32.mrf.mxu1  ;;  %2519 = vmatmul.mubr.msk.f32.gmra.mxu0 %vm4798_vm2, %v4778_v53  ;;  %2722 = vmatprep.subr.mxu0 %v1957_v63  ;;  %vm4836_vm2 = vmand %vm1385_vm0, %vm1450_vm1  ;;  %v6027_v33 = vsel %vm4843_vm9, 4294967295, %v6026_v33  ;;  %vm1389_vm0 = vcmp.ge.s32.totalorder %v4481_v47, %v4802_v8  ;;  %vm1454_vm1 = vcmp.lt.s32.totalorder %v4481_v47, %v4825_v40  ;;  %6029 = vst [vmem:[#allocation12_spill] sm:$0xff] %v4864_v11 }
 0x1b3   :  { %2723 = vmatpush3.msra.mxu0 %v1941_v9  ;;  %v4828_v10 = vadd.f32 %v962_v29, %v819_v27  ;;  %v6025_v3 = vsel %vm4836_vm2, 4294967295, %v6024_v3  ;;  %v6030_v9 = vmov 0  ;;  %v6032_v27 = vmov 0 }
 0x1b4   :  { %v821_v12 = vpop.f32.mrf.mxu0  ;;  %v964_v25 = vpop.f32.mrf.mxu1  ;;  %2791 = vmatprep.subr.mxu0 %v5952_v30  ;;  %v4879_v29 = vmul.u32 9, %v2504_v15 }
 0x1b5   :  { %v4841_v19 = vadd.f32 %v964_v25, %v821_v12 }
 0x1b6   :  { %6034 = vst [vmem:[#allocation13_spill] sm:$0xff] %v4879_v29  ;;  %v4896_v15 = vadd.s32 9, %v4879_v29 }
 0x1b7   :  { %2520 = vmatprep.mubr.msk.f32.mxu0 %vm4836_vm2, %v4841_v19  ;;  %vm4869_vm2 = vmand %vm1389_vm0, %vm1454_vm1  ;;  %vm1458_vm0 = vcmp.lt.s32.totalorder %v4481_v47, %v4864_v11  ;;  %vm1392_vm1 = vcmp.ge.s32.totalorder %v4474_v54, %v4847_v35  ;;  %v6040_v35 = vmov 0 }
 0x1b8   :  { %v825_v18 = vpop.f32.mrf.mxu0  ;;  %v968_v59 = vpop.f32.mrf.mxu1  ;;  %2521 = vmatmul.mubr.msk.f32.gmra.mxu0 %vm4843_vm9, %v4828_v10  ;;  %v6031_v9 = vsel %vm4869_vm2, 4294967295, %v6030_v9  ;;  %vm4875_vm9 = vmand %vm1388_vm3, %vm1453_vm6  ;;  %vm1457_vm3 = vcmp.lt.s32.totalorder %v4474_v54, %v4864_v11  ;;  %6035 = vst [vmem:[#allocation14_spill] sm:$0xff] %v4896_v15  ;;  %v4911_v11 = vmul.u32 9, %v2505_v37 }
 0x1b9   :  { %v4867_v22 = vadd.f32 %v968_v59, %v825_v18  ;;  %v6033_v27 = vsel %vm4875_vm9, 4294967295, %v6032_v27  ;;  %v1301_v18 = vadd.s32 88, %v5997_v58  ;;  %vm4901_vm6 = vmand %vm1393_vm11, %vm1458_vm0  ;;  %vm1462_vm11 = vcmp.lt.s32.totalorder %v4481_v47, %v4896_v15 }
 0x1ba   :  { %v827_v16 = vpop.f32.mrf.mxu0  ;;  %v970_v63 = vpop.f32.mrf.mxu1  ;;  %6043 = vst [vmem:[#allocation18_spill] sm:$0xff] %v4911_v11  ;;  %vm1396_vm0 = vcmp.ge.s32.totalorder %v4474_v54, %v4879_v29  ;;  %v4928_v37 = vadd.s32 9, %v4911_v11 }
 0x1bb   :  { %v4873_v39 = vadd.f32 %v970_v63, %v827_v16  ;;  %v6036_v63 = vmov 0 }
 0x1bc   :  { %v6037_v63 = vsel %vm4901_vm6, 4294967295, %v6036_v63  ;;  %6044 = vst [vmem:[#allocation19_spill] sm:$0xff] %v4928_v37 }
 0x1bd   :  { %2522 = vmatprep.mubr.msk.f32.mxu0 %vm4869_vm2, %v4873_v39  ;;  %6038 = vst [vmem:[#allocation15_spill] sm:$0xff] %v6037_v63  ;;  %vm1397_vm2 = vcmp.ge.s32.totalorder %v4481_v47, %v4879_v29  ;;  %v6049_v29 = vmov 0 }
 0x1be   :  { %v831_v12 = vpop.f32.mrf.mxu0  ;;  %v974_v25 = vpop.f32.mrf.mxu1  ;;  %2523 = vmatmul.mubr.msk.f32.gmra.mxu0 %vm4875_vm9, %v4867_v22  ;;  %vm4907_vm9 = vmand %vm1392_vm1, %vm1457_vm3  ;;  %vm1461_vm1 = vcmp.lt.s32.totalorder %v4474_v54, %v4896_v15 }
 0x1bf   :  { %v4899_v59 = vadd.f32 %v974_v25, %v831_v12  ;;  %v6041_v35 = vsel %vm4907_vm9, 4294967295, %v6040_v35  ;;  %v2506_v12 = vadd.s32 4294967247, %v1301_v18  ;;  %vm4933_vm3 = vmand %vm1397_vm2, %vm1462_vm11  ;;  %vm1466_vm2 = vcmp.lt.s32.totalorder %v4481_v47, %v4928_v37 }
 0x1c0   :  { %v833_v14 = vpop.f32.mrf.mxu0  ;;  %v976_v16 = vpop.f32.mrf.mxu1  ;;  %6042 = vst [vmem:[#allocation17_spill] sm:$0xff] %v6041_v35  ;;  %vm1400_vm11 = vcmp.ge.s32.totalorder %v4474_v54, %v4911_v11 }
 0x1c1   :  { %v4905_v40 = vadd.f32 %v976_v16, %v833_v14  ;;  %v1302_v16 = vadd.s32 96, %v5997_v58  ;;  %v4943_v15 = vmul.u32 9, %v2506_v12 }
 0x1c3   :  { %6039 = vst [vmem:[#allocation16_spill] sm:$0xff] %v4905_v40  ;;  %2524 = vmatprep.mubr.msk.f32.mxu0 %vm4901_vm6, %v4905_v40  ;;  %v6045_v40 = vmov 0  ;;  %6052 = vst [vmem:[#allocation23_spill] sm:$0xff] %v4943_v15  ;;  %vm1401_vm6 = vcmp.ge.s32.totalorder %v4481_v47, %v4911_v11  ;;  %v4960_v12 = vadd.s32 9, %v4943_v15 }
 0x1c4   :  { %v837_v25 = vpop.f32.mrf.mxu0  ;;  %v980_v14 = vpop.f32.mrf.mxu1  ;;  %2525 = vmatmul.mubr.msk.f32.gmra.mxu0 %vm4907_vm9, %v4899_v59  ;;  %v6046_v40 = vsel %vm4933_vm3, 4294967295, %v6045_v40  ;;  %vm4939_vm9 = vmand %vm1396_vm0, %vm1461_vm1  ;;  %vm1465_vm0 = vcmp.lt.s32.totalorder %v4474_v54, %v4928_v37 }
 0x1c5   :  { %v4931_v8 = vadd.f32 %v980_v14, %v837_v25  ;;  %6047 = vst [vmem:[#allocation20_spill] sm:$0xff] %v6046_v40  ;;  %v6050_v29 = vsel %vm4939_vm9, 4294967295, %v6049_v29  ;;  %v2507_v25 = vadd.s32 4294967247, %v1302_v16  ;;  %6053 = vst [vmem:[#allocation24_spill] sm:$0xff] %v4960_v12  ;;  %v6054_v16 = vmov 0 }
 0x1c6   :  { %v839_v18 = vpop.f32.mrf.mxu0  ;;  %v982_v63 = vpop.f32.mrf.mxu1  ;;  %6051 = vst [vmem:[#allocation22_spill] sm:$0xff] %v6050_v29  ;;  %vm4964_vm1 = vmand %vm1401_vm6, %vm1466_vm2  ;;  %v6058_v29 = vmov 0  ;;  %vm1470_vm6 = vcmp.lt.s32.totalorder %v4481_v47, %v4960_v12  ;;  %vm1404_vm2 = vcmp.ge.s32.totalorder %v4474_v54, %v4943_v15 }
 0x1c7   :  { %v4937_v35 = vadd.f32 %v982_v63, %v839_v18  ;;  %v6055_v16 = vsel %vm4964_vm1, 4294967295, %v6054_v16  ;;  %v4974_v11 = vmul.u32 9, %v2507_v25 }
 0x1c8   :  { %6056 = vst [vmem:[#allocation25_spill] sm:$0xff] %v6055_v16  ;;  %v6061_v16 = vmov 0 }
 0x1c9   :  { %6048 = vst [vmem:[#allocation21_spill] sm:$0xff] %v4937_v35  ;;  %2526 = vmatprep.mubr.msk.f32.mxu0 %vm4933_vm3, %v4937_v35  ;;  %vm1405_vm3 = vcmp.ge.s32.totalorder %v4481_v47, %v4943_v15  ;;  %v1996_v15 = vld [vmem:[%s5833_s5 + $0x1b8] sm:$0x1] }
 0x1ca   :  { %v843_v14 = vpop.f32.mrf.mxu0  ;;  %2527 = vmatmul.mubr.msk.f32.gmra.mxu0 %vm4939_vm9, %v4931_v8  ;;  %vm4970_vm9 = vmand %vm1400_vm11, %vm1465_vm0  ;;  %vm1469_vm11 = vcmp.lt.s32.totalorder %v4474_v54, %v4960_v12 }
 0x1cb   :  { %v986_v63 = vpop.f32.mrf.mxu1  ;;  %v6059_v29 = vsel %vm4970_vm9, 4294967295, %v6058_v29  ;;  %vm4995_vm0 = vmand %vm1405_vm3, %vm1470_vm6  ;;  %vm1408_vm3 = vcmp.ge.s32.totalorder %v4474_v54, %v4974_v11 }
 0x1cc   :  { %v4962_v18 = vadd.f32 %v986_v63, %v843_v14  ;;  %v845_v58 = vpop.f32.mrf.mxu0  ;;  %6060 = vst [vmem:[#allocation27_spill] sm:$0xff] %v6059_v29  ;;  %v6062_v16 = vsel %vm4995_vm0, 4294967295, %v6061_v16 }
 0x1cd   :  { %v988_v40 = vpop.f32.mrf.mxu1  ;;  %6063 = vst [vmem:[#allocation28_spill] sm:$0xff] %v6062_v16 }
 0x1ce   :  { %v4968_v35 = vadd.f32 %v988_v40, %v845_v58  ;;  %v4991_v58 = vadd.s32 9, %v4974_v11 }
 0x1d0   :  { %6057 = vst [vmem:[#allocation26_spill] sm:$0xff] %v4968_v35  ;;  %2528 = vmatprep.mubr.msk.f32.mxu0 %vm4964_vm1, %v4968_v35  ;;  %v849_v14 = vpop.f32.mrf.mxu0  ;;  %v992_v63 = vpop.f32.mrf.mxu1  ;;  %vm1409_vm1 = vcmp.ge.s32.totalorder %v4481_v47, %v4974_v11  ;;  %vm1474_vm10 = vcmp.lt.s32.totalorder %v4481_v47, %v4991_v58  ;;  %vm1473_vm6 = vcmp.lt.s32.totalorder %v4474_v54, %v4991_v58 }
 0x1d1   :  { %2529 = vmatmul.mubr.msk.f32.gmra.mxu0 %vm4970_vm9, %v4962_v18  ;;  %v4993_v40 = vadd.f32 %v992_v63, %v849_v14  ;;  %vm5001_vm9 = vmand %vm1404_vm2, %vm1469_vm11 }
 0x1d2   :  { %v851_v25 = vpop.f32.mrf.mxu0  ;;  %v994_v37 = vpop.f32.mrf.mxu1  ;;  %vm5021_vm2 = vmand %vm1409_vm1, %vm1474_vm10  ;;  %vm5932_vm1 = vcmask 465920  }
 0x1d3   :  { %v4999_v35 = vadd.f32 %v994_v37, %v851_v25  ;;  %vm5027_vm11 = vmand %vm1408_vm3, %vm1473_vm6 }
 0x1d5   :  { %2530 = vmatprep.mubr.msk.f32.mxu0 %vm4995_vm0, %v4999_v35 }
 0x1d6   :  { %v855_v14 = vpop.f32.mrf.mxu0  ;;  %v998_v63 = vpop.f32.mrf.mxu1  ;;  %2531 = vmatmul.mubr.msk.f32.gmra.mxu0 %vm5001_vm9, %v4993_v40 }
 0x1d7   :  { %v5019_v37 = vadd.f32 %v998_v63, %v855_v14  ;;  %v5053_v14 = vadd.s32 256, %v4474_v54  ;;  %v1986_v63 = vld [vmem:[%s5833_s5 + $0x168] sm:$0xff] }
 0x1d8   :  { %v857_v25 = vpop.f32.mrf.mxu0  ;;  %v1000_v12 = vpop.f32.mrf.mxu1 }
 0x1d9   :  { %v5025_v47 = vadd.f32 %v1000_v12, %v857_v25  ;;  %v5047_v12 = vadd.s32 384, %v4474_v54  ;;  %vm1431_vm6 = vcmp.lt.s32.totalorder %v5053_v14, %v4498_v48 }
 0x1db   :  { %2532 = vmatprep.mubr.msk.f32.mxu0 %vm5021_vm2, %v5025_v47  ;;  %vm1367_vm10 = vcmp.ge.s32.totalorder %v5047_v12, %v4486_v51 }
 0x1dc   :  { %2533 = vmatmul.mubr.msk.f32.gmra.mxu0 %vm5027_vm11, %v5019_v37 }
 0x1dd   :  { %2561 = vmatprep.mubr.msk.f32.mxu0 %vm4500_vm7, %v4504_v7  ;;  %vm1363_vm7 = vcmp.ge.s32.totalorder %v5047_v12, %v4477_v56 }
 0x1e0   :  { %2562 = vmatmul.mubr.msk.f32.vlgmr.msra.gmra.mxu0 %vm4506_vm8, %v4512_v32  ;;  %vm1428_vm8 = vcmp.lt.s32.totalorder %v5047_v12, %v4484_v1 }
 0x1e1   :  { %2563 = vmatprep.mubr.msk.f32.mxu0 %vm4552_vm13, %v4559_v61  ;;  %vm1362_vm13 = vcmp.ge.s32.totalorder %v5053_v14, %v4477_v56 }
 0x1e4   :  { %2564 = vmatmul.mubr.msk.f32.gmra.mxu0 %vm4561_vm14, %v4544_v26  ;;  %vm1427_vm14 = vcmp.lt.s32.totalorder %v5053_v14, %v4484_v1 }
 0x1e5   :  { %2565 = vmatprep.mubr.msk.f32.mxu0 %vm4608_vm4, %v4615_v60  ;;  %vm1480_vm4 = vmand %vm1363_vm7, %vm1428_vm8  ;;  %vm6072_vm8 = vnez %v6015_v50 }
 0x1e6   :  { %vm5076_vm3 = vmand %vm1362_vm13, %vm1427_vm14  ;;  %vm1436_vm13 = vcmp.lt.s32.totalorder %v5047_v12, %v4539_v0 }
 0x1e7   :  { %v1069_v49 = vpop.f32.mrf.mxu0  ;;  %v1212_v7 = vpop.f32.mrf.mxu1 }
 0x1e8   :  { %2566 = vmatmul.mubr.msk.f32.gmra.mxu0 %vm4617_vm5, %v4600_v28  ;;  %vm1432_vm5 = vcmp.lt.s32.totalorder %v5047_v12, %v4498_v48  ;;  %v5080_v1 = vadd.f32 %v1212_v7, %v1069_v49  ;;  %v1988_v28 = vld [vmem:[%s5833_s5 + $0x178] sm:$0xff] }
 0x1e9   :  { %v1071_v17 = vpop.f32.mrf.mxu0  ;;  %v1214_v32 = vpop.f32.mrf.mxu1  ;;  %2567 = vmatprep.mubr.msk.f32.mxu0 %vm4665_vm12, %v4672_v6  ;;  %vm1366_vm12 = vcmp.ge.s32.totalorder %v5053_v14, %v4486_v51  ;;  %vm1484_vm7 = vmand %vm1367_vm10, %vm1432_vm5  ;;  %vm1370_vm10 = vcmp.ge.s32.totalorder %v5053_v14, %v4510_v57  ;;  %vm1435_vm5 = vcmp.lt.s32.totalorder %v5053_v14, %v4539_v0 }
 0x1ea   :  { %v1215_v26 = vadd.f32 %v1214_v32, %v1071_v17  ;;  %vm5106_vm14 = vmand %vm1366_vm12, %vm1431_vm6  ;;  %vm6076_vm6 = vnez %v6019_v55  ;;  %v1984_v32 = vld [vmem:[%s5833_s5 + $0x158] sm:$0xff] }
 0x1eb   :  { %v1075_v46 = vpop.f32.mrf.mxu0  ;;  %v1218_v56 = vpop.f32.mrf.mxu1 }
 0x1ec   :  { %v5082_v38 = vsel %vm1480_vm4, %v1215_v26, 0.0  ;;  %2568 = vmatmul.mubr.msk.f32.gmra.mxu0 %vm4677_vm15, %v4657_v13  ;;  %vm1371_vm15 = vcmp.ge.s32.totalorder %v5047_v12, %v4510_v57  ;;  %v5110_v31 = vadd.f32 %v1218_v56, %v1075_v46  ;;  %vm6075_vm4 = vnez %v6017_v20 }
 0x1ed   :  { %v1077_v43 = vpop.f32.mrf.mxu0  ;;  %v1220_v60 = vpop.f32.mrf.mxu1  ;;  %2535 = vmatprep.mubr.msk.f32.mxu1 %vm5932_vm1, %v5082_v38  ;;  %2569 = vmatprep.mubr.msk.f32.mxu0 %vm6072_vm8, %v4731_v23  ;;  %vm1488_vm12 = vmand %vm1371_vm15, %vm1436_vm13  ;;  %vm1440_vm8 = vcmp.lt.s32.totalorder %v5047_v12, %v4595_v42  ;;  %vm6079_vm13 = vnez %v6021_v24 }
 0x1ee   :  { %v1221_v45 = vadd.f32 %v1220_v60, %v1077_v43  ;;  %2536 = vmatmul.mubr.msk.f32.vlgmr.msra.gmra.mxu1 %vm5076_vm3, %v5080_v1  ;;  %vm5140_vm15 = vmand %vm1370_vm10, %vm1435_vm5  ;;  %vm1439_vm10 = vcmp.lt.s32.totalorder %v5053_v14, %v4595_v42  ;;  %v1985_v42 = vld [vmem:[%s5833_s5 + $0x160] sm:$0xff] }
 0x1ef   :  { %v1081_v51 = vpop.f32.mrf.mxu0  ;;  %v1224_v48 = vpop.f32.mrf.mxu1  ;;  %2131 = vmatpush1.msra.mxu1 %v1988_v28 }
 0x1f0   :  { %v5112_v6 = vsel %vm1484_vm7, %v1221_v45, 0.0  ;;  %2570 = vmatmul.mubr.msk.f32.gmra.mxu0 %vm6075_vm4, %v4716_v5  ;;  %2132 = vmatprep.subr.mxu1 %v5952_v30  ;;  %vm1375_vm7 = vcmp.ge.s32.totalorder %v5047_v12, %v4565_v41  ;;  %v5144_v55 = vadd.f32 %v1224_v48, %v1081_v51  ;;  %vm1374_vm4 = vcmp.ge.s32.totalorder %v5053_v14, %v4565_v41  ;;  %v6088_v51 = vld [vmem:[#allocation16_spill] sm:$0xff]  ;;  %v6089_v48 = vld [vmem:[#allocation15_spill] sm:$0xff] }
 0x1f1   :  { %v1083_v50 = vpop.f32.mrf.mxu0  ;;  %v1226_v23 = vpop.f32.mrf.mxu1  ;;  %2537 = vmatprep.mubr.msk.f32.mxu1 %vm5932_vm1, %v5112_v6  ;;  %2571 = vmatprep.mubr.msk.f32.mxu0 %vm6076_vm6, %v4793_v34  ;;  %vm1492_vm5 = vmand %vm1375_vm7, %vm1440_vm8  ;;  %vm1379_vm6 = vcmp.ge.s32.totalorder %v5047_v12, %v4621_v2  ;;  %vm6083_vm8 = vnez %v6027_v33  ;;  %v1983_v33 = vld [vmem:[%s5833_s5 + $0x150] sm:$0xff] }
 0x1f2   :  { %v1227_v5 = vadd.f32 %v1226_v23, %v1083_v50  ;;  %2538 = vmatmul.mubr.msk.f32.gmra.mxu1 %vm5106_vm14, %v5110_v31  ;;  %vm5180_vm7 = vmand %vm1374_vm4, %vm1439_vm10  ;;  %vm1378_vm4 = vcmp.ge.s32.totalorder %v5053_v14, %v4621_v2  ;;  %vm1443_vm10 = vcmp.lt.s32.totalorder %v5053_v14, %v4652_v62 }
 0x1f3   :  { %v1087_v57 = vpop.f32.mrf.mxu0  ;;  %v1230_v0 = vpop.f32.mrf.mxu1  ;;  %2133 = vmatpush1.msra.mxu1 %v1987_v21  ;;  %v6092_v21 = vmov 0 }
 0x1f4   :  { %v5146_v34 = vsel %vm1488_vm12, %v1227_v5, 0.0  ;;  %2572 = vmatmul.mubr.msk.f32.gmra.mxu0 %vm6079_vm13, %v4778_v53  ;;  %2134 = vmatprep.subr.mxu1 %v5952_v30  ;;  %vm6080_vm12 = vnez %v6025_v3  ;;  %vm1444_vm13 = vcmp.lt.s32.totalorder %v5047_v12, %v4652_v62  ;;  %v1982_v62 = vld [vmem:[%s5833_s5 + $0x148] sm:$0xff] }
 0x1f5   :  { %v1089_v25 = vpop.f32.mrf.mxu0  ;;  %v1232_v49 = vpop.f32.mrf.mxu1  ;;  %2539 = vmatprep.mubr.msk.f32.mxu1 %vm5932_vm1, %v5146_v34  ;;  %2573 = vmatprep.mubr.msk.f32.mxu0 %vm6080_vm12, %v4841_v19  ;;  %v5184_v19 = vadd.f32 %v1230_v0, %v1087_v57  ;;  %vm1383_vm12 = vcmp.ge.s32.totalorder %v5047_v12, %v4681_v4  ;;  %v6094_v5 = vld [vmem:[#allocation17_spill] sm:$0xff] }
 0x1f6   :  { %v1233_v53 = vadd.f32 %v1232_v49, %v1089_v25  ;;  %2540 = vmatmul.mubr.msk.f32.gmra.mxu1 %vm5140_vm15, %v5144_v55  ;;  %v6097_v0 = vld [vmem:[#allocation9_spill] sm:$0xff] }
 0x1f7   :  { %v1093_v24 = vpop.f32.mrf.mxu0  ;;  %v1236_v7 = vpop.f32.mrf.mxu1  ;;  %2135 = vmatpush1.msra.mxu1 %v1986_v63  ;;  %v6098_v63 = vld [vmem:[#allocation10_spill] sm:$0xff] }
 0x1f8   :  { %v5186_v17 = vsel %vm1492_vm5, %v1233_v53, 0.0  ;;  %2136 = vmatprep.subr.mxu1 %v5952_v30  ;;  %2574 = vmatmul.mubr.msk.f32.gmra.mxu0 %vm6083_vm8, %v4828_v10  ;;  %vm1496_vm5 = vmand %vm1379_vm6, %vm1444_vm13  ;;  %vm1448_vm8 = vcmp.lt.s32.totalorder %v5047_v12, %v4710_v52  ;;  %vm6084_vm6 = vnez %v6031_v9  ;;  %v5231_v43 = vadd.f32 %v1236_v7, %v1093_v24  ;;  %v1979_v25 = vld [vmem:[%s5833_s5 + $0x130] sm:$0xff]  ;;  %v6100_v24 = vld [vmem:[#allocation20_spill] sm:$0xff] }
 0x1f9   :  { %v1095_v41 = vpop.f32.mrf.mxu0  ;;  %v1238_v26 = vpop.f32.mrf.mxu1  ;;  %2541 = vmatprep.mubr.msk.f32.mxu1 %vm5932_vm1, %v5186_v17  ;;  %2137 = vmatpush1.msra.mxu1 %v1985_v42  ;;  %vm5227_vm13 = vmand %vm1378_vm4, %vm1443_vm10  ;;  %vm1447_vm10 = vcmp.lt.s32.totalorder %v5053_v14, %v4710_v52  ;;  %vm1452_vm4 = vcmp.lt.s32.totalorder %v5047_v12, %v4772_v36  ;;  %v1980_v52 = vld [vmem:[%s5833_s5 + $0x138] sm:$0xff]  ;;  %v6099_v42 = vld [vmem:[#allocation21_spill] sm:$0xff]  ;;  %v6104_v7 = vmov 0 }
 0x1fa   :  { %v1239_v10 = vadd.f32 %v1238_v26, %v1095_v41  ;;  %2542 = vmatmul.mubr.msk.f32.gmra.mxu1 %vm5180_vm7, %v5184_v19  ;;  %2138 = vmatprep.subr.mxu1 %v5952_v30  ;;  %v6106_v26 = vld [vmem:[#allocation22_spill] sm:$0xff] }
 0x1fb   :  { %v1099_v46 = vpop.f32.mrf.mxu0  ;;  %v1242_v56 = vpop.f32.mrf.mxu1  ;;  %2575 = vmatprep.mubr.msk.f32.mxu0 %vm6084_vm6, %v4873_v39  ;;  %2139 = vmatpush1.msra.mxu1 %v1984_v32  ;;  %vm6087_vm6 = vnez %v6033_v27  ;;  %v1981_v39 = vld [vmem:[%s5833_s5 + $0x140] sm:$0xff] }
 0x1fc   :  { %v5233_v60 = vsel %vm1496_vm5, %v1239_v10, 0.0  ;;  %2140 = vmatprep.subr.mxu1 %v5952_v30  ;;  %2576 = vmatmul.mubr.msk.f32.gmra.mxu0 %vm6087_vm6, %v4867_v22  ;;  %vm1500_vm5 = vmand %vm1383_vm12, %vm1448_vm8  ;;  %vm1387_vm6 = vcmp.ge.s32.totalorder %v5047_v12, %v4743_v44  ;;  %vm6090_vm12 = vnez %v6089_v48  ;;  %vm6091_vm8 = vcmp.ge.s32.totalorder %v5053_v14, %v4681_v4  ;;  %v1976_v48 = vld [vmem:[%s5833_s5 + $0x118] sm:$0xff] }
 0x1fd   :  { %v1101_v2 = vpop.f32.mrf.mxu0  ;;  %v1244_v9 = vpop.f32.mrf.mxu1  ;;  %2543 = vmatprep.mubr.msk.f32.mxu1 %vm5932_vm1, %v5233_v60  ;;  %2141 = vmatpush1.msra.mxu1 %v1983_v33  ;;  %vm5274_vm1 = vmand %vm6091_vm8, %vm1447_vm10  ;;  %v5278_v50 = vadd.f32 %v1242_v56, %v1099_v46  ;;  %vm1456_vm8 = vcmp.lt.s32.totalorder %v5047_v12, %v6098_v63  ;;  %v6110_v33 = vld [vmem:[#allocation11_spill] sm:$0xff]  ;;  %v6111_v46 = vld [vmem:[#allocation12_spill] sm:$0xff] }
 0x1fe   :  { %v1245_v22 = vadd.f32 %v1244_v9, %v1101_v2  ;;  %2544 = vmatmul.mubr.msk.f32.gmra.mxu1 %vm5227_vm13, %v5231_v43  ;;  %2142 = vmatprep.subr.mxu1 %v5952_v30  ;;  %v6093_v21 = vsel %vm5274_vm1, 4294967295, %v6092_v21  ;;  %v1977_v56 = vld [vmem:[%s5833_s5 + $0x120] sm:$0xff]  ;;  %v6112_v9 = vld [vmem:[#allocation26_spill] sm:$0xff] }
 0x1ff   :  { %v1105_v27 = vpop.f32.mrf.mxu0  ;;  %v1248_v45 = vpop.f32.mrf.mxu1  ;;  %2577 = vmatprep.mubr.msk.f32.mxu0 %vm6090_vm12, %v6088_v51  ;;  %2143 = vmatpush1.msra.mxu1 %v1982_v62  ;;  %vm6095_vm12 = vnez %v6094_v5  ;;  %v6119_v51 = vld [vmem:[#allocation27_spill] sm:$0xff] }
 0x200   :  { %v5280_v23 = vsel %vm1500_vm5, %v1245_v22, 0.0  ;;  %2144 = vmatprep.subr.mxu1 %v5952_v30  ;;  %2578 = vmatmul.mubr.msk.f32.gmra.mxu0 %vm6095_vm12, %v4899_v59  ;;  %vm1504_vm5 = vmand %vm1387_vm6, %vm1452_vm4  ;;  %vm6096_vm12 = vcmask 465920   ;;  %vm6101_vm4 = vnez %v6100_v24  ;;  %vm6102_vm6 = vcmp.lt.s32.totalorder %v5053_v14, %v4772_v36  ;;  %v1978_v36 = vld [vmem:[%s5833_s5 + $0x128] sm:$0xff] }
 0x201   :  { %v1107_v4 = vpop.f32.mrf.mxu0  ;;  %v1250_v57 = vpop.f32.mrf.mxu1  ;;  %2545 = vmatprep.mubr.msk.f32.mxu1 %vm6096_vm12, %v5280_v23  ;;  %2145 = vmatpush1.msra.mxu1 %v1981_v39  ;;  %vm6103_vm12 = vcmp.ge.s32.totalorder %v5053_v14, %v4743_v44  ;;  %v5325_v32 = vadd.f32 %v1248_v45, %v1105_v27  ;;  %v6113_v22 = vld [vmem:[#allocation25_spill] sm:$0xff] }
 0x202   :  { %v1251_v59 = vadd.f32 %v1250_v57, %v1107_v4  ;;  %2546 = vmatmul.mubr.msk.f32.gmra.mxu1 %vm5274_vm1, %v5278_v50  ;;  %2146 = vmatprep.subr.mxu1 %v5952_v30  ;;  %vm5321_vm10 = vmand %vm6103_vm12, %vm6102_vm6  ;;  %vm1460_vm12 = vcmp.lt.s32.totalorder %v5047_v12, %v6111_v46  ;;  %v6123_v4 = vld [vmem:[#allocation13_spill] sm:$0xff]  ;;  %v6124_v57 = vld [vmem:[#allocation14_spill] sm:$0xff] }
 0x203   :  { %v1111_v49 = vpop.f32.mrf.mxu0  ;;  %v1254_v53 = vpop.f32.mrf.mxu1  ;;  %2579 = vmatprep.mubr.msk.f32.mxu0 %vm6101_vm4, %v6099_v42  ;;  %2147 = vmatpush1.msra.mxu1 %v1980_v52  ;;  %v6105_v7 = vsel %vm5321_vm10, 4294967295, %v6104_v7  ;;  %vm6107_vm4 = vnez %v6106_v26 }
 0x204   :  { %v5327_v41 = vsel %vm1504_vm5, %v1251_v59, 0.0  ;;  %2148 = vmatprep.subr.mxu1 %v5952_v30  ;;  %2580 = vmatmul.mubr.msk.f32.gmra.mxu0 %vm6107_vm4, %v4931_v8  ;;  %vm6108_vm5 = vcmp.ge.s32.totalorder %v5047_v12, %v6097_v0  ;;  %vm6109_vm4 = vcmask 465920   ;;  %v5372_v27 = vadd.f32 %v1254_v53, %v1111_v49  ;;  %v1975_v59 = vld [vmem:[%s5833_s5 + $0x110] sm:$0xff] }
 0x205   :  { %v1113_v44 = vpop.f32.mrf.mxu0  ;;  %v1256_v10 = vpop.f32.mrf.mxu1  ;;  %vm1508_vm1 = vmand %vm6108_vm5, %vm1456_vm8  ;;  %2547 = vmatprep.mubr.msk.f32.mxu1 %vm6109_vm4, %v5327_v41  ;;  %2149 = vmatpush1.msra.mxu1 %v1979_v25  ;;  %vm6114_vm8 = vnez %v6113_v22  ;;  %vm6115_vm5 = vcmp.lt.s32.totalorder %v5053_v14, %v6098_v63  ;;  %vm6116_vm4 = vcmp.ge.s32.totalorder %v5053_v14, %v6097_v0 }
 0x206   :  { %v1257_v8 = vadd.f32 %v1256_v10, %v1113_v44  ;;  %2548 = vmatmul.mubr.msk.f32.gmra.mxu1 %vm5321_vm10, %v5325_v32  ;;  %2150 = vmatprep.subr.mxu1 %v5952_v30  ;;  %vm5368_vm6 = vmand %vm6116_vm4, %vm6115_vm5  ;;  %vm1399_vm5 = vcmp.ge.s32.totalorder %v5047_v12, %v6123_v4  ;;  %vm1464_vm4 = vcmp.lt.s32.totalorder %v5047_v12, %v6124_v57  ;;  %v1973_v44 = vld [vmem:[%s5833_s5 + $0x100] sm:$0xff] }
 0x207   :  { %v1117_v62 = vpop.f32.mrf.mxu0  ;;  %v1260_v2 = vpop.f32.mrf.mxu1  ;;  %2581 = vmatprep.mubr.msk.f32.mxu0 %vm6114_vm8, %v6112_v9  ;;  %2151 = vmatpush1.msra.mxu1 %v1978_v36  ;;  %vm6120_vm8 = vnez %v6119_v51  ;;  %v6132_v36 = vld [vmem:[#allocation19_spill] sm:$0xff]  ;;  %v1995_v9 = vld [vmem:[%s5833_s5 + $0x1b0] sm:$0xff] }
 0x208   :  { %v5374_v45 = vsel %vm1508_vm1, %v1257_v8, 0.0  ;;  %2152 = vmatprep.subr.mxu1 %v5952_v30  ;;  %2582 = vmatmul.mubr.msk.f32.gmra.mxu0 %vm6120_vm8, %v4962_v18  ;;  %vm6121_vm1 = vcmp.ge.s32.totalorder %v5047_v12, %v6110_v33  ;;  %vm6122_vm8 = vcmask 465920   ;;  %v5419_v53 = vadd.f32 %v1260_v2, %v1117_v62  ;;  %v6138_v2 = vld [vmem:[#allocation24_spill] sm:$0xff] }
 0x209   :  { %v1119_v5 = vpop.f32.mrf.mxu0  ;;  %v1262_v52 = vpop.f32.mrf.mxu1  ;;  %vm1512_vm10 = vmand %vm6121_vm1, %vm1460_vm12  ;;  %2549 = vmatprep.mubr.msk.f32.mxu1 %vm6122_vm8, %v5374_v45  ;;  %2153 = vmatpush1.msra.mxu1 %v1977_v56  ;;  %vm6126_vm12 = vcmp.lt.s32.totalorder %v5053_v14, %v6111_v46  ;;  %vm6127_vm1 = vcmp.ge.s32.totalorder %v5053_v14, %v6110_v33 }
 0x20a   :  { %v1263_v18 = vadd.f32 %v1262_v52, %v1119_v5  ;;  %2550 = vmatmul.mubr.msk.f32.gmra.mxu1 %vm5368_vm6, %v5372_v27  ;;  %2154 = vmatprep.subr.mxu1 %v5952_v30  ;;  %vm5415_vm8 = vmand %vm6127_vm1, %vm6126_vm12  ;;  %vm1463_vm12 = vcmp.lt.s32.totalorder %v5053_v14, %v6124_v57 }
 0x20b   :  { %v1123_v0 = vpop.f32.mrf.mxu0  ;;  %v1266_v63 = vpop.f32.mrf.mxu1  ;;  %2583 = vmatprep.mubr.msk.f32.mxu0 %vm4995_vm0, %v4999_v35  ;;  %2155 = vmatpush1.msra.mxu1 %v1976_v48  ;;  %v1974_v35 = vld [vmem:[%s5833_s5 + $0x108] sm:$0xff]  ;;  %vm1468_vm0 = vcmp.lt.s32.totalorder %v5047_v12, %v6132_v36  ;;  %v6140_v48 = vmov 0 }
 0x20c   :  { %v5421_v42 = vsel %vm1512_vm10, %v1263_v18, 0.0  ;;  %2156 = vmatprep.subr.mxu1 %v5952_v30  ;;  %2584 = vmatmul.mubr.msk.f32.gmra.mxu0 %vm5001_vm9, %v4993_v40  ;;  %vm1516_vm10 = vmand %vm1399_vm5, %vm1464_vm4  ;;  %vm6130_vm9 = vcmask 465920   ;;  %v6131_v40 = vld [vmem:[#allocation18_spill] sm:$0xff]  ;;  %vm6133_vm5 = vcmp.ge.s32.totalorder %v5053_v14, %v6123_v4  ;;  %v5466_v46 = vadd.f32 %v1266_v63, %v1123_v0  ;;  %v1994_v18 = vld [vmem:[%s5833_s5 + $0x1a8] sm:$0xff] }
 0x20d   :  { %v1125_v24 = vpop.f32.mrf.mxu0  ;;  %v1268_v26 = vpop.f32.mrf.mxu1  ;;  %2551 = vmatprep.mubr.msk.f32.mxu1 %vm6130_vm9, %v5421_v42  ;;  %2157 = vmatpush1.msra.mxu1 %v1975_v59  ;;  %vm1403_vm1 = vcmp.ge.s32.totalorder %v5047_v12, %v6131_v40  ;;  %vm5462_vm4 = vmand %vm6133_vm5, %vm1463_vm12  ;;  %vm1467_vm12 = vcmp.lt.s32.totalorder %v5053_v14, %v6132_v36  ;;  %vm1472_vm5 = vcmp.lt.s32.totalorder %v5047_v12, %v6138_v2  ;;  %v1993_v0 = vld [vmem:[%s5833_s5 + $0x1a0] sm:$0xff] }
 0x20e   :  { %v1269_v29 = vadd.f32 %v1268_v26, %v1125_v24  ;;  %2552 = vmatmul.mubr.msk.f32.gmra.mxu1 %vm5415_vm8, %v5419_v53  ;;  %2158 = vmatprep.subr.mxu1 %v5952_v30 }
 0x20f   :  { %v1129_v10 = vpop.f32.mrf.mxu0  ;;  %v1272_v8 = vpop.f32.mrf.mxu1  ;;  %2585 = vmatprep.mubr.msk.f32.mxu0 %vm5021_vm2, %v5025_v47  ;;  %2159 = vmatpush1.msra.mxu1 %v1974_v35  ;;  %vm1402_vm2 = vcmp.ge.s32.totalorder %v5053_v14, %v6131_v40 }
 0x210   :  { %v5468_v56 = vsel %vm1516_vm10, %v1269_v29, 0.0  ;;  %2160 = vmatprep.subr.mxu1 %v5952_v30  ;;  %2586 = vmatmul.mubr.msk.f32.gmra.mxu0 %vm5027_vm11, %v5019_v37  ;;  %vm1520_vm10 = vmand %vm1403_vm1, %vm1468_vm0  ;;  %v6137_v37 = vld [vmem:[#allocation23_spill] sm:$0xff]  ;;  %vm6139_vm0 = vcmask 1040384   ;;  %v5511_v5 = vadd.f32 %v1272_v8, %v1129_v10  ;;  %v1991_v10 = vld [vmem:[%s5833_s5 + $0x190] sm:$0xff] }
 0x211   :  { %v1131_v47 = vpop.f32.mrf.mxu0  ;;  %v1274_v62 = vpop.f32.mrf.mxu1  ;;  %vm6136_vm11 = vmmov %vm6130_vm9  ;;  %2161 = vmatpush1.msra.mxu1 %v1973_v44  ;;  %vm1407_vm9 = vcmp.ge.s32.totalorder %v5047_v12, %v6137_v37  ;;  %v1992_v29 = vld [vmem:[%s5833_s5 + $0x198] sm:$0xff]  ;;  %v1989_v8 = vld [vmem:[%s5833_s5 + $0x180] sm:$0xff] }
 0x212   :  { %2553 = vmatprep.mubr.msk.f32.mxu1 %vm6136_vm11, %v5468_v56  ;;  %v1275_v16 = vadd.f32 %v1274_v62, %v1131_v47  ;;  %2178 = vmatprep.subr.mxu1 %v5952_v30  ;;  %vm5507_vm1 = vmand %vm1402_vm2, %vm1467_vm12 }
 0x213   :  { %2554 = vmatmul.mubr.msk.f32.gmra.mxu1 %vm5462_vm4, %v5466_v46  ;;  %v1135_v22 = vpop.f32.mrf.mxu0  ;;  %v1278_v51 = vpop.f32.mrf.mxu1  ;;  %v6141_v48 = vsel %vm5507_vm1, 4294967295, %v6140_v48  ;;  %vm1524_vm2 = vmand %vm1407_vm9, %vm1472_vm5  ;;  %vm6143_vm9 = vcmp.ge.s32.totalorder %v5053_v14, %v6137_v37 }
 0x214   :  { %2587 = vmatpush2.msk.msra.mxu1 %vm6139_vm0, %v1996_v15  ;;  %v5513_v52 = vsel %vm1520_vm10, %v1275_v16, 0.0  ;;  %vm1471_vm0 = vcmp.lt.s32.totalorder %v5053_v14, %v6138_v2  ;;  %vm6142_vm12 = vmmov %vm6136_vm11  ;;  %vm1476_vm11 = vcmp.lt.s32.totalorder %v5047_v12, %v4991_v58  ;;  %v1279_v24 = vadd.f32 %v1278_v51, %v1135_v22 }
 0x215   :  { %2180 = vmatprep.subr.mxu1 %v5952_v30  ;;  %v1137_v4 = vpop.f32.mrf.mxu0  ;;  %v1280_v57 = vpop.f32.mrf.mxu1  ;;  %2555 = vmatprep.mubr.msk.f32.mxu1 %vm6142_vm12, %v5513_v52  ;;  %vm5545_vm5 = vmand %vm6143_vm9, %vm1471_vm0  ;;  %vm1410_vm12 = vcmp.ge.s32.totalorder %v5053_v14, %v4974_v11  ;;  %vm1475_vm10 = vcmp.lt.s32.totalorder %v5053_v14, %v4991_v58  ;;  %vm6146_vm0 = vcmp.ge.s32.totalorder %v5047_v12, %v4974_v11  ;;  %v1990_v14 = vld [vmem:[%s5833_s5 + $0x188] sm:$0xff] }
 0x216   :  { %2181 = vmatpush2.msra.mxu1 %v1995_v9  ;;  %v1281_v59 = vadd.f32 %v1280_v57, %v1137_v4  ;;  %vm1528_vm9 = vmand %vm6146_vm0, %vm1476_vm11 }
 0x217   :  { %2556 = vmatmul.mubr.msk.f32.gmra.mxu1 %vm5507_vm1, %v5511_v5  ;;  %2182 = vmatprep.subr.mxu1 %v5952_v30  ;;  %v1141_v63 = vpop.f32.mrf.mxu0  ;;  %v1284_v25 = vpop.f32.mrf.mxu1  ;;  %vm6147_vm1 = vcmask 465920  }
 0x218   :  { %2183 = vmatpush2.msra.mxu1 %v1994_v18  ;;  %v1576_v26 = vsel %vm1524_vm2, %v1281_v59, 0.0  ;;  %vm5567_vm2 = vmand %vm1410_vm12, %vm1475_vm10  ;;  %v1285_v11 = vadd.f32 %v1284_v25, %v1141_v63 }
 0x219   :  { %2184 = vmatprep.subr.mxu1 %v5952_v30  ;;  %v1143_v40 = vpop.f32.mrf.mxu0  ;;  %v1286_v36 = vpop.f32.mrf.mxu1  ;;  %2557 = vmatprep.mubr.msk.f32.mxu1 %vm6147_vm1, %v1576_v26  ;;  %vm6150_vm11 = vmmov %vm6147_vm1 }
 0x21a   :  { %2185 = vmatpush2.msra.mxu1 %v1993_v0  ;;  %v1287_v44 = vadd.f32 %v1286_v36, %v1143_v40  ;;  %vm6151_vm10 = vmmov %vm6147_vm1 }
 0x21b   :  { %2558 = vmatmul.mubr.msk.f32.gmra.mxu1 %vm5545_vm5, %v1279_v24  ;;  %2186 = vmatprep.subr.mxu1 %v5952_v30  ;;  %vm6152_vm12 = vmmov %vm6147_vm1 }
 0x21c   :  { %2187 = vmatpush2.msra.mxu1 %v1992_v29  ;;  %v1580_v12 = vsel %vm1528_vm9, %v1287_v44, 0.0  ;;  %vm6153_vm0 = vmmov %vm6147_vm1 }
 0x21d   :  { %2188 = vmatprep.subr.mxu1 %v5952_v30  ;;  %2559 = vmatprep.mubr.msk.f32.mxu1 %vm6147_vm1, %v1580_v12  ;;  %vm6157_vm9 = vmmov %vm6153_vm0 }
 0x21e   :  { %2189 = vmatpush2.msra.mxu1 %v1991_v10  ;;  %vm6159_vm1 = vmmov %vm6153_vm0 }
 0x21f   :  { %2560 = vmatmul.mubr.msk.f32.gmra.mxu1 %vm5567_vm2, %v1285_v11  ;;  %2190 = vmatprep.subr.mxu1 %v5952_v30 }
 0x220   :  { %2191 = vmatpush2.msra.mxu1 %v1990_v14  ;;  %2588 = vmatprep.mubr.msk.f32.mxu1 %vm6150_vm11, %v5082_v38  ;;  %vm6161_vm11 = vmmov %vm6153_vm0 }
 0x221   :  { %2192 = vmatprep.subr.mxu1 %v5952_v30 }
 0x222   :  { %2193 = vmatpush2.msra.mxu1 %v1989_v8 }
 0x223   :  { %2589 = vmatmul.mubr.msk.f32.vlgmr.msra.gmra.mxu1 %vm5076_vm3, %v5080_v1  ;;  %2820 = vmatprep.subr.mxu1 %v5952_v30  ;;  %vm6154_vm3 = vmmov %vm6153_vm0 }
 0x224   :  { %2590 = vmatprep.mubr.msk.f32.mxu1 %vm6151_vm10, %v5112_v6  ;;  %vm6162_vm10 = vmmov %vm6153_vm0 }
 0x227   :  { %2591 = vmatmul.mubr.msk.f32.gmra.mxu1 %vm5106_vm14, %v5110_v31  ;;  %vm6155_vm14 = vmmov %vm6153_vm0 }
 0x228   :  { %2592 = vmatprep.mubr.msk.f32.mxu1 %vm6152_vm12, %v5146_v34  ;;  %vm6164_vm12 = vmmov %vm6153_vm0 }
 0x22b   :  { %2593 = vmatmul.mubr.msk.f32.gmra.mxu1 %vm5140_vm15, %v5144_v55  ;;  %vm6156_vm15 = vnez %v6093_v21 }
 0x22c   :  { %2594 = vmatprep.mubr.msk.f32.mxu1 %vm6153_vm0, %v5186_v17 }
 0x22f   :  { %2595 = vmatmul.mubr.msk.f32.gmra.mxu1 %vm5180_vm7, %v5184_v19  ;;  %vm6158_vm7 = vnez %v6105_v7 }
 0x230   :  { %2596 = vmatprep.mubr.msk.f32.mxu1 %vm6154_vm3, %v5233_v60 }
 0x233   :  { %2597 = vmatmul.mubr.msk.f32.gmra.mxu1 %vm5227_vm13, %v5231_v43  ;;  %vm6160_vm13 = vmmov %vm6153_vm0 }
 0x234   :  { %2598 = vmatprep.mubr.msk.f32.mxu1 %vm6155_vm14, %v5280_v23  ;;  %vm2275_vm14 = vcmask 801792  }
 0x237   :  { %2599 = vmatmul.mubr.msk.f32.gmra.mxu1 %vm6156_vm15, %v5278_v50  ;;  %vm2353_vm15 = vcmask 33792  }
 0x238   :  { %2600 = vmatprep.mubr.msk.f32.mxu1 %vm6157_vm9, %v5327_v41 }
 0x23b   :  { %2601 = vmatmul.mubr.msk.f32.gmra.mxu1 %vm6158_vm7, %v5325_v32 }
 0x23c   :  { %2602 = vmatprep.mubr.msk.f32.mxu1 %vm6159_vm1, %v5374_v45 }
 0x23f   :  { %2603 = vmatmul.mubr.msk.f32.gmra.mxu1 %vm5368_vm6, %v5372_v27  ;;  %vm6163_vm6 = vnez %v6141_v48 }
 0x240   :  { %2604 = vmatprep.mubr.msk.f32.mxu1 %vm6160_vm13, %v5421_v42 }
 0x243   :  { %2605 = vmatmul.mubr.msk.f32.gmra.mxu1 %vm5415_vm8, %v5419_v53  ;;  %vm6165_vm8 = vmmov %vm6153_vm0 }
 0x244   :  { %2606 = vmatprep.mubr.msk.f32.mxu1 %vm6161_vm11, %v5468_v56 }
 0x247   :  { %2607 = vmatmul.mubr.msk.f32.gmra.mxu1 %vm5462_vm4, %v5466_v46  ;;  %vm2900_vm4 = vmmov 0  }
 0x248   :  { %2608 = vmatprep.mubr.msk.f32.mxu1 %vm6162_vm10, %v5513_v52  ;;  %2817 = vmatprep.mubr.msk.f32.mxu0 %vm2900_vm4, %v5952_v30 }
 0x24b   :  { %2609 = vmatmul.mubr.msk.f32.gmra.mxu1 %vm6163_vm6, %v5511_v5 }
 0x24c   :  { %2610 = vmatprep.mubr.msk.f32.mxu1 %vm6164_vm12, %v1576_v26 }
 0x24f   :  { %2611 = vmatmul.mubr.msk.f32.gmra.mxu1 %vm5545_vm5, %v1279_v24  ;;  %vm2279_vm5 = vcmask 1041408  }
 0x250   :  { %2612 = vmatprep.mubr.msk.f32.mxu1 %vm6165_vm8, %v1580_v12 }
 0x253   :  { %2613 = vmatmul.mubr.msk.f32.gmra.mxu1 %vm5567_vm2, %v1285_v11 }
 0x254   :  { %v2653_v61 = vpop.f32.mrf.mxu0  ;;  %2846 = vmatprep.mubr.msk.f32.mxu1 %vm2900_vm4, %v5952_v30 }
 0x256   :  { %v2654_v1 = vpop.f32.mrf.mxu0 }
 0x257   :  { %v2655_v38 = vadd.f32 %v2654_v1, %v2653_v61 }
 0x25a   :  { %v2656_v13 = vpop.f32.mrf.mxu0 }
 0x25c   :  { %v2657_v31 = vpop.f32.mrf.mxu0 }
 0x25d   :  { %v2658_v6 = vadd.f32 %v2657_v31, %v2656_v13 }
 0x260   :  { %v5645_v20 = vpop.f32.mrf.mxu0 }
 0x262   :  { %v5647_v55 = vpop.f32.mrf.mxu0 }
 0x266   :  { %v5649_v34 = vpop.f32.mrf.mxu0 }
 0x268   :  { %v5651_v3 = vpop.f32.mrf.mxu0 }
 0x26c   :  { %v5653_v19 = vpop.f32.mrf.mxu0 }
 0x26e   :  { %v5655_v17 = vpop.f32.mrf.mxu0 }
 0x272   :  { %v5657_v28 = vpop.f32.mrf.mxu0 }
 0x274   :  { %v5659_v43 = vpop.f32.mrf.mxu0 }
 0x278   :  { %v5661_v60 = vpop.f32.mrf.mxu0 }
 0x27a   :  { %v5663_v21 = vpop.f32.mrf.mxu0 }
 0x27e   :  { %v5665_v50 = vpop.f32.mrf.mxu0 }
 0x280   :  { %v5667_v23 = vpop.f32.mrf.mxu0 }
 0x284   :  { %v5669_v7 = vpop.f32.mrf.mxu0 }
 0x286   :  { %v5671_v32 = vpop.f32.mrf.mxu0 }
 0x28a   :  { %v5673_v41 = vpop.f32.mrf.mxu0 }
 0x28c   :  { %v5675_v39 = vpop.f32.mrf.mxu0 }
 0x291   :  { %v2683_v27 = vpop.f32.mrf.mxu0 }
 0x293   :  { %v2684_v45 = vpop.f32.mrf.mxu0 }
 0x296   :  { %v2686_v49 = vpop.f32.mrf.mxu0 }
 0x298   :  { %v2687_v53 = vpop.f32.mrf.mxu0 }
 0x29c   :  { %v2689_v42 = vpop.f32.mrf.mxu0 }
 0x29e   :  { %v2690_v33 = vpop.f32.mrf.mxu0 }
 0x2a0   :  { %v2724_v46 = vpop.f32.mrf.mxu0 }
 0x2a2   :  { %v2725_v56 = vpop.f32.mrf.mxu0 }
 0x2a3   :  { %v2726_v15 = vadd.f32 %v2725_v56, %v2724_v46  ;;  %v2691_v56 = vadd.f32 %v2690_v33, %v2689_v42 }
 0x2a4   :  { %v2727_v47 = vpop.f32.mrf.mxu0 }
 0x2a6   :  { %v2728_v62 = vpop.f32.mrf.mxu0 }
 0x2a7   :  { %v5677_v16 = vadd.f32 %v2728_v62, %v2727_v47 }
 0x2a8   :  { %v5687_v18 = vpop.f32.mrf.mxu0 }
 0x2aa   :  { %v5691_v59 = vpop.f32.mrf.mxu0 }
 0x2ac   :  { %v5695_v25 = vpop.f32.mrf.mxu0 }
 0x2ae   :  { %v1877_v37 = vpop.f32.mrf.mxu1  ;;  %v5699_v26 = vpop.f32.mrf.mxu0 }
 0x2af   :  { %v5681_v2 = vadd.f32 %v2655_v38, %v1877_v37  ;;  %v2688_v37 = vadd.f32 %v2687_v53, %v2686_v49 }
 0x2b0   :  { %v1879_v9 = vpop.f32.mrf.mxu1  ;;  %v5701_v36 = vpop.f32.mrf.mxu0 }
 0x2b2   :  { %v1882_v22 = vpop.f32.mrf.mxu1  ;;  %v5703_v58 = vpop.f32.mrf.mxu0 }
 0x2b3   :  { %v5683_v51 = vadd.f32 %v2658_v6, %v1882_v22 }
 0x2b4   :  { %v1884_v48 = vpop.f32.mrf.mxu1  ;;  %v5705_v14 = vpop.f32.mrf.mxu0 }
 0x2b5   :  { %v2685_v48 = vadd.f32 %v2684_v45, %v2683_v27  ;;  %v2679_v27 = vadd.f32 %v5671_v32, %v5669_v7  ;;  %v2673_v7 = vadd.f32 %v5663_v21, %v5661_v60  ;;  %v2667_v60 = vadd.f32 %v5655_v17, %v5653_v19 }
 0x2b6   :  { %v5685_v5 = vpop.f32.mrf.mxu1  ;;  %v5707_v1 = vpop.f32.mrf.mxu0  ;;  %v2661_v19 = vadd.f32 %v5647_v55, %v5645_v20 }
 0x2b8   :  { %v1889_v52 = vpop.f32.mrf.mxu1  ;;  %v5709_v31 = vpop.f32.mrf.mxu0 }
 0x2ba   :  { %v5689_v4 = vpop.f32.mrf.mxu1  ;;  %v5711_v47 = vpop.f32.mrf.mxu0 }
 0x2bc   :  { %v1894_v57 = vpop.f32.mrf.mxu1 }
 0x2bd   :  { %v5714_v57 = vpop.f32.mrf.mxu0 }
 0x2be   :  { %v5693_v0 = vpop.f32.mrf.mxu1 }
 0x2bf   :  { %v5724_v49 = vpop.f32.mrf.mxu0 }
 0x2c0   :  { %v1899_v63 = vpop.f32.mrf.mxu1 }
 0x2c2   :  { %v5697_v35 = vpop.f32.mrf.mxu1 }
 0x2c4   :  { %v1904_v24 = vpop.f32.mrf.mxu1 }
 0x2c5   :  { %v2682_v24 = vadd.f32 %v5675_v39, %v5673_v41  ;;  %v2676_v41 = vadd.f32 %v5667_v23, %v5665_v50  ;;  %v2670_v50 = vadd.f32 %v5659_v43, %v5657_v28  ;;  %v2664_v28 = vadd.f32 %v5651_v3, %v5649_v34 }
 0x2c6   :  { %v1907_v29 = vpop.f32.mrf.mxu1  ;;  %v1898_v43 = vadd.f32 %v2667_v60, %v5693_v0  ;;  %v1888_v0 = vadd.f32 %v2661_v19, %v5685_v5 }
 0x2c7   :  { %v1908_v23 = vadd.f32 %v2673_v7, %v1907_v29  ;;  %v1903_v21 = vadd.f32 %v2670_v50, %v5697_v35  ;;  %v1893_v17 = vadd.f32 %v2664_v28, %v5689_v4  ;;  %v2744_v28 = vadd.f32 %v5711_v47, %v5709_v31 }
 0x2c8   :  { %v1909_v40 = vpop.f32.mrf.mxu1  ;;  %v2735_v31 = vadd.f32 %v5699_v26, %v5695_v25 }
 0x2ca   :  { %v1912_v44 = vpop.f32.mrf.mxu1 }
 0x2cb   :  { %v1913_v32 = vadd.f32 %v2676_v41, %v1912_v44 }
 0x2cc   :  { %v1914_v10 = vpop.f32.mrf.mxu1 }
 0x2ce   :  { %v1917_v11 = vpop.f32.mrf.mxu1 }
 0x2cf   :  { %v1918_v39 = vadd.f32 %v2679_v27, %v1917_v11 }
 0x2d0   :  { %v1919_v12 = vpop.f32.mrf.mxu1 }
 0x2d1   :  { %v6166_v12 = vld [vmem:[#allocation8_spill] sm:$0xff] }
 0x2d2   :  { %v2260_v44 = vmul.u32 49, %v6166_v12 }
 0x2d3   :  { %v1922_v8 = vpop.f32.mrf.mxu1 }
 0x2d4   :  { %v1923_v45 = vadd.f32 %v2682_v24, %v1922_v8  ;;  %v2262_v8 = vadd.s32 1, %v6166_v12  ;;  %vm5761_vm2 = vcmp.ge.s32.totalorder %v4474_v54, %v2260_v44  ;;  %v2747_v44 = vadd.f32 %v5724_v49, %v5714_v57 }
 0x2d5   :  { %v1924_v61 = vpop.f32.mrf.mxu1  ;;  %v2738_v57 = vadd.f32 %v5703_v58, %v5701_v36 }
 0x2d6   :  { %v5736_v61 = vpop.f32.mrf.mxu0  ;;  %v2263_v11 = vmul.u32 49, %v2262_v8 }
 0x2d7   :  { %v1927_v38 = vpop.f32.mrf.mxu1 }
 0x2d8   :  { %v1928_v42 = vadd.f32 %v2685_v48, %v1927_v38  ;;  %vm2264_vm0 = vcmp.lt.s32.totalorder %v4474_v54, %v2263_v11 }
 0x2d9   :  { %v1929_v13 = vpop.f32.mrf.mxu1  ;;  %vm2265_vm3 = vmand %vm5761_vm2, %vm2264_vm0 }
 0x2da   :  { %v5748_v13 = vpop.f32.mrf.mxu0  ;;  %v5776_v54 = vsel %vm2265_vm3, 1.0, %v5952_v30 }
 0x2db   :  { %v1932_v6 = vpop.f32.mrf.mxu1  ;;  %v2750_v60 = vadd.f32 %v5748_v13, %v5736_v61  ;;  %v2741_v61 = vadd.f32 %v5707_v1, %v5705_v14  ;;  %v2732_v14 = vadd.f32 %v5691_v59, %v5687_v18  ;;  %v2615_v18 = vld [vmem:[%s5834_s6] ss:$0 sm:$0xff] }
 0x2dc   :  { %v1933_v52 = vadd.f32 %v2688_v37, %v1932_v6  ;;  %v2751_v34 = vpop.f32.mrf.mxu0 }
 0x2dd   :  { %v1934_v46 = vpop.f32.mrf.mxu1 }
 0x2de   :  { %v2752_v20 = vpop.f32.mrf.mxu0 }
 0x2df   :  { %v1937_v62 = vpop.f32.mrf.mxu1 }
 0x2e0   :  { %v1938_v9 = vadd.f32 %v2691_v56, %v1937_v62  ;;  %v2754_v5 = vpop.f32.mrf.mxu0 }
 0x2e1   :  { %v1939_v22 = vpop.f32.mrf.mxu1 }
 0x2e2   :  { %2792 = vmatpush3.msk.msra.mxu0 %vm2279_vm5, %v1938_v9  ;;  %v2755_v37 = vpop.f32.mrf.mxu0 }
 0x2e3   :  { %v2196_v63 = vpop.f32.mrf.mxu1  ;;  %2793 = vmatprep.subr.mxu0 %v5952_v30  ;;  %v2756_v8 = vadd.f32 %v2755_v37, %v2754_v5 }
 0x2e4   :  { %v5719_v33 = vadd.f32 %v2726_v15, %v2196_v63  ;;  %2794 = vmatpush3.msra.mxu0 %v1933_v52  ;;  %v2757_v48 = vpop.f32.mrf.mxu0 }
 0x2e5   :  { %v2198_v40 = vpop.f32.mrf.mxu1  ;;  %2795 = vmatprep.subr.mxu0 %v5952_v30 }
 0x2e6   :  { %2796 = vmatpush3.msra.mxu0 %v1928_v42  ;;  %v2758_v63 = vpop.f32.mrf.mxu0 }
 0x2e7   :  { %v2201_v53 = vpop.f32.mrf.mxu1  ;;  %2797 = vmatprep.subr.mxu0 %v5952_v30  ;;  %v2759_v7 = vadd.f32 %v2758_v63, %v2757_v48 }
 0x2e8   :  { %v5730_v15 = vadd.f32 %v5677_v16, %v2201_v53  ;;  %2798 = vmatpush3.msra.mxu0 %v1923_v45  ;;  %v2760_v40 = vpop.f32.mrf.mxu0 }
 0x2e9   :  { %v2203_v10 = vpop.f32.mrf.mxu1  ;;  %2799 = vmatprep.subr.mxu0 %v5952_v30 }
 0x2ea   :  { %2800 = vmatpush3.msra.mxu0 %v1918_v39  ;;  %v2761_v53 = vpop.f32.mrf.mxu0 }
 0x2eb   :  { %v5738_v38 = vpop.f32.mrf.mxu1  ;;  %2801 = vmatprep.subr.mxu0 %v5952_v30  ;;  %v2762_v39 = vadd.f32 %v2761_v53, %v2760_v40 }
 0x2ec   :  { %2802 = vmatpush3.msra.mxu0 %v1913_v32  ;;  %v2207_v36 = vadd.f32 %v2732_v14, %v5738_v38 }
 0x2ed   :  { %v2208_v16 = vpop.f32.mrf.mxu1  ;;  %2803 = vmatprep.subr.mxu0 %v5952_v30 }
 0x2ee   :  { %2804 = vmatpush3.msra.mxu0 %v1908_v23  ;;  %v2753_v23 = vadd.f32 %v2752_v20, %v2751_v34 }
 0x2ef   :  { %v5750_v6 = vpop.f32.mrf.mxu1  ;;  %2805 = vmatprep.subr.mxu0 %v5952_v30 }
 0x2f0   :  { %2806 = vmatpush3.msra.mxu0 %v1903_v21  ;;  %v2212_v1 = vadd.f32 %v2735_v31, %v5750_v6 }
 0x2f1   :  { %v2213_v29 = vpop.f32.mrf.mxu1  ;;  %2807 = vmatprep.subr.mxu0 %v5952_v30 }
 0x2f2   :  { %2808 = vmatpush3.msra.mxu0 %v1898_v43 }
 0x2f3   :  { %v5766_v3 = vpop.f32.mrf.mxu1  ;;  %2809 = vmatprep.subr.mxu0 %v5952_v30 }
 0x2f4   :  { %2810 = vmatpush3.msra.mxu0 %v1893_v17  ;;  %v2217_v47 = vadd.f32 %v2738_v57, %v5766_v3 }
 0x2f5   :  { %v2218_v46 = vpop.f32.mrf.mxu1  ;;  %2811 = vmatprep.subr.mxu0 %v5952_v30 }
 0x2f6   :  { %2812 = vmatpush3.msra.mxu0 %v1888_v0 }
 0x2f7   :  { %v2221_v55 = vpop.f32.mrf.mxu1  ;;  %2813 = vmatprep.subr.mxu0 %v5952_v30 }
 0x2f8   :  { %2814 = vmatpush3.msra.mxu0 %v5683_v51  ;;  %v2222_v49 = vadd.f32 %v2741_v61, %v2221_v55 }
 0x2f9   :  { %v2223_v4 = vpop.f32.mrf.mxu1  ;;  %2815 = vmatprep.subr.mxu0 %v5952_v30 }
 0x2fa   :  { %2816 = vmatpush3.msra.mxu0 %v5681_v2 }
 0x2fb   :  { %v2226_v56 = vpop.f32.mrf.mxu1  ;;  %2818 = vmatmul.mubr.msk.f32.vlgmr.msra.gmra.mxu0 %vm2275_vm14, %v5776_v54 }
 0x2fc   :  { %v2227_v13 = vadd.f32 %v2744_v28, %v2226_v56 }
 0x2fd   :  { %v2228_v62 = vpop.f32.mrf.mxu1 }
 0x2ff   :  { %v2231_v9 = vpop.f32.mrf.mxu1 }
 0x300   :  { %v2232_v43 = vadd.f32 %v2747_v44, %v2231_v9 }
 0x301   :  { %v2233_v22 = vpop.f32.mrf.mxu1 }
 0x303   :  { %v2236_v51 = vpop.f32.mrf.mxu1 }
 0x304   :  { %v2237_v11 = vadd.f32 %v2750_v60, %v2236_v51 }
 0x305   :  { %v2238_v52 = vpop.f32.mrf.mxu1 }
 0x307   :  { %v2241_v24 = vpop.f32.mrf.mxu1 }
 0x308   :  { %v2242_v21 = vadd.f32 %v2753_v23, %v2241_v24 }
 0x309   :  { %v2243_v42 = vpop.f32.mrf.mxu1 }
 0x30b   :  { %v2246_v27 = vpop.f32.mrf.mxu1 }
 0x30c   :  { %v2247_v16 = vadd.f32 %v2756_v8, %v2246_v27 }
 0x30d   :  { %v2248_v45 = vpop.f32.mrf.mxu1 }
 0x30f   :  { %v2251_v2 = vpop.f32.mrf.mxu1 }
 0x310   :  { %v2252_v50 = vadd.f32 %v2759_v7, %v2251_v2 }
 0x311   :  { %v2253_v41 = vpop.f32.mrf.mxu1 }
 0x313   :  { %v2256_v10 = vpop.f32.mrf.mxu1 }
 0x314   :  { %v2257_v32 = vadd.f32 %v2762_v39, %v2256_v10 }
 0x315   :  { %v2258_v12 = vpop.f32.mrf.mxu1 }
 0x316   :  { %2821 = vmatpush3.msk.msra.mxu1 %vm2279_vm5, %v2257_v32 }
 0x317   :  { %2822 = vmatprep.subr.mxu1 %v5952_v30 }
 0x318   :  { %2823 = vmatpush3.msra.mxu1 %v2252_v50 }
 0x319   :  { %2824 = vmatprep.subr.mxu1 %v5952_v30 }
 0x31a   :  { %2825 = vmatpush3.msra.mxu1 %v2247_v16 }
 0x31b   :  { %2826 = vmatprep.subr.mxu1 %v5952_v30 }
 0x31c   :  { %2827 = vmatpush3.msra.mxu1 %v2242_v21 }
 0x31d   :  { %2828 = vmatprep.subr.mxu1 %v5952_v30 }
 0x31e   :  { %2829 = vmatpush3.msra.mxu1 %v2237_v11 }
 0x31f   :  { %2830 = vmatprep.subr.mxu1 %v5952_v30 }
 0x320   :  { %2831 = vmatpush3.msra.mxu1 %v2232_v43 }
 0x321   :  { %2832 = vmatprep.subr.mxu1 %v5952_v30 }
 0x322   :  { %2833 = vmatpush3.msra.mxu1 %v2227_v13 }
 0x323   :  { %2834 = vmatprep.subr.mxu1 %v5952_v30 }
 0x324   :  { %2835 = vmatpush3.msra.mxu1 %v2222_v49 }
 0x325   :  { %2836 = vmatprep.subr.mxu1 %v5952_v30 }
 0x326   :  { %2837 = vmatpush3.msra.mxu1 %v2217_v47 }
 0x327   :  { %2838 = vmatprep.subr.mxu1 %v5952_v30 }
 0x328   :  { %2839 = vmatpush3.msra.mxu1 %v2212_v1 }
 0x329   :  { %2840 = vmatprep.subr.mxu1 %v5952_v30 }
 0x32a   :  { %2841 = vmatpush3.msra.mxu1 %v2207_v36 }
 0x32b   :  { %2842 = vmatprep.subr.mxu1 %v5952_v30 }
 0x32c   :  { %2843 = vmatpush3.msra.mxu1 %v5730_v15 }
 0x32d   :  { %2844 = vmatprep.subr.mxu1 %v5952_v30 }
 0x32e   :  { %2845 = vmatpush3.msra.mxu1 %v5719_v33 }
 0x32f   :  { %2847 = vmatmul.mubr.msk.f32.vlgmr.msra.gmra.mxu1 %vm2275_vm14, %v5776_v54 }
 0x3bb   :  { %v2349_v59 = vpop.f32.mrf.mxu0 }
 0x3bc   :  { %v2350_v25 = vadd.f32 %v2615_v18, %v2349_v59 }
 0x3bd   :  { %v2819_v26 = vpop.f32.mrf.mxu0 }
 0x3be   :  { %2354 = vst.msk [vmem:[#allocation2] sm:$0x3] %vm2353_vm15, %v2350_v25 }
 0x3bf   :  { %2866 = shalt.err (!%p2863_p4)
}
 0x3c0   :  { %2446 = dma.vmem_to_hbm [thread:$0]  %s2444_s14, 32, %s5836_s8, [#allocation3]   ;;  %v2618_v30 = vld [vmem:[%s5835_s7] ss:$0 sm:$0xff]  ;;  %vm2435_vm9 = vcmask 25600  }
 0x3c1   :  { %s2902_s18 = smov [#allocation4]  }
 0x3c2   :  { %s2453_s19 = sshll.u32 %s2902_s18, 4  ;;  %s2454_s19 = int_to_ptr.vmem [resolvable:$true] %s2453_s19 }
 0x3c3   :  { %s2875_s20 = scalar_lea.vmem %s2454_s19, 32  ;;  %p2880_p6 = scmp.lt.s32.totalorder %s2454_s19, %s2454_s19 }
 0x3c4   :  { %p2876_p5 = scmp.ne.s32.totalorder %s2454_s19, %s2875_s20  ;;  %p2881_p7 = scmp.lt.s32.totalorder %s2875_s20, %s2875_s20 }
 0x3c6   :  { %p2882_p8 = por %p2881_p7, %p2880_p6 }
 0x3c8   :  { %p2883_p9 = pnand %p2882_p8, %p2876_p5 }
 0x3ef   :  { %v2431_v58 = vpop.f32.mrf.mxu1 }
 0x3f0   :  { %v2432_v33 = vadd.f32 %v2618_v30, %v2431_v58 }
 0x3f1   :  { %v2848_v15 = vpop.f32.mrf.mxu1 }
 0x3f2   :  { %2436 = vst.msk [vmem:[#allocation4] sm:$0x3] %vm2435_vm9, %v2432_v33 }
 0x3f3   :  { %2886 = shalt.err (!%p2883_p9)
}
 0x3f4   :  { %2456 = dma.vmem_to_hbm [thread:$0]  %s2454_s19, 32, %s5837_s9, [#allocation5]  }
 0x3f5   :  { %2895 = dma.done.wait [#allocation3], 32  }
 0x3f6   :  { %2896 = vsyncadd [#allocation3], 4294967264 }
 0x3f7   :  { %2897 = dma.done.wait [#allocation5], 32  }
 0x3f8   :  { %2898 = vsyncadd [#allocation5], 4294967264 }
 0x3f9   :  { %2463 = vsyncpa [#allocation3], 1 }
 0x3fa   :  { %2464 = vsyncpa [#allocation5], 1 }

</bundles_post_ra>
